<compile_context>
chip_gen: v5e
topology: v5e:2x2
jax: 0.10.0
libtpu: 0.0.40
codegen_flags: <defaults>
</compile_context>

<pallas_src>
import functools

import jax
import jax.numpy as jnp
from jax.experimental import pallas as pl
from jax.experimental.pallas import tpu as pltpu


def _mlp_kernel(x_ref, w1_ref, w2_ref, w3_ref, w4_ref, bias_ref, o_ref):
    """Fused 4-layer (Linear + ReLU) forward for one batch tile.

    Weights arrive already in the MXU compute dtype (bf16); the four biases are
    packed row-wise into one resident f32 (8, maxF) block.  Each layer: cast
    activations to bf16 -> MXU matmul with f32 accumulation -> f32 bias add ->
    ReLU.
    """
    H = w1_ref.shape[1]
    F1 = w4_ref.shape[1]
    compute_dtype = w1_ref.dtype

    def layer(h, w_ref, bias_row, bias_cols):
        y = jnp.dot(h.astype(compute_dtype), w_ref[...],
                    preferred_element_type=jnp.float32)
        b = bias_ref[bias_row:bias_row + 1, :bias_cols]   # (1, cols), f32
        return jnp.maximum(y + b, 0.0)

    h = layer(x_ref[...], w1_ref, 0, H)
    h = layer(h, w2_ref, 1, H)
    h = layer(h, w3_ref, 2, H)
    h = layer(h, w4_ref, 3, F1)

    o_ref[...] = h.astype(o_ref.dtype)


@functools.partial(jax.jit, static_argnames=("block_b",))
def dense_autoencoder_forward(x, kparams, block_b=1024):
    """x: (B, nfeatures1) float32.  kparams: dict from prepare_params()."""
    B, F1 = x.shape
    H = kparams["w1"].shape[1]          # 128
    maxF = max(H, F1)
    assert kparams["w4"].shape[1] == F1
    # Lane-dense invariant: ragged last dims force masked partial stores.
    assert F1 % 128 == 0, "nfeatures1 must be a multiple of 128"
    assert H % 128 == 0

    # ---- Batch tile selection ---------------------------------------------
    # Big tiles amortize per-step overhead and improve DMA efficiency, but we
    # also want >= 4 grid steps when B allows, so x/out DMAs overlap compute
    # and both v7x TensorCores get >= 2 steps each.
    MIN_TILE = 128
    TARGET_STEPS = 4
    bb = min(block_b, B)
    if B // TARGET_STEPS >= MIN_TILE:
        bb = min(bb, pl.cdiv(B, TARGET_STEPS))
    if bb >= 8:
        bb -= bb % 8                     # f32 sublane multiple
    bb = max(bb, 1)

    # Pad B to a multiple of bb so the last tile needs no masked stores and no
    # wasted MXU work on garbage rows beyond the pad (pad rows are zeros).
    B_pad = pl.cdiv(B, bb) * bb
    if B_pad != B:
        x = jnp.pad(x, ((0, B_pad - B), (0, 0)))
    grid = (B_pad // bb,)

    # ---- VMEM budget / limit ------------------------------------------------
    bytes_weights = (F1 * H + 2 * H * H + H * F1) * 2      # bf16, single-buffered
    bytes_bias = 8 * maxF * 4                               # packed biases, f32
    bytes_io = 2 * 2 * bb * F1 * 4                          # x + out, double-buffered
    vmem_bytes = bytes_weights + bytes_bias + bytes_io
    # v7x has only 64 MiB physical VMEM per TC -> keep comfortable headroom.
    assert vmem_bytes < 48 * 1024 * 1024, \
        "working set too big for v7x VMEM; tile w1/w4 (see TODO at top)"
    vmem_limit = int(min(max(2 * vmem_bytes, 8 << 20), 48 << 20))

    # ---- Specs ---------------------------------------------------------------
    def resident(shape):
        # Constant block index across the grid -> fetched once; single-buffered
        # so the double-buffer copy isn't wasted VMEM.
        return pl.BlockSpec(shape, lambda i: (0,) * len(shape),
                            pipeline_mode=pl.Buffered(1))

    in_specs = [
        pl.BlockSpec((bb, F1), lambda i: (i, 0)),       # x tile (double-buffered)
        resident((F1, H)),                              # w1
        resident((H, H)),                               # w2
        resident((H, H)),                               # w3
        resident((H, F1)),                              # w4
        resident((8, maxF)),                            # packed biases b1..b4
    ]
    out_specs = pl.BlockSpec((bb, F1), lambda i: (i, 0))

    flops = 2 * B_pad * (F1 * H + H * H + H * H + H * F1)
    bytes_accessed = (B_pad * F1 * 4 * 2                # x in + out (f32 streams)
                      + bytes_weights + bytes_bias)
    cost = pl.CostEstimate(flops=flops, transcendentals=0,
                           bytes_accessed=bytes_accessed)

    out = pl.pallas_call(
        _mlp_kernel,
        out_shape=jax.ShapeDtypeStruct((B_pad, F1), x.dtype),
        grid_spec=pl.GridSpec(grid=grid, in_specs=in_specs, out_specs=out_specs),
        compiler_params=pltpu.CompilerParams(
            dimension_semantics=("parallel",),
            vmem_limit_bytes=vmem_limit),
        cost_estimate=cost,
    )(x, kparams["w1"], kparams["w2"], kparams["w3"], kparams["w4"],
      kparams["bias"])

    if B_pad != B:
        out = out[:B]
    return out


def init_params(key, nfeatures1, nfeatures2=128, dtype=jnp.float32):
    """Deterministic init mimicking nn.Linear (uniform(-1/sqrt(in), 1/sqrt(in))).

    Weights are stored TRANSPOSED relative to PyTorch, i.e. shape (in, out),
    so the forward computes x @ W + b.  Biases are stored as (1, out).
    """
    dims = [(nfeatures1, nfeatures2),
            (nfeatures2, nfeatures2),
            (nfeatures2, nfeatures2),
            (nfeatures2, nfeatures1)]
    params = {}
    for idx, (fan_in, fan_out) in enumerate(dims, start=1):
        key, kw, kb = jax.random.split(key, 3)
        bound = 1.0 / (fan_in ** 0.5)
        params[f"w{idx}"] = jax.random.uniform(
            kw, (fan_in, fan_out), dtype, minval=-bound, maxval=bound)
        params[f"b{idx}"] = jax.random.uniform(
            kb, (1, fan_out), dtype, minval=-bound, maxval=bound)
    return params


def prepare_params(params, compute_dtype=jnp.bfloat16):
    """One-time (outside the jitted per-call path) param preparation.

    Casts weights to the MXU compute dtype and packs the four f32 bias vectors
    row-wise into a single (8, maxF) block (rows 0..3 = b1..b4, zero padded).
    """
    H = params["w1"].shape[1]
    F1 = params["w4"].shape[1]
    maxF = max(H, F1)
    bias = jnp.zeros((8, maxF), jnp.float32)
    for i in range(4):
        b = params[f"b{i + 1}"].reshape(-1).astype(jnp.float32)
        bias = bias.at[i, :b.shape[0]].set(b)
    return {
        "w1": params["w1"].astype(compute_dtype),
        "w2": params["w2"].astype(compute_dtype),
        "w3": params["w3"].astype(compute_dtype),
        "w4": params["w4"].astype(compute_dtype),
        "bias": bias,
    }


def reference_forward_f32(x, params):
    """Pure-JAX f32 reference of the PyTorch forward."""
    h = x
    for i in range(1, 5):
        h = jnp.maximum(h @ params[f"w{i}"] + params[f"b{i}"], 0.0)
    return h


def reference_forward_bf16(x, params):
    """Reference matching the kernel's numerics (bf16 matmul, f32 accumulate)."""
    h = x
    for i in range(1, 5):
        y = jnp.dot(h.astype(jnp.bfloat16),
                    params[f"w{i}"].astype(jnp.bfloat16),
                    preferred_element_type=jnp.float32)
        h = jnp.maximum(y + params[f"b{i}"], 0.0)
    return h


if __name__ == "__main__":
    key = jax.random.PRNGKey(0)
    k_x, k_p = jax.random.split(key)

    B = 2048           # -> 4 grid steps of 512 rows: >=2 steps per v7x TC for
                       #    DMA/compute overlap, and bb >= 512 for v5e/v6e.
    NFEATURES1 = 256   # flattened input features, multiple of 128

    x = jax.random.normal(k_x, (B, NFEATURES1), dtype=jnp.float32)
    params_f32 = init_params(k_p, NFEATURES1)
    # Weights -> bf16 and biases packed ONCE, outside the per-call jitted path.
    kparams = prepare_params(params_f32)

    out = dense_autoencoder_forward(x, kparams)
    out = jax.block_until_ready(out)

    assert out.shape == (B, NFEATURES1)
    assert out.dtype == jnp.float32

    # Tight check vs a reference with matching bf16-matmul / f32-accum numerics.
    ref_bf16 = reference_forward_bf16(x, params_f32)
    assert jnp.allclose(out, ref_bf16, atol=1e-2, rtol=1e-2), \
        "mismatch vs bf16-matmul JAX reference"

    # Looser check vs the full-f32 PyTorch-equivalent reference.
    ref_f32 = reference_forward_f32(x, params_f32)
    assert jnp.allclose(out, ref_f32, atol=5e-2, rtol=5e-2), \
        "mismatch vs f32 JAX reference"

    print("KERNEL_OK")
</pallas_src>

<mosaic_0001>
module attributes {stable_mosaic.version = 11 : i64} {
  func.func @_mlp_kernel(%arg0: i32, %arg1: memref<512x256xf32, #tpu.memory_space<vmem>>, %arg2: memref<256x128xbf16, #tpu.memory_space<vmem>>, %arg3: memref<128x128xbf16, #tpu.memory_space<vmem>>, %arg4: memref<128x128xbf16, #tpu.memory_space<vmem>>, %arg5: memref<128x256xbf16, #tpu.memory_space<vmem>>, %arg6: memref<8x256xf32, #tpu.memory_space<vmem>>, %arg7: memref<512x256xf32, #tpu.memory_space<vmem>>) attributes {dimension_semantics = [#tpu.dimension_semantics<parallel>], iteration_bounds = array<i64: 4>, scalar_prefetch = 0 : i64, scratch_operands = 0 : i64, tpu.core_type = #tpu.core_type<tc>, window_params = [{transform_indices = @transform_0, window_bounds = array<i64: 512, 256>}, {pipeline_mode = #tpu.pipeline_mode<synchronous>, transform_indices = @transform_1, window_bounds = array<i64: 256, 128>}, {pipeline_mode = #tpu.pipeline_mode<synchronous>, transform_indices = @transform_2, window_bounds = array<i64: 128, 128>}, {pipeline_mode = #tpu.pipeline_mode<synchronous>, transform_indices = @transform_3, window_bounds = array<i64: 128, 128>}, {pipeline_mode = #tpu.pipeline_mode<synchronous>, transform_indices = @transform_4, window_bounds = array<i64: 128, 256>}, {pipeline_mode = #tpu.pipeline_mode<synchronous>, transform_indices = @transform_5, window_bounds = array<i64: 8, 256>}, {transform_indices = @transform_6, window_bounds = array<i64: 512, 256>}]} {
    %c0 = arith.constant 0 : index
    %c0_0 = arith.constant 0 : index
    %0 = vector.load %arg1[%c0, %c0_0] : memref<512x256xf32, #tpu.memory_space<vmem>>, vector<512x256xf32>
    %1 = arith.truncf %0 : vector<512x256xf32> to vector<512x256xbf16>
    %c0_1 = arith.constant 0 : index
    %c0_2 = arith.constant 0 : index
    %2 = vector.load %arg2[%c0_1, %c0_2] : memref<256x128xbf16, #tpu.memory_space<vmem>>, vector<256x128xbf16>
    %cst = arith.constant dense<0.000000e+00> : vector<512x128xf32>
    %3 = tpu.matmul %1, %2, %cst {dimension_numbers = #tpu.dot_dimension_numbers<[1], [0], [0], [1], [0, 0, 1, 1], [], []>} : vector<512x256xbf16>, vector<256x128xbf16>, vector<512x128xf32> -> vector<512x128xf32>
    %c0_3 = arith.constant 0 : index
    %c0_4 = arith.constant 0 : index
    %4 = vector.load %arg6[%c0_3, %c0_4] : memref<8x256xf32, #tpu.memory_space<vmem>>, vector<1x128xf32>
    %5 = vector.broadcast %4 : vector<1x128xf32> to vector<512x128xf32>
    %6 = arith.addf %3, %5 : vector<512x128xf32>
    %cst_5 = arith.constant 0.000000e+00 : f32
    %7 = vector.broadcast %cst_5 : f32 to vector<512x128xf32>
    %8 = arith.maximumf %6, %7 : vector<512x128xf32>
    %9 = arith.truncf %8 : vector<512x128xf32> to vector<512x128xbf16>
    %c0_6 = arith.constant 0 : index
    %c0_7 = arith.constant 0 : index
    %10 = vector.load %arg3[%c0_6, %c0_7] : memref<128x128xbf16, #tpu.memory_space<vmem>>, vector<128x128xbf16>
    %cst_8 = arith.constant dense<0.000000e+00> : vector<512x128xf32>
    %11 = tpu.matmul %9, %10, %cst_8 {dimension_numbers = #tpu.dot_dimension_numbers<[1], [0], [0], [1], [0, 0, 1, 1], [], []>} : vector<512x128xbf16>, vector<128x128xbf16>, vector<512x128xf32> -> vector<512x128xf32>
    %c1 = arith.constant 1 : index
    %c0_9 = arith.constant 0 : index
    %12 = vector.load %arg6[%c1, %c0_9] : memref<8x256xf32, #tpu.memory_space<vmem>>, vector<1x128xf32>
    %13 = vector.broadcast %12 : vector<1x128xf32> to vector<512x128xf32>
    %14 = arith.addf %11, %13 : vector<512x128xf32>
    %cst_10 = arith.constant 0.000000e+00 : f32
    %15 = vector.broadcast %cst_10 : f32 to vector<512x128xf32>
    %16 = arith.maximumf %14, %15 : vector<512x128xf32>
    %17 = arith.truncf %16 : vector<512x128xf32> to vector<512x128xbf16>
    %c0_11 = arith.constant 0 : index
    %c0_12 = arith.constant 0 : index
    %18 = vector.load %arg4[%c0_11, %c0_12] : memref<128x128xbf16, #tpu.memory_space<vmem>>, vector<128x128xbf16>
    %cst_13 = arith.constant dense<0.000000e+00> : vector<512x128xf32>
    %19 = tpu.matmul %17, %18, %cst_13 {dimension_numbers = #tpu.dot_dimension_numbers<[1], [0], [0], [1], [0, 0, 1, 1], [], []>} : vector<512x128xbf16>, vector<128x128xbf16>, vector<512x128xf32> -> vector<512x128xf32>
    %c2 = arith.constant 2 : index
    %c0_14 = arith.constant 0 : index
    %20 = vector.load %arg6[%c2, %c0_14] : memref<8x256xf32, #tpu.memory_space<vmem>>, vector<1x128xf32>
    %21 = vector.broadcast %20 : vector<1x128xf32> to vector<512x128xf32>
    %22 = arith.addf %19, %21 : vector<512x128xf32>
    %cst_15 = arith.constant 0.000000e+00 : f32
    %23 = vector.broadcast %cst_15 : f32 to vector<512x128xf32>
    %24 = arith.maximumf %22, %23 : vector<512x128xf32>
    %25 = arith.truncf %24 : vector<512x128xf32> to vector<512x128xbf16>
    %c0_16 = arith.constant 0 : index
    %c0_17 = arith.constant 0 : index
    %26 = vector.load %arg5[%c0_16, %c0_17] : memref<128x256xbf16, #tpu.memory_space<vmem>>, vector<128x256xbf16>
    %cst_18 = arith.constant dense<0.000000e+00> : vector<512x256xf32>
    %27 = tpu.matmul %25, %26, %cst_18 {dimension_numbers = #tpu.dot_dimension_numbers<[1], [0], [0], [1], [0, 0, 1, 1], [], []>} : vector<512x128xbf16>, vector<128x256xbf16>, vector<512x256xf32> -> vector<512x256xf32>
    %c3 = arith.constant 3 : index
    %c0_19 = arith.constant 0 : index
    %28 = vector.load %arg6[%c3, %c0_19] : memref<8x256xf32, #tpu.memory_space<vmem>>, vector<1x256xf32>
    %29 = vector.broadcast %28 : vector<1x256xf32> to vector<512x256xf32>
    %30 = arith.addf %27, %29 : vector<512x256xf32>
    %cst_20 = arith.constant 0.000000e+00 : f32
    %31 = vector.broadcast %cst_20 : f32 to vector<512x256xf32>
    %32 = arith.maximumf %30, %31 : vector<512x256xf32>
    %c0_21 = arith.constant 0 : index
    %c0_22 = arith.constant 0 : index
    %33 = vector.load %arg7[%c0_21, %c0_22] : memref<512x256xf32, #tpu.memory_space<vmem>>, vector<512x256xf32>
    tpu.vector_store %arg7[%c0_21, %c0_22], %32 {strides = array<i32>} : memref<512x256xf32, #tpu.memory_space<vmem>>, vector<512x256xf32>,
    return
  }
  func.func @transform_0(%arg0: i32) -> (i32, i32) {
    %c0_i32 = arith.constant 0 : i32
    %c0_i32_0 = arith.constant 0 : i32
    return %arg0, %c0_i32 : i32, i32
  }
  func.func @transform_1(%arg0: i32) -> (i32, i32) {
    %c0_i32 = arith.constant 0 : i32
    %c0_i32_0 = arith.constant 0 : i32
    %c0_i32_1 = arith.constant 0 : i32
    return %c0_i32, %c0_i32_0 : i32, i32
  }
  func.func @transform_2(%arg0: i32) -> (i32, i32) {
    %c0_i32 = arith.constant 0 : i32
    %c0_i32_0 = arith.constant 0 : i32
    %c0_i32_1 = arith.constant 0 : i32
    return %c0_i32, %c0_i32_0 : i32, i32
  }
  func.func @transform_3(%arg0: i32) -> (i32, i32) {
    %c0_i32 = arith.constant 0 : i32
    %c0_i32_0 = arith.constant 0 : i32
    %c0_i32_1 = arith.constant 0 : i32
    return %c0_i32, %c0_i32_0 : i32, i32
  }
  func.func @transform_4(%arg0: i32) -> (i32, i32) {
    %c0_i32 = arith.constant 0 : i32
    %c0_i32_0 = arith.constant 0 : i32
    %c0_i32_1 = arith.constant 0 : i32
    return %c0_i32, %c0_i32_0 : i32, i32
  }
  func.func @transform_5(%arg0: i32) -> (i32, i32) {
    %c0_i32 = arith.constant 0 : i32
    %c0_i32_0 = arith.constant 0 : i32
    %c0_i32_1 = arith.constant 0 : i32
    return %c0_i32, %c0_i32_0 : i32, i32
  }
  func.func @transform_6(%arg0: i32) -> (i32, i32) {
    %c0_i32 = arith.constant 0 : i32
    %c0_i32_0 = arith.constant 0 : i32
    return %arg0, %c0_i32 : i32, i32
  }
}

</mosaic_0001>

<bundles_post_ra>
// kernel: dense_autoencoder_forward.1
= control target key start
LH: loop header
LB: loop body
LE: loop exit
PB: predicated region body
PF: predicated region fallthrough
CT: control target
= control target key end

     0   :  { %s4227_s0 = inlined_call_operand.hbm [shape: f32[2048,256], index: 0, kind: input, shape index: {}]   ;;  %s4228_s1 = inlined_call_operand.hbm [shape: bf16[256,128], index: 1, kind: input, shape index: {}]   ;;  %s4229_s2 = inlined_call_operand.hbm [shape: bf16[128,128], index: 2, kind: input, shape index: {}]   ;;  %s4230_s3 = inlined_call_operand.hbm [shape: bf16[128,128], index: 3, kind: input, shape index: {}]   ;;  %s4231_s4 = inlined_call_operand.hbm [shape: bf16[128,256], index: 4, kind: input, shape index: {}]   ;;  %s4232_s5 = inlined_call_operand.hbm [shape: f32[8,256], index: 5, kind: input, shape index: {}]   ;;  %s4233_s6 = inlined_call_operand.hbm [shape: f32[2048,256], index: 6, kind: output, shape index: {}]  }
   0x1   :  { %4234 = sst [smem:[#allocation19_spill]] %s4228_s1 }
   0x2   :  { %11 = vsyncpa [#allocation3], 0 }
   0x3   :  { %13 = vsyncpa [#allocation3 + $0x1], 0 }
   0x4   :  { %14 = vsyncpa [#allocation6], 0 }
   0x5   :  { %15 = vsyncpa [#allocation9], 0 }
   0x6   :  { %16 = vsyncpa [#allocation12], 0 }
   0x7   :  { %17 = vsyncpa [#allocation4], 0 }
   0x8   :  { %19 = vsyncpa [#allocation4 + $0x1], 0  ;;  %s3308_s21 = smov 0   ;;  %s3310_s22 = smov 0  }
   0x9   :  { %s3312_s23 = smov 0   ;;  %s3314_s24 = smov 0  }
   0xa LB: > { %s4235_s1 = sld [smem:[#allocation19_spill]]  ;;  %s3332_s28 = sadd.s32 4294967295, %s3258_s24   ;;  %s3258_s24 = sphi %s3314_s24, %s4246_s24   ;;  %s3254_s23 = sphi %s3312_s23, %s4245_s23   ;;  %s3250_s22 = sphi %s3310_s22, %s4244_s22   ;;  %s3246_s21 = sphi %s3308_s21, %s4243_s21  }
   0xb   : > { %p2607_p0 = scmp.ge.s32.totalorder %s3258_s24, 1  ;;  %p46_p1 = scmp.eq.s32.totalorder %s3332_s28, 0 }
   0xc   : > { %p187_p2 = scmp.lt.s32.totalorder %s3258_s24, 5  ;;  %s3260_s30 = smov [#allocation5]  }
   0xd   : > { %s200_s7 = sshll.u32 %s3260_s30, 4  ;;  %s226_s10 = sshll.u32 %s4230_s3, 4  ;;  %s201_s7 = int_to_ptr.vmem [resolvable:$true] %s200_s7  ;;  %s227_s10 = int_to_ptr.hbm [resolvable:$true] %s226_s10 }
   0xe   : > { %p3337_p3 = pnand %p2607_p0, %p187_p2  ;;  %s212_s14 = sshll.u32 %s4229_s2, 4  ;;  %s213_s14 = int_to_ptr.hbm [resolvable:$true] %s212_s14 }
   0xf   : > { %s3261_s15 = smov [#allocation8]   ;;  %s3262_s17 = smov 64  }
  0x10   : > { %s198_s27 = sshll.u32 %s4235_s1, 4  ;;  %p2916_p4 = pneg %p3337_p3  ;;  %s199_s27 = int_to_ptr.hbm [resolvable:$true] %s198_s27 }
  0x11   : > { %s228_s16 = sshll.u32 %s3261_s15, 4  ;;  %s3263_s18 = smov 4   ;;  %s229_s16 = int_to_ptr.vmem [resolvable:$true] %s228_s16 }
  0x12   : > { %p3348_p5 = pnand %p2916_p4, %p46_p1  ;;  %s240_s25 = sshll.u32 %s4231_s4, 4  ;;  %s241_s25 = int_to_ptr.hbm [resolvable:$true] %s240_s25 }
  0x13   : > { %s3264_s26 = smov [#allocation7]   ;;  %s3266_s8 = smov 128  }
  0x14   : > { %2919 = dma.hbm_to_vmem [thread:$0]  (!%p3348_p5), %s199_s27, 2048, %s201_s7, [#allocation6], %s3262_s17, %s3262_s17, %s3263_s18  }
  0x15   : > { %2925 = dma.hbm_to_vmem [thread:$0]  (!%p3348_p5), %s227_s10, 1024, %s229_s16, [#allocation9], %s3262_s17, %s3262_s17, %s3263_s18  }
  0x16   : > { %s214_s30 = sshll.u32 %s3264_s26, 4  ;;  %s3265_s27 = smov [#allocation10]   ;;  %s215_s30 = int_to_ptr.vmem [resolvable:$true] %s214_s30 }
  0x17   : > { %2922 = dma.hbm_to_vmem [thread:$0]  (!%p3348_p5), %s213_s14, 1024, %s215_s30, [#allocation6], %s3262_s17, %s3262_s17, %s3263_s18  }
  0x18   : > { %s242_s7 = sshll.u32 %s3265_s27, 4  ;;  %s3267_s9 = smov 8   ;;  %s243_s7 = int_to_ptr.vmem [resolvable:$true] %s242_s7 }
  0x19   : > { %2928 = dma.hbm_to_vmem [thread:$0]  (!%p3348_p5), %s241_s25, 2048, %s243_s7, [#allocation9], %s3266_s8, %s3266_s8, %s3267_s9  }
  0x1a   : > { %s255_s13 = sshll.u32 %s4232_s5, 4  ;;  %s3268_s14 = smov [#allocation11]   ;;  %s256_s13 = int_to_ptr.hbm [resolvable:$true] %s255_s13 }
  0x1b   : > { %s257_s15 = sshll.u32 %s3268_s14, 4  ;;  %s2606_s16 = sadd.s32 4294967294, %s3258_s24   ;;  %s258_s15 = int_to_ptr.vmem [resolvable:$true] %s257_s15 }
  0x1c   : > { %2931 = dma.hbm_to_vmem [thread:$0]  (!%p3348_p5), %s256_s13, 256, %s258_s15, [#allocation12]  }
  0x1d   : > { %s3373_s17 = sadd.s32 1, %s3258_s24   ;;  %s32_s18 = sadd.s32 1, %s3254_s23 }
  0x1e   : > { %s29_s19 = ssub.s32 %s3258_s24, %s3373_s17  ;;  %p39_p6 = scmp.ne.s32.totalorder %s3254_s23, %s3250_s22 }
  0x1f   : > { %p30_p7 = scmp.eq.s32.totalorder %s29_s19, 0  ;;  %p40_p8 = scmp.eq.s32.totalorder %s3258_s24, 0 }
  0x20   : > { %p45_p9 = scmp.ne.s32.totalorder %s3250_s22, %s3246_s21  ;;  %p174_p10 = scmp.eq.s32.totalorder %s3332_s28, 3 }
  0x21   : > { %s3385_s20 = scalar_select %p30_p7, %s3254_s23, %s32_s18  }
  0x22   : > { %p3387_p11 = por %p40_p8, %p39_p6  ;;  %p3393_p12 = por %p46_p1, %p45_p9 }
  0x23   : > { %p3397_p13 = por %p174_p10, %p39_p6  ;;  %p180_p0 = scmp.eq.s32.totalorder %s2606_s16, 3 }
  0x24   : > { %p2945_p2 = scmp.lt.s32.totalorder %s3258_s24, 4  ;;  %s268_s30 = sand.u32 1, %s3254_s23  }
  0x25   : > { %p3403_p4 = por %p180_p0, %p45_p9  ;;  %s2614_s7 = sshll.u32 %s268_s30, 10 }
  0x26   : > { %s2825_s8 = sshll.u32 %s3258_s24, 10  ;;  %s272_s14 = scalar_lea.vmem [#allocation2], %s2614_s7 }
  0x27   : > { %s278_s12 = scalar_lea.hbm %s4227_s0, %s2825_s8  ;;  %s281_s15 = sshll.u32 %s272_s14, 4  ;;  %s282_s15 = int_to_ptr.vmem [resolvable:$true] %s281_s15 }
  0x28   : > { %s279_s13 = sshll.u32 %s278_s12, 4  ;;  %p3413_p5 = pnand %p2945_p2, %p3387_p11  ;;  %s280_s13 = int_to_ptr.hbm [resolvable:$true] %s279_s13 }
  0x29   : > { %s269_s18 = scalar_lea.sflag [#allocation3], %s268_s30  ;;  %s3150_s19 = sshra.s32 %s280_s13, 4  ;;  %s3151_s19 = int_to_ptr.hbm [resolvable:$true] %s3150_s19 }
  0x2a   : > { %s3152_s1 = scalar_lea.hbm %s3151_s19, 1024  ;;  %p3154_p7 = pneg %p3413_p5 }
  0x2b   : > { %p3153_p6 = scmp.ne.s32.totalorder %s3151_s19, %s3152_s1  ;;  %s3157_s9 = scalar_lea.hbm %s4227_s0, 4096 }
  0x2c   : > { %p3158_p10 = scmp.lt.s32.totalorder %s3151_s19, %s4227_s0  ;;  %p3159_p11 = scmp.lt.s32.totalorder %s3157_s9, %s3152_s1 }
  0x2d   : > { %p3155_p8 = pnand %p3154_p7, %p3153_p6 }
  0x2e   : > { %p3160_p0 = por %p3159_p11, %p3158_p10 }
  0x2f   : > { %p3156_p9 = pneg %p3155_p8 }
  0x31   : > { %p3161_p2 = pnand %p3160_p0, %p3156_p9 }
  0x33   : > { %3164 = shalt.err (!%p3161_p2)
}
  0x34   : > { %s3269_s30 = smov 256   ;;  %s3270_s12 = smov 16  }
  0x35   : > { %2935 = dma.hbm_to_vmem [thread:$0]  (!%p3413_p5), %s280_s13, 16384, %s282_s15, %s269_s18, %s3269_s30, %s3269_s30, %s3270_s12  }
  0x36   : > { %293 = sbr.rel (%p3337_p3) target bundleno = 1285 (0x505), region = 44  ;;  %s3430_s14 = sand.u32 (!%p3337_p3), 1, %s3250_s22  }
  0x37   : > { %s2619_s19 = sshll.u32 (!%p3337_p3), %s3430_s14, 10  ;;  %s296_s1 = scalar_lea.sflag (!%p3337_p3), [#allocation3], %s3430_s14 }
  0x38   : > { %s3436_s8 = scalar_lea.vmem (!%p3337_p3), [#allocation2], %s2619_s19 }
  0x3b   : > { %3225 = dma.done.wait (%p3393_p12), %s296_s1, 16384  }
  0x3c   : > { %3227 = vsyncadd (%p3393_p12), %s296_s1, 4294950912 }
  0x3d   : > { %3229 = dma.done.wait (%p46_p1), [#allocation6], 3072  }
  0x3e   : > { %3231 = vsyncadd (%p46_p1), [#allocation6], 4294964224 }
  0x3f   : > { %3233 = dma.done.wait (%p46_p1), [#allocation9], 3072  }
  0x40   : > { %3235 = vsyncadd (%p46_p1), [#allocation9], 4294964224 }
  0x41   : > { %3237 = dma.done.wait (%p46_p1), [#allocation12], 256  }
  0x42   : > { %3239 = vsyncadd (%p46_p1), [#allocation12], 4294967040  ;;  %v2833_v0 = vld [vmem:[#allocation5 + $0x38] sm:$0xff]  ;;  %v2832_v2 = vld [vmem:[#allocation5 + $0x30] sm:$0xff]  ;;  %s3855_s29 = scalar_lea.vmem [#allocation13], %s2619_s19  ;;  %s2875_s11 = sshll.u32 %s3332_s28, 10 }
  0x43   : > { %v2841_v1 = vld [vmem:[#allocation5 + $0x78] sm:$0xff]  ;;  %2876 = vmatpush.bf16.msra.mxu2 %v2833_v0  ;;  %v2840_v3 = vld [vmem:[#allocation5 + $0x70] sm:$0xff]  ;;  %677 = vmatpush.bf16.msra.mxu0 %v2833_v0  ;;  %v2831_v4 = vld [vmem:[#allocation5 + $0x28] sm:$0xff]  ;;  %s2481_s16 = scalar_lea.hbm %s4233_s6, %s2875_s11  ;;  %s2482_s18 = sshll.u32 %s3855_s29, 4  ;;  %s2483_s18 = int_to_ptr.vmem [resolvable:$true] %s2482_s18 }
  0x44   : > { %2884 = vmatpush.bf16.msra.mxu3 %v2841_v1  ;;  %846 = vmatpush.bf16.msra.mxu1 %v2841_v1  ;;  %v2839_v5 = vld [vmem:[#allocation5 + $0x68] sm:$0xff]  ;;  %v2830_v6 = vld [vmem:[#allocation5 + $0x20] sm:$0xff]  ;;  %v2829_v8 = vld [vmem:[#allocation5 + $0x18] sm:$0xff]  ;;  %s2484_s7 = sshll.u32 %s2481_s16, 4  ;;  %s2469_s28 = scalar_lea.sflag [#allocation4], %s3430_s14  ;;  %s2485_s7 = int_to_ptr.hbm [resolvable:$true] %s2484_s7 }
  0x45   : > { %v2838_v7 = vld [vmem:[#allocation5 + $0x60] sm:$0xff]  ;;  %v2837_v9 = vld [vmem:[#allocation5 + $0x58] sm:$0xff]  ;;  %v2828_v10 = vld [vmem:[#allocation5 + $0x10] sm:$0xff]  ;;  %s3194_s9 = sshra.s32 %s2485_s7, 4  ;;  %s3200_s12 = scalar_lea.hbm %s4233_s6, 4096  ;;  %s3195_s9 = int_to_ptr.hbm [resolvable:$true] %s3194_s9 }
  0x46   : > { %v2836_v11 = vld [vmem:[#allocation5 + $0x50] sm:$0xff]  ;;  %v2827_v12 = vld [vmem:[#allocation5 + $0x8] sm:$0xff]  ;;  %v2826_v14 = vld [vmem:[#allocation5] sm:$0xff]  ;;  %s3196_s10 = scalar_lea.hbm %s3195_s9, 1024  ;;  %p3201_p5 = scmp.lt.s32.totalorder %s3195_s9, %s4233_s6 }
  0x47   : > { %2877 = vmatpush.bf16.msra.mxu2 %v2832_v2  ;;  %678 = vmatpush.bf16.msra.mxu0 %v2832_v2  ;;  %v2835_v13 = vld [vmem:[#allocation5 + $0x48] sm:$0xff]  ;;  %v2834_v15 = vld [vmem:[#allocation5 + $0x40] sm:$0xff]  ;;  %v422_v17 = vld [vmem:[%s3436_s8 + $0x210] sm:$0xff]  ;;  %p3197_p1 = scmp.ne.s32.totalorder %s3195_s9, %s3196_s10  ;;  %p3202_p6 = scmp.lt.s32.totalorder %s3200_s12, %s3196_s10 }
  0x48   : > { %2885 = vmatpush.bf16.msra.mxu3 %v2840_v3  ;;  %847 = vmatpush.bf16.msra.mxu1 %v2840_v3  ;;  %v420_v16 = vld [vmem:[%s3436_s8 + $0x200] sm:$0xff]  ;;  %v421_v18 = vld [vmem:[%s3436_s8 + $0x208] sm:$0xff]  ;;  %v423_v19 = vld [vmem:[%s3436_s8 + $0x218] sm:$0xff] }
  0x49   : > { %v2849_v20 = vld [vmem:[#allocation7 + $0x38] sm:$0xff]  ;;  %v516_v21 = vpack.c.bf16 %v422_v17, %v420_v16  ;;  %v517_v22 = vpack.c.bf16 %v423_v19, %v421_v18  ;;  %v2848_v23 = vld [vmem:[#allocation7 + $0x30] sm:$0xff]  ;;  %v424_v24 = vld [vmem:[%s3436_s8 + $0x220] sm:$0xff]  ;;  %p3198_p3 = pnand %p3197_p1, %p3397_p13  ;;  %p3203_p7 = por %p3202_p6, %p3201_p5 }
  0x4a   : > { %v426_v25 = vld [vmem:[%s3436_s8 + $0x230] sm:$0xff]  ;;  %v425_v26 = vld [vmem:[%s3436_s8 + $0x228] sm:$0xff]  ;;  %v427_v27 = vld [vmem:[%s3436_s8 + $0x238] sm:$0xff] }
  0x4b   : > { %2878 = vmatpush.bf16.msra.mxu2 %v2831_v4  ;;  %679 = vmatpush.bf16.msra.mxu0 %v2831_v4  ;;  %v518_v28 = vpack.c.bf16 %v426_v25, %v424_v24  ;;  %v519_v29 = vpack.c.bf16 %v427_v27, %v425_v26  ;;  %v428_v30 = vld [vmem:[%s3436_s8 + $0x240] sm:$0xff]  ;;  %v430_v31 = vld [vmem:[%s3436_s8 + $0x250] sm:$0xff]  ;;  %v429_v32 = vld [vmem:[%s3436_s8 + $0x248] sm:$0xff]  ;;  %p3199_p12 = pneg %p3198_p3 }
  0x4c   : > { %2886 = vmatpush.bf16.msra.mxu3 %v2839_v5  ;;  %848 = vmatpush.bf16.msra.mxu1 %v2839_v5  ;;  %v431_v33 = vld [vmem:[%s3436_s8 + $0x258] sm:$0xff]  ;;  %v520_v34 = vpack.c.bf16 %v430_v31, %v428_v30  ;;  %v2847_v36 = vld [vmem:[#allocation7 + $0x28] sm:$0xff]  ;;  %v432_v37 = vld [vmem:[%s3436_s8 + $0x260] sm:$0xff] }
  0x4d   : > { %v521_v35 = vpack.c.bf16 %v431_v33, %v429_v32  ;;  %v434_v38 = vld [vmem:[%s3436_s8 + $0x270] sm:$0xff]  ;;  %v433_v39 = vld [vmem:[%s3436_s8 + $0x268] sm:$0xff]  ;;  %v435_v40 = vld [vmem:[%s3436_s8 + $0x278] sm:$0xff]  ;;  %p3204_p8 = pnand %p3203_p7, %p3199_p12 }
  0x4e   : > { %v522_v41 = vpack.c.bf16 %v434_v38, %v432_v37  ;;  %v523_v42 = vpack.c.bf16 %v435_v40, %v433_v39  ;;  %v436_v43 = vld [vmem:[%s3436_s8 + $0x280] sm:$0xff]  ;;  %v438_v44 = vld [vmem:[%s3436_s8 + $0x290] sm:$0xff]  ;;  %v437_v45 = vld [vmem:[%s3436_s8 + $0x288] sm:$0xff] }
  0x4f   : > { %2879 = vmatpush.bf16.msra.mxu2 %v2830_v6  ;;  %680 = vmatpush.bf16.msra.mxu0 %v2830_v6  ;;  %v439_v46 = vld [vmem:[%s3436_s8 + $0x298] sm:$0xff]  ;;  %v524_v47 = vpack.c.bf16 %v438_v44, %v436_v43  ;;  %v2846_v49 = vld [vmem:[#allocation7 + $0x20] sm:$0xff]  ;;  %v358_v51 = vld [vmem:[%s3436_s8 + $0x10] sm:$0xff] }
  0x50   : > { %2887 = vmatpush.bf16.msra.mxu3 %v2838_v7  ;;  %849 = vmatpush.bf16.msra.mxu1 %v2838_v7  ;;  %v525_v48 = vpack.c.bf16 %v439_v46, %v437_v45  ;;  %v356_v50 = vld [vmem:[%s3436_s8] sm:$0xff]  ;;  %v357_v53 = vld [vmem:[%s3436_s8 + $0x8] sm:$0xff]  ;;  %v359_v54 = vld [vmem:[%s3436_s8 + $0x18] sm:$0xff] }
  0x51   : > { %v484_v52 = vpack.c.bf16 %v358_v51, %v356_v50  ;;  %v485_v55 = vpack.c.bf16 %v359_v54, %v357_v53  ;;  %v440_v56 = vld [vmem:[%s3436_s8 + $0x2a0] sm:$0xff]  ;;  %v442_v57 = vld [vmem:[%s3436_s8 + $0x2b0] sm:$0xff]  ;;  %v441_v58 = vld [vmem:[%s3436_s8 + $0x2a8] sm:$0xff] }
  0x52   : > { %v443_v59 = vld [vmem:[%s3436_s8 + $0x2b8] sm:$0xff]  ;;  %v526_v60 = vpack.c.bf16 %v442_v57, %v440_v56  ;;  %v360_v62 = vld [vmem:[%s3436_s8 + $0x20] sm:$0xff]  ;;  %v362_v63 = vld [vmem:[%s3436_s8 + $0x30] sm:$0xff] }
  0x53   : > { %2880 = vmatpush.bf16.msra.mxu2 %v2829_v8  ;;  %681 = vmatpush.bf16.msra.mxu0 %v2829_v8  ;;  %v527_v61 = vpack.c.bf16 %v443_v59, %v441_v58  ;;  %v361_v0 = vld [vmem:[%s3436_s8 + $0x28] sm:$0xff]  ;;  %v486_v1 = vpack.c.bf16 %v362_v63, %v360_v62  ;;  %v363_v2 = vld [vmem:[%s3436_s8 + $0x38] sm:$0xff]  ;;  %v444_v4 = vld [vmem:[%s3436_s8 + $0x2c0] sm:$0xff] }
  0x54   : > { %2888 = vmatpush.bf16.msra.mxu3 %v2837_v9  ;;  %850 = vmatpush.bf16.msra.mxu1 %v2837_v9  ;;  %v487_v3 = vpack.c.bf16 %v363_v2, %v361_v0  ;;  %v446_v5 = vld [vmem:[%s3436_s8 + $0x2d0] sm:$0xff]  ;;  %v445_v6 = vld [vmem:[%s3436_s8 + $0x2c8] sm:$0xff]  ;;  %v447_v7 = vld [vmem:[%s3436_s8 + $0x2d8] sm:$0xff] }
  0x55   : > { %v528_v8 = vpack.c.bf16 %v446_v5, %v444_v4  ;;  %v529_v9 = vpack.c.bf16 %v447_v7, %v445_v6  ;;  %v451_v17 = vld [vmem:[%s3436_s8 + $0x2f8] sm:$0xff]  ;;  %v365_v18 = vld [vmem:[%s3436_s8 + $0x48] sm:$0xff]  ;;  %v368_v24 = vld [vmem:[%s3436_s8 + $0x60] sm:$0xff] }
  0x56   : > { %v367_v19 = vld [vmem:[%s3436_s8 + $0x58] sm:$0xff]  ;;  %v370_v25 = vld [vmem:[%s3436_s8 + $0x70] sm:$0xff]  ;;  %v452_v26 = vld [vmem:[%s3436_s8 + $0x300] sm:$0xff] }
  0x57   : > { %2881 = vmatpush.bf16.msra.mxu2 %v2828_v10  ;;  %682 = vmatpush.bf16.msra.mxu0 %v2828_v10  ;;  %v2845_v10 = vld [vmem:[#allocation7 + $0x18] sm:$0xff]  ;;  %v454_v27 = vld [vmem:[%s3436_s8 + $0x310] sm:$0xff]  ;;  %v369_v31 = vld [vmem:[%s3436_s8 + $0x68] sm:$0xff] }
  0x58   : > { %2889 = vmatpush.bf16.msra.mxu3 %v2836_v11  ;;  %851 = vmatpush.bf16.msra.mxu1 %v2836_v11  ;;  %v364_v11 = vld [vmem:[%s3436_s8 + $0x40] sm:$0xff]  ;;  %v455_v30 = vld [vmem:[%s3436_s8 + $0x318] sm:$0xff]  ;;  %v374_v43 = vld [vmem:[%s3436_s8 + $0x90] sm:$0xff] }
  0x59   : > { %v371_v32 = vld [vmem:[%s3436_s8 + $0x78] sm:$0xff]  ;;  %v3506_v37 = vld [vmem:[#allocation11] ss:$0 sm:$0xff]  ;;  %v458_v45 = vld [vmem:[%s3436_s8 + $0x330] sm:$0xff] }
  0x5a   : > { %v491_v33 = vpack.c.bf16 %v371_v32, %v369_v31  ;;  %v456_v44 = vld [vmem:[%s3436_s8 + $0x320] sm:$0xff]  ;;  %v457_v46 = vld [vmem:[%s3436_s8 + $0x328] sm:$0xff]  ;;  %v375_v50 = vld [vmem:[%s3436_s8 + $0x98] sm:$0xff] }
  0x5b   : > { %2882 = vmatpush.bf16.msra.mxu2 %v2827_v12  ;;  %683 = vmatpush.bf16.msra.mxu0 %v2827_v12  ;;  %v366_v12 = vld [vmem:[%s3436_s8 + $0x50] sm:$0xff]  ;;  %v376_v2 = vld [vmem:[%s3436_s8 + $0xa0] sm:$0xff]  ;;  %v461_v6 = vld [vmem:[%s3436_s8 + $0x348] sm:$0xff] }
  0x5c   : > { %2890 = vmatpush.bf16.msra.mxu3 %v2835_v13  ;;  %852 = vmatpush.bf16.msra.mxu1 %v2835_v13  ;;  %v448_v13 = vld [vmem:[%s3436_s8 + $0x2e0] sm:$0xff]  ;;  %v488_v16 = vpack.c.bf16 %v366_v12, %v364_v11  ;;  %v462_v5 = vld [vmem:[%s3436_s8 + $0x350] sm:$0xff]  ;;  %v467_v32 = vld [vmem:[%s3436_s8 + $0x378] sm:$0xff] }
  0x5d   : > { %v460_v4 = vld [vmem:[%s3436_s8 + $0x340] sm:$0xff] }
  0x5f   : > { %2883 = vmatpush.bf16.msra.mxu2 %v2826_v14  ;;  %684 = vmatpush.bf16.msra.mxu0 %v2826_v14  ;;  %v450_v14 = vld [vmem:[%s3436_s8 + $0x2f0] sm:$0xff] }
  0x60   : > { %2891 = vmatpush.bf16.msra.mxu3 %v2834_v15  ;;  %853 = vmatpush.bf16.msra.mxu1 %v2834_v15  ;;  %v449_v15 = vld [vmem:[%s3436_s8 + $0x2e8] sm:$0xff] }
  0x62   : > { %765 = vmatmul.bf16.vlgmr.msra.gmra.mxu2 %v516_v21  ;;  %685 = vmatmul.bf16.vlgmr.msra.gmra.mxu0 %v484_v52  ;;  %v530_v21 = vpack.c.bf16 %v450_v14, %v448_v13 }
  0x63   : > { %1176 = vmatpush.bf16.msrb.mxu2 %v2849_v20  ;;  %934 = vmatmul.bf16.vlgmr.msra.gmra.mxu3 %v517_v22  ;;  %v489_v20 = vpack.c.bf16 %v367_v19, %v365_v18  ;;  %v531_v22 = vpack.c.bf16 %v451_v17, %v449_v15  ;;  %v536_v15 = vpack.c.bf16 %v462_v5, %v460_v4 }
  0x64   : > { %854 = vmatmul.bf16.vlgmr.msra.gmra.mxu1 %v485_v55  ;;  %v534_v55 = vpack.c.bf16 %v458_v45, %v456_v44  ;;  %v2855_v45 = vld [vmem:[#allocation8 + $0x28] sm:$0xff] }
  0x67   : > { %1177 = vmatpush.bf16.msrb.mxu2 %v2848_v23  ;;  %v2857_v23 = vld [vmem:[#allocation8 + $0x38] sm:$0xff] }
  0x68   : > { %1506 = vmatpush.bf16.msrb.mxu3 %v2857_v23 }
  0x6b   : > { %1178 = vmatpush.bf16.msrb.mxu2 %v2847_v36  ;;  %v2844_v36 = vld [vmem:[#allocation7 + $0x10] sm:$0xff] }
  0x6f   : > { %1179 = vmatpush.bf16.msrb.mxu2 %v2846_v49  ;;  %v373_v49 = vld [vmem:[%s3436_s8 + $0x88] sm:$0xff] }
  0x70   : > { %v493_v51 = vpack.c.bf16 %v375_v50, %v373_v49 }
  0x72   : > { %770 = vmatmul.bf16.gmra.mxu2 %v518_v28  ;;  %690 = vmatmul.bf16.gmra.mxu0 %v486_v1  ;;  %v453_v28 = vld [vmem:[%s3436_s8 + $0x308] sm:$0xff] }
  0x73   : > { %939 = vmatmul.bf16.gmra.mxu3 %v519_v29  ;;  %1180 = vmatpush.bf16.msrb.mxu2 %v2845_v10  ;;  %v490_v29 = vpack.c.bf16 %v370_v25, %v368_v24  ;;  %v379_v10 = vld [vmem:[%s3436_s8 + $0xb8] sm:$0xff] }
  0x74   : > { %859 = vmatmul.bf16.gmra.mxu1 %v487_v3  ;;  %v378_v3 = vld [vmem:[%s3436_s8 + $0xb0] sm:$0xff] }
  0x75   : > { %v494_v7 = vpack.c.bf16 %v378_v3, %v376_v2 }
  0x77   : > { %1181 = vmatpush.bf16.msrb.mxu2 %v2844_v36 }
  0x82   : > { %775 = vmatmul.bf16.gmra.mxu2 %v520_v34  ;;  %695 = vmatmul.bf16.gmra.mxu0 %v488_v16  ;;  %v532_v34 = vpack.c.bf16 %v454_v27, %v452_v26  ;;  %v380_v26 = vld [vmem:[%s3436_s8 + $0xc0] sm:$0xff]  ;;  %v382_v27 = vld [vmem:[%s3436_s8 + $0xd0] sm:$0xff] }
  0x83   : > { %944 = vmatmul.bf16.gmra.mxu3 %v521_v35  ;;  %v533_v35 = vpack.c.bf16 %v455_v30, %v453_v28  ;;  %v464_v28 = vld [vmem:[%s3436_s8 + $0x360] sm:$0xff]  ;;  %v465_v30 = vld [vmem:[%s3436_s8 + $0x368] sm:$0xff]  ;;  %v496_v31 = vpack.c.bf16 %v382_v27, %v380_v26 }
  0x84   : > { %864 = vmatmul.bf16.gmra.mxu1 %v489_v20  ;;  %v2843_v20 = vld [vmem:[#allocation7 + $0x8] sm:$0xff] }
  0x85   : > { %1182 = vmatpush.bf16.msrb.mxu2 %v2843_v20  ;;  %v475_v20 = vld [vmem:[%s3436_s8 + $0x3b8] sm:$0xff] }
  0x92   : > { %780 = vmatmul.bf16.gmra.mxu2 %v522_v41  ;;  %700 = vmatmul.bf16.gmra.mxu0 %v490_v29  ;;  %v466_v29 = vld [vmem:[%s3436_s8 + $0x370] sm:$0xff] }
  0x93   : > { %949 = vmatmul.bf16.gmra.mxu3 %v523_v42  ;;  %v372_v42 = vld [vmem:[%s3436_s8 + $0x80] sm:$0xff] }
  0x94   : > { %869 = vmatmul.bf16.gmra.mxu1 %v491_v33  ;;  %v381_v33 = vld [vmem:[%s3436_s8 + $0xc8] sm:$0xff] }
  0xa2   : > { %785 = vmatmul.bf16.gmra.mxu2 %v524_v47  ;;  %v492_v47 = vpack.c.bf16 %v374_v43, %v372_v42 }
  0xa3   : > { %954 = vmatmul.bf16.gmra.mxu3 %v525_v48  ;;  %v459_v48 = vld [vmem:[%s3436_s8 + $0x338] sm:$0xff] }
  0xa4   : > { %705 = vmatmul.bf16.gmra.mxu0 %v492_v47  ;;  %v535_v56 = vpack.c.bf16 %v459_v48, %v457_v46  ;;  %874 = vmatmul.bf16.gmra.mxu1 %v493_v51  ;;  %v384_v51 = vld [vmem:[%s3436_s8 + $0xe0] sm:$0xff] }
  0xb2   : > { %790 = vmatmul.bf16.gmra.mxu2 %v526_v60  ;;  %v2856_v60 = vld [vmem:[#allocation8 + $0x30] sm:$0xff] }
  0xb3   : > { %959 = vmatmul.bf16.gmra.mxu3 %v527_v61 }
  0xb4   : > { %1507 = vmatpush.bf16.msrb.mxu3 %v2856_v60  ;;  %710 = vmatmul.bf16.gmra.mxu0 %v494_v7 }
  0xb8   : > { %1508 = vmatpush.bf16.msrb.mxu3 %v2855_v45  ;;  %v476_v45 = vld [vmem:[%s3436_s8 + $0x3c0] sm:$0xff] }
  0xc2   : > { %795 = vmatmul.bf16.gmra.mxu2 %v528_v8  ;;  %v463_v8 = vld [vmem:[%s3436_s8 + $0x358] sm:$0xff] }
  0xc3   : > { %964 = vmatmul.bf16.gmra.mxu3 %v529_v9  ;;  %v377_v9 = vld [vmem:[%s3436_s8 + $0xa8] sm:$0xff]  ;;  %v537_v16 = vpack.c.bf16 %v463_v8, %v461_v6  ;;  %v2842_v6 = vld [vmem:[#allocation7] sm:$0xff] }
  0xc4   : > { %v495_v11 = vpack.c.bf16 %v379_v10, %v377_v9  ;;  %715 = vmatmul.bf16.gmra.mxu0 %v496_v31  ;;  %1183 = vmatpush.bf16.msrb.mxu2 %v2842_v6 }
  0xc6   : > { %879 = vmatmul.bf16.gmra.mxu1 %v495_v11 }
  0xd2   : > { %800 = vmatmul.bf16.gmra.mxu2 %v530_v21 }
  0xd3   : > { %969 = vmatmul.bf16.gmra.mxu3 %v531_v22 }
  0xe2   : > { %805 = vmatmul.bf16.gmra.mxu2 %v532_v34  ;;  %v383_v34 = vld [vmem:[%s3436_s8 + $0xd8] sm:$0xff] }
  0xe3   : > { %974 = vmatmul.bf16.gmra.mxu3 %v533_v35  ;;  %v497_v35 = vpack.c.bf16 %v383_v34, %v381_v33 }
  0xe5   : > { %v766_v38 = vpop.f32.mrf.mxu2  ;;  %884 = vmatmul.bf16.gmra.mxu1 %v497_v35  ;;  %v2854_v35 = vld [vmem:[#allocation8 + $0x20] sm:$0xff] }
  0xe6   : > { %v935_v39 = vpop.f32.mrf.mxu3  ;;  %v767_v40 = vadd.f32 %v766_v38, %v3506_v37  ;;  %1509 = vmatpush.bf16.msrb.mxu3 %v2854_v35 }
  0xe8   : > { %v936_v41 = vadd.f32 %v935_v39, %v767_v40  ;;  %v538_v40 = vpack.c.bf16 %v466_v29, %v464_v28 }
  0xea   : > { %v1047_v58 = vmax.f32 %v936_v41, 0.0  ;;  %v539_v41 = vpack.c.bf16 %v467_v32, %v465_v30 }
  0xed   : > { %v768_v52 = vpop.f32.mrf.mxu2 }
  0xee   : > { %v937_v53 = vpop.f32.mrf.mxu3  ;;  %v769_v54 = vadd.f32 %v768_v52, %v3506_v37  ;;  %v386_v52 = vld [vmem:[%s3436_s8 + $0xf0] sm:$0xff] }
  0xf0   : > { %v938_v57 = vadd.f32 %v937_v53, %v769_v54  ;;  %v468_v53 = vld [vmem:[%s3436_s8 + $0x380] sm:$0xff]  ;;  %v470_v54 = vld [vmem:[%s3436_s8 + $0x390] sm:$0xff] }
  0xf2   : > { %v1048_v59 = vmax.f32 %v938_v57, 0.0  ;;  %810 = vmatmul.bf16.gmra.mxu2 %v534_v55  ;;  %v469_v55 = vld [vmem:[%s3436_s8 + $0x388] sm:$0xff]  ;;  %v471_v57 = vld [vmem:[%s3436_s8 + $0x398] sm:$0xff] }
  0xf3   : > { %979 = vmatmul.bf16.gmra.mxu3 %v535_v56  ;;  %v498_v56 = vpack.c.bf16 %v386_v52, %v384_v51  ;;  %v541_v2 = vpack.c.bf16 %v471_v57, %v469_v55  ;;  %v479_v51 = vld [vmem:[%s3436_s8 + $0x3d8] sm:$0xff]  ;;  %v393_v52 = vld [vmem:[%s3436_s8 + $0x128] sm:$0xff] }
  0xf4   : > { %v3518_v61 = vpack.c.bf16 %v1048_v59, %v1047_v58  ;;  %v385_v58 = vld [vmem:[%s3436_s8 + $0xe8] sm:$0xff]  ;;  %v387_v59 = vld [vmem:[%s3436_s8 + $0xf8] sm:$0xff] }
  0xf5   : > { %v771_v62 = vpop.f32.mrf.mxu2  ;;  %720 = vmatmul.bf16.gmra.mxu0 %v498_v56  ;;  %v499_v60 = vpack.c.bf16 %v387_v59, %v385_v58 }
  0xf6   : > { %v940_v63 = vpop.f32.mrf.mxu3  ;;  %v772_v0 = vadd.f32 %v771_v62, %v3506_v37 }
  0xf7   : > { %889 = vmatmul.bf16.gmra.mxu1 %v499_v60 }
  0xf8   : > { %v941_v1 = vadd.f32 %v940_v63, %v772_v0 }
  0xfa   : > { %v1049_v18 = vmax.f32 %v941_v1, 0.0  ;;  %v540_v1 = vpack.c.bf16 %v470_v54, %v468_v53  ;;  %v395_v53 = vld [vmem:[%s3436_s8 + $0x138] sm:$0xff] }
  0xfb   : > { %v503_v54 = vpack.c.bf16 %v395_v53, %v393_v52 }
  0xfd   : > { %v773_v12 = vpop.f32.mrf.mxu2 }
  0xfe   : > { %v942_v13 = vpop.f32.mrf.mxu3  ;;  %v774_v14 = vadd.f32 %v773_v12, %v3506_v37  ;;  %v3557_v12 = vpop.f32.mrf.mxu0 }
 0x100   : > { %v943_v17 = vadd.f32 %v942_v13, %v774_v14  ;;  %v388_v13 = vld [vmem:[%s3436_s8 + $0x100] sm:$0xff]  ;;  %v390_v14 = vld [vmem:[%s3436_s8 + $0x110] sm:$0xff] }
 0x102   : > { %v1050_v19 = vmax.f32 %v943_v17, 0.0  ;;  %815 = vmatmul.bf16.gmra.mxu2 %v536_v15  ;;  %v472_v15 = vld [vmem:[%s3436_s8 + $0x3a0] sm:$0xff]  ;;  %v473_v17 = vld [vmem:[%s3436_s8 + $0x3a8] sm:$0xff] }
 0x103   : > { %984 = vmatmul.bf16.gmra.mxu3 %v537_v16  ;;  %v474_v16 = vld [vmem:[%s3436_s8 + $0x3b0] sm:$0xff]  ;;  %v543_v29 = vpack.c.bf16 %v475_v20, %v473_v17  ;;  %v399_v20 = vld [vmem:[%s3436_s8 + $0x158] sm:$0xff] }
 0x104   : > { %v3530_v21 = vpack.c.bf16 %v1050_v19, %v1049_v18  ;;  %v3564_v18 = vpop.f32.mrf.mxu1  ;;  %v500_v19 = vpack.c.bf16 %v390_v14, %v388_v13  ;;  %v542_v28 = vpack.c.bf16 %v474_v16, %v472_v15  ;;  %v482_v13 = vld [vmem:[%s3436_s8 + $0x3f0] sm:$0xff]  ;;  %v481_v14 = vld [vmem:[%s3436_s8 + $0x3e8] sm:$0xff]  ;;  %v483_v16 = vld [vmem:[%s3436_s8 + $0x3f8] sm:$0xff] }
 0x105   : > { %v776_v22 = vpop.f32.mrf.mxu2 }
 0x106   : > { %v945_v23 = vpop.f32.mrf.mxu3  ;;  %v777_v24 = vadd.f32 %v776_v22, %v3506_v37  ;;  %v389_v22 = vld [vmem:[%s3436_s8 + $0x108] sm:$0xff]  ;;  %725 = vmatmul.bf16.gmra.mxu0 %v500_v19  ;;  %v3570_v31 = vpop.f32.mrf.mxu0 }
 0x107   : > { %v397_v19 = vld [vmem:[%s3436_s8 + $0x148] sm:$0xff] }
 0x108   : > { %v946_v25 = vadd.f32 %v945_v23, %v777_v24  ;;  %v391_v23 = vld [vmem:[%s3436_s8 + $0x118] sm:$0xff] }
 0x109   : > { %v501_v24 = vpack.c.bf16 %v391_v23, %v389_v22  ;;  %v505_v22 = vpack.c.bf16 %v399_v20, %v397_v19  ;;  %v2872_v19 = vld [vmem:[#allocation10 + $0x74] sm:$0xf]  ;;  %v2814_v20 = vld [vmem:[#allocation10 + $0x78] sm:$0xf0] }
 0x10a   : > { %v1051_v43 = vmax.f32 %v946_v25, 0.0 }
 0x10b   : > { %894 = vmatmul.bf16.gmra.mxu1 %v501_v24 }
 0x10c   : > { %v3572_v34 = vpop.f32.mrf.mxu1 }
 0x10d   : > { %v778_v36 = vpop.f32.mrf.mxu2 }
 0x10e   : > { %v947_v38 = vpop.f32.mrf.mxu3  ;;  %v779_v39 = vadd.f32 %v778_v36, %v3506_v37 }
 0x110   : > { %v948_v42 = vadd.f32 %v947_v38, %v779_v39 }
 0x112   : > { %v1052_v44 = vmax.f32 %v948_v42, 0.0  ;;  %820 = vmatmul.bf16.gmra.mxu2 %v538_v40  ;;  %v3577_v42 = vpop.f32.mrf.mxu0 }
 0x113   : > { %989 = vmatmul.bf16.gmra.mxu3 %v539_v41 }
 0x114   : > { %v3542_v46 = vpack.c.bf16 %v1052_v44, %v1051_v43  ;;  %v392_v43 = vld [vmem:[%s3436_s8 + $0x120] sm:$0xff]  ;;  %v394_v44 = vld [vmem:[%s3436_s8 + $0x130] sm:$0xff] }
 0x115   : > { %v781_v47 = vpop.f32.mrf.mxu2 }
 0x116   : > { %v950_v48 = vpop.f32.mrf.mxu3  ;;  %v782_v49 = vadd.f32 %v781_v47, %v3506_v37  ;;  %v478_v47 = vld [vmem:[%s3436_s8 + $0x3d0] sm:$0xff] }
 0x117   : > { %v544_v58 = vpack.c.bf16 %v478_v47, %v476_v45 }
 0x118   : > { %v951_v50 = vadd.f32 %v950_v48, %v782_v49  ;;  %v477_v48 = vld [vmem:[%s3436_s8 + $0x3c8] sm:$0xff]  ;;  %v3584_v49 = vpop.f32.mrf.mxu1 }
 0x119   : > { %v545_v59 = vpack.c.bf16 %v479_v51, %v477_v48  ;;  %v400_v51 = vld [vmem:[%s3436_s8 + $0x160] sm:$0xff] }
 0x11a   : > { %v1053_v4 = vmax.f32 %v951_v50, 0.0  ;;  %v502_v50 = vpack.c.bf16 %v394_v44, %v392_v43 }
 0x11b   : > { %899 = vmatmul.bf16.gmra.mxu1 %v503_v54  ;;  %v403_v54 = vld [vmem:[%s3436_s8 + $0x178] sm:$0xff] }
 0x11c   : > { %730 = vmatmul.bf16.gmra.mxu0 %v502_v50 }
 0x11d   : > { %v783_v62 = vpop.f32.mrf.mxu2 }
 0x11e   : > { %v952_v63 = vpop.f32.mrf.mxu3  ;;  %v784_v0 = vadd.f32 %v783_v62, %v3506_v37  ;;  %v3590_v62 = vpop.f32.mrf.mxu0 }
 0x120   : > { %v953_v3 = vadd.f32 %v952_v63, %v784_v0 }
 0x122   : > { %v1054_v5 = vmax.f32 %v953_v3, 0.0  ;;  %825 = vmatmul.bf16.gmra.mxu2 %v540_v1  ;;  %v3592_v1 = vpop.f32.mrf.mxu1 }
 0x123   : > { %994 = vmatmul.bf16.gmra.mxu3 %v541_v2 }
 0x124   : > { %v3554_v7 = vpack.c.bf16 %v1054_v5, %v1053_v4 }
 0x125   : > { %v786_v8 = vpop.f32.mrf.mxu2 }
 0x126   : > { %v955_v9 = vpop.f32.mrf.mxu3  ;;  %v787_v10 = vadd.f32 %v786_v8, %v3506_v37  ;;  %v3597_v8 = vpop.f32.mrf.mxu0 }
 0x128   : > { %v956_v11 = vadd.f32 %v955_v9, %v787_v10  ;;  %v396_v9 = vld [vmem:[%s3436_s8 + $0x140] sm:$0xff]  ;;  %v398_v10 = vld [vmem:[%s3436_s8 + $0x150] sm:$0xff] }
 0x129   : > { %v504_v15 = vpack.c.bf16 %v398_v10, %v396_v9 }
 0x12a   : > { %v1055_v32 = vmax.f32 %v956_v11, 0.0  ;;  %v480_v11 = vld [vmem:[%s3436_s8 + $0x3e0] sm:$0xff]  ;;  %v3605_v17 = vpop.f32.mrf.mxu1 }
 0x12b   : > { %904 = vmatmul.bf16.gmra.mxu1 %v505_v22 }
 0x12c   : > { %735 = vmatmul.bf16.gmra.mxu0 %v504_v15  ;;  %v2873_v15 = vld [vmem:[#allocation10 + $0x74] sm:$0xf0] }
 0x12d   : > { %v788_v25 = vpop.f32.mrf.mxu2 }
 0x12e   : > { %v957_v26 = vpop.f32.mrf.mxu3  ;;  %v789_v27 = vadd.f32 %v788_v25, %v3506_v37 }
 0x130   : > { %v958_v30 = vadd.f32 %v957_v26, %v789_v27  ;;  %v546_v26 = vpack.c.bf16 %v482_v13, %v480_v11  ;;  %v547_v27 = vpack.c.bf16 %v483_v16, %v481_v14  ;;  %v2812_v14 = vld [vmem:[#allocation10 + $0x70] sm:$0xf] }
 0x131   : > { %v2813_v16 = vor.u32 %v2873_v15, %v2812_v14 }
 0x132   : > { %v1056_v33 = vmax.f32 %v958_v30, 0.0  ;;  %830 = vmatmul.bf16.gmra.mxu2 %v542_v28  ;;  %v3612_v35 = vpop.f32.mrf.mxu1 }
 0x133   : > { %999 = vmatmul.bf16.gmra.mxu3 %v543_v29  ;;  %v3610_v29 = vpop.f32.mrf.mxu0  ;;  %1874 = vmatpush.bf16.msrb.mxu0 %v2813_v16 }
 0x134   : > { %v3574_v36 = vpack.c.bf16 %v1056_v33, %v1055_v32  ;;  %v2853_v33 = vld [vmem:[#allocation8 + $0x18] sm:$0xff] }
 0x135   : > { %v791_v38 = vpop.f32.mrf.mxu2  ;;  %1510 = vmatpush.bf16.msrb.mxu3 %v2853_v33 }
 0x136   : > { %v960_v39 = vpop.f32.mrf.mxu3  ;;  %v792_v40 = vadd.f32 %v791_v38, %v3506_v37  ;;  %v687_v38 = vadd.f32 %v3557_v12, %v3506_v37  ;;  %v402_v12 = vld [vmem:[%s3436_s8 + $0x170] sm:$0xff] }
 0x137   : > { %v506_v52 = vpack.c.bf16 %v402_v12, %v400_v51  ;;  %v2852_v51 = vld [vmem:[#allocation8 + $0x10] sm:$0xff] }
 0x138   : > { %v961_v41 = vadd.f32 %v960_v39, %v792_v40  ;;  %v689_v39 = vadd.f32 %v3570_v31, %v3506_v37  ;;  %v856_v45 = vadd.f32 %v3564_v18, %v687_v38  ;;  %v401_v31 = vld [vmem:[%s3436_s8 + $0x168] sm:$0xff] }
 0x139   : > { %1511 = vmatpush.bf16.msrb.mxu3 %v2852_v51  ;;  %v413_v51 = vld [vmem:[%s3436_s8 + $0x1c8] sm:$0xff] }
 0x13a   : > { %v1057_v63 = vmax.f32 %v961_v41, 0.0  ;;  %v858_v47 = vadd.f32 %v3572_v34, %v689_v39  ;;  %v3627_v53 = vpop.f32.mrf.mxu1 }
 0x13b   : > { %v3623_v50 = vpop.f32.mrf.mxu0 }
 0x13c   : > { %740 = vmatmul.bf16.gmra.mxu0 %v506_v52  ;;  %v697_v52 = vadd.f32 %v3597_v8, %v3506_v37  ;;  %v410_v8 = vld [vmem:[%s3436_s8 + $0x1b0] sm:$0xff] }
 0x13d   : > { %v793_v55 = vpop.f32.mrf.mxu2 }
 0x13e   : > { %v962_v56 = vpop.f32.mrf.mxu3  ;;  %v794_v57 = vadd.f32 %v793_v55, %v3506_v37  ;;  %v1015_v55 = vmax.f32 %v856_v45, 0.0 }
 0x140   : > { %v963_v60 = vadd.f32 %v962_v56, %v794_v57  ;;  %v1016_v56 = vmax.f32 %v858_v47, 0.0  ;;  %v507_v57 = vpack.c.bf16 %v403_v54, %v401_v31  ;;  %v699_v31 = vadd.f32 %v3610_v29, %v3506_v37  ;;  %v409_v29 = vld [vmem:[%s3436_s8 + $0x1a8] sm:$0xff] }
 0x142   : > { %v1058_v0 = vmax.f32 %v963_v60, 0.0  ;;  %835 = vmatmul.bf16.gmra.mxu2 %v544_v58  ;;  %909 = vmatmul.bf16.gmra.mxu1 %v507_v57  ;;  %v1079_v34 = vpack.c.bf16 %v1016_v56, %v1015_v55 }
 0x143   : > { %1004 = vmatmul.bf16.gmra.mxu3 %v545_v59 }
 0x144   : > { %v3594_v2 = vpack.c.bf16 %v1058_v0, %v1057_v63  ;;  %v3632_v63 = vpop.f32.mrf.mxu0 }
 0x145   : > { %v796_v3 = vpop.f32.mrf.mxu2 }
 0x146   : > { %v965_v4 = vpop.f32.mrf.mxu3  ;;  %v797_v5 = vadd.f32 %v796_v3, %v3506_v37 }
 0x148   : > { %v966_v6 = vadd.f32 %v965_v4, %v797_v5  ;;  %v3634_v4 = vpop.f32.mrf.mxu1  ;;  %v692_v5 = vadd.f32 %v3577_v42, %v3506_v37 }
 0x14a   : > { %v1059_v30 = vmax.f32 %v966_v6, 0.0  ;;  %v694_v6 = vadd.f32 %v3590_v62, %v3506_v37  ;;  %v861_v42 = vadd.f32 %v3584_v49, %v692_v5  ;;  %v411_v5 = vld [vmem:[%s3436_s8 + $0x1b8] sm:$0xff] }
 0x14c   : > { %v863_v22 = vadd.f32 %v3592_v1, %v694_v6  ;;  %v1017_v33 = vmax.f32 %v861_v42, 0.0 }
 0x14d   : > { %v798_v23 = vpop.f32.mrf.mxu2 }
 0x14e   : > { %v967_v24 = vpop.f32.mrf.mxu3  ;;  %v799_v25 = vadd.f32 %v798_v23, %v3506_v37  ;;  %v2817_v23 = vor.u32 %v2872_v19, %v2814_v20  ;;  %v1018_v38 = vmax.f32 %v863_v22, 0.0  ;;  %v702_v22 = vadd.f32 %v3623_v50, %v3506_v37 }
 0x150   : > { %v968_v28 = vadd.f32 %v967_v24, %v799_v25  ;;  %v3645_v24 = vpop.f32.mrf.mxu0  ;;  %v404_v25 = vld [vmem:[%s3436_s8 + $0x180] sm:$0xff]  ;;  %2043 = vmatpush.bf16.msrb.mxu1 %v2817_v23  ;;  %v871_v50 = vadd.f32 %v3627_v53, %v702_v22 }
 0x152   : > { %v1060_v32 = vmax.f32 %v968_v28, 0.0  ;;  %840 = vmatmul.bf16.gmra.mxu2 %v546_v26  ;;  %v406_v26 = vld [vmem:[%s3436_s8 + $0x190] sm:$0xff]  ;;  %v3649_v28 = vpop.f32.mrf.mxu1 }
 0x153   : > { %1009 = vmatmul.bf16.gmra.mxu3 %v547_v27  ;;  %v508_v27 = vpack.c.bf16 %v406_v26, %v404_v25 }
 0x154   : > { %v3618_v40 = vpack.c.bf16 %v1060_v32, %v1059_v30  ;;  %v405_v30 = vld [vmem:[%s3436_s8 + $0x188] sm:$0xff]  ;;  %v407_v32 = vld [vmem:[%s3436_s8 + $0x198] sm:$0xff] }
 0x155   : > { %v801_v41 = vpop.f32.mrf.mxu2  ;;  %745 = vmatmul.bf16.gmra.mxu0 %v508_v27  ;;  %v509_v39 = vpack.c.bf16 %v407_v32, %v405_v30  ;;  %v2804_v30 = vld [vmem:[#allocation10 + $0x60] sm:$0xf]  ;;  %v2871_v32 = vld [vmem:[#allocation10 + $0x64] sm:$0xf0] }
 0x156   : > { %v970_v43 = vpop.f32.mrf.mxu3  ;;  %v802_v44 = vadd.f32 %v801_v41, %v3506_v37 }
 0x157   : > { %914 = vmatmul.bf16.gmra.mxu1 %v509_v39  ;;  %v2806_v39 = vld [vmem:[#allocation10 + $0x68] sm:$0xf0] }
 0x158   : > { %v971_v48 = vadd.f32 %v970_v43, %v802_v44  ;;  %v1080_v44 = vpack.c.bf16 %v1018_v38, %v1017_v33  ;;  %v3654_v45 = vpop.f32.mrf.mxu0  ;;  %v2805_v33 = vor.u32 %v2871_v32, %v2804_v30  ;;  %v2870_v38 = vld [vmem:[#allocation10 + $0x64] sm:$0xf] }
 0x15a   : > { %v1061_v0 = vmax.f32 %v971_v48, 0.0  ;;  %v3656_v12 = vpop.f32.mrf.mxu1  ;;  %1875 = vmatpush.bf16.msrb.mxu0 %v2805_v33 }
 0x15d   : > { %v803_v58 = vpop.f32.mrf.mxu2 }
 0x15e   : > { %v972_v59 = vpop.f32.mrf.mxu3  ;;  %v804_v18 = vadd.f32 %v803_v58, %v3506_v37  ;;  %v866_v58 = vadd.f32 %v3605_v17, %v697_v52  ;;  %v415_v52 = vld [vmem:[%s3436_s8 + $0x1d8] sm:$0xff] }
 0x160   : > { %v973_v60 = vadd.f32 %v972_v59, %v804_v18  ;;  %v868_v59 = vadd.f32 %v3612_v35, %v699_v31  ;;  %v1019_v6 = vmax.f32 %v866_v58, 0.0  ;;  %v1021_v31 = vmax.f32 %v871_v50, 0.0 }
 0x162   : > { %v1062_v3 = vmax.f32 %v973_v60, 0.0  ;;  %1184 = vmatmul.bf16.vlgmr.msrb.gmra.mxu2 %v1079_v34  ;;  %v3667_v34 = vpop.f32.mrf.mxu0  ;;  %v408_v60 = vld [vmem:[%s3436_s8 + $0x1a0] sm:$0xff] }
 0x164   : > { %v3640_v9 = vpack.c.bf16 %v1062_v3, %v1061_v0  ;;  %v510_v0 = vpack.c.bf16 %v410_v8, %v408_v60  ;;  %v3671_v3 = vpop.f32.mrf.mxu1 }
 0x165   : > { %v806_v10 = vpop.f32.mrf.mxu2 }
 0x166   : > { %v975_v11 = vpop.f32.mrf.mxu3  ;;  %v807_v13 = vadd.f32 %v806_v10, %v3506_v37  ;;  %v1020_v10 = vmax.f32 %v868_v59, 0.0  ;;  %750 = vmatmul.bf16.gmra.mxu0 %v510_v0  ;;  %v2851_v0 = vld [vmem:[#allocation8 + $0x8] sm:$0xff] }
 0x167   : > { %1512 = vmatpush.bf16.msrb.mxu3 %v2851_v0 }
 0x168   : > { %v976_v62 = vadd.f32 %v975_v11, %v807_v13  ;;  %v511_v11 = vpack.c.bf16 %v411_v5, %v409_v29  ;;  %v1081_v15 = vpack.c.bf16 %v1020_v10, %v1019_v6  ;;  %v707_v5 = vadd.f32 %v3645_v24, %v3506_v37  ;;  %v418_v24 = vld [vmem:[%s3436_s8 + $0x1f0] sm:$0xff] }
 0x169   : > { %v709_v6 = vadd.f32 %v3654_v45, %v3506_v37  ;;  %v417_v45 = vld [vmem:[%s3436_s8 + $0x1e8] sm:$0xff] }
 0x16a   : > { %v1063_v47 = vmax.f32 %v976_v62, 0.0  ;;  %919 = vmatmul.bf16.gmra.mxu1 %v511_v11  ;;  %v3676_v16 = vpop.f32.mrf.mxu0  ;;  %v704_v62 = vadd.f32 %v3632_v63, %v3506_v37 }
 0x16c   : > { %v3678_v42 = vpop.f32.mrf.mxu1 }
 0x16d   : > { %v808_v49 = vpop.f32.mrf.mxu2 }
 0x16e   : > { %v977_v41 = vpop.f32.mrf.mxu3  ;;  %v809_v1 = vadd.f32 %v808_v49, %v3506_v37  ;;  %v873_v49 = vadd.f32 %v3634_v4, %v704_v62 }
 0x170   : > { %v978_v43 = vadd.f32 %v977_v41, %v809_v1  ;;  %v2809_v41 = vor.u32 %v2870_v38, %v2806_v39 }
 0x172   : > { %v1064_v48 = vmax.f32 %v978_v43, 0.0  ;;  %1189 = vmatmul.bf16.gmra.mxu2 %v1080_v44  ;;  %v3689_v1 = vpop.f32.mrf.mxu0  ;;  %v412_v43 = vld [vmem:[%s3436_s8 + $0x1c0] sm:$0xff]  ;;  %v414_v44 = vld [vmem:[%s3436_s8 + $0x1d0] sm:$0xff]  ;;  %2044 = vmatpush.bf16.msrb.mxu1 %v2809_v41  ;;  %v714_v41 = vadd.f32 %v3676_v16, %v3506_v37 }
 0x174   : > { %v3662_v54 = vpack.c.bf16 %v1064_v48, %v1063_v47  ;;  %v512_v47 = vpack.c.bf16 %v414_v44, %v412_v43  ;;  %v3693_v48 = vpop.f32.mrf.mxu1 }
 0x175   : > { %v811_v55 = vpop.f32.mrf.mxu2 }
 0x176   : > { %v980_v56 = vpop.f32.mrf.mxu3  ;;  %v812_v57 = vadd.f32 %v811_v55, %v3506_v37  ;;  %v1022_v55 = vmax.f32 %v873_v49, 0.0  ;;  %755 = vmatmul.bf16.gmra.mxu0 %v512_v47 }
 0x178   : > { %v981_v18 = vadd.f32 %v980_v56, %v812_v57  ;;  %v513_v56 = vpack.c.bf16 %v415_v52, %v413_v51  ;;  %v1082_v59 = vpack.c.bf16 %v1022_v55, %v1021_v31  ;;  %v2796_v31 = vld [vmem:[#allocation10 + $0x50] sm:$0xf]  ;;  %v2869_v55 = vld [vmem:[#allocation10 + $0x54] sm:$0xf0] }
 0x17a   : > { %v1065_v19 = vmax.f32 %v981_v18, 0.0  ;;  %924 = vmatmul.bf16.gmra.mxu1 %v513_v56  ;;  %v3698_v18 = vpop.f32.mrf.mxu0  ;;  %v2797_v56 = vor.u32 %v2869_v55, %v2796_v31 }
 0x17c   : > { %v3700_v29 = vpop.f32.mrf.mxu1  ;;  %1876 = vmatpush.bf16.msrb.mxu0 %v2797_v56 }
 0x17d   : > { %v813_v13 = vpop.f32.mrf.mxu2 }
 0x17e   : > { %v982_v14 = vpop.f32.mrf.mxu3  ;;  %v814_v17 = vadd.f32 %v813_v13, %v3506_v37 }
 0x180   : > { %v983_v35 = vadd.f32 %v982_v14, %v814_v17  ;;  %v876_v17 = vadd.f32 %v3649_v28, %v707_v5 }
 0x182   : > { %v1066_v20 = vmax.f32 %v983_v35, 0.0  ;;  %1194 = vmatmul.bf16.gmra.mxu2 %v1081_v15  ;;  %v878_v35 = vadd.f32 %v3656_v12, %v709_v6 }
 0x184   : > { %v3684_v23 = vpack.c.bf16 %v1066_v20, %v1065_v19  ;;  %v3711_v19 = vpop.f32.mrf.mxu0  ;;  %v416_v20 = vld [vmem:[%s3436_s8 + $0x1e0] sm:$0xff]  ;;  %v3715_v62 = vpop.f32.mrf.mxu1 }
 0x185   : > { %v816_v25 = vpop.f32.mrf.mxu2  ;;  %v514_v22 = vpack.c.bf16 %v418_v24, %v416_v20 }
 0x186   : > { %v985_v26 = vpop.f32.mrf.mxu3  ;;  %v817_v27 = vadd.f32 %v816_v25, %v3506_v37  ;;  %v419_v25 = vld [vmem:[%s3436_s8 + $0x1f8] sm:$0xff] }
 0x187   : > { %760 = vmatmul.bf16.gmra.mxu0 %v514_v22  ;;  %v515_v30 = vpack.c.bf16 %v419_v25, %v417_v45 }
 0x188   : > { %v986_v63 = vadd.f32 %v985_v26, %v817_v27  ;;  %v1023_v26 = vmax.f32 %v876_v17, 0.0  ;;  %v1024_v27 = vmax.f32 %v878_v35, 0.0  ;;  %v717_v35 = vadd.f32 %v3689_v1, %v3506_v37 }
 0x18a   : > { %v1067_v60 = vmax.f32 %v986_v63, 0.0  ;;  %929 = vmatmul.bf16.gmra.mxu1 %v515_v30  ;;  %v1083_v38 = vpack.c.bf16 %v1024_v27, %v1023_v26  ;;  %v712_v63 = vadd.f32 %v3667_v34, %v3506_v37  ;;  %v886_v26 = vadd.f32 %v3693_v48, %v717_v35 }
 0x18b   : > { %v722_v48 = vadd.f32 %v3711_v19, %v3506_v37 }
 0x18c   : > { %v723_v39 = vpop.f32.mrf.mxu0  ;;  %v892_v43 = vpop.f32.mrf.mxu1 }
 0x18d   : > { %v818_v53 = vpop.f32.mrf.mxu2  ;;  %v891_v56 = vadd.f32 %v3715_v62, %v722_v48 }
 0x18e   : > { %v987_v57 = vpop.f32.mrf.mxu3  ;;  %v819_v4 = vadd.f32 %v818_v53, %v3506_v37  ;;  %v2868_v53 = vld [vmem:[#allocation10 + $0x54] sm:$0xf] }
 0x18f   : > { %v1029_v19 = vmax.f32 %v891_v56, 0.0 }
 0x190   : > { %v988_v58 = vadd.f32 %v987_v57, %v819_v4  ;;  %v2798_v57 = vld [vmem:[#allocation10 + $0x58] sm:$0xf0]  ;;  %v881_v4 = vadd.f32 %v3671_v3, %v712_v63 }
 0x192   : > { %v1068_v8 = vmax.f32 %v988_v58, 0.0  ;;  %1199 = vmatmul.bf16.gmra.mxu2 %v1082_v59  ;;  %v883_v58 = vadd.f32 %v3678_v42, %v714_v41  ;;  %v2801_v59 = vor.u32 %v2868_v53, %v2798_v57  ;;  %v2850_v42 = vld [vmem:[#allocation8] sm:$0xff] }
 0x193   : > { %1513 = vmatpush.bf16.msrb.mxu3 %v2850_v42 }
 0x194   : > { %v3706_v10 = vpack.c.bf16 %v1068_v8, %v1067_v60  ;;  %2045 = vmatpush.bf16.msrb.mxu1 %v2801_v59  ;;  %v3729_v16 = vpop.f32.mrf.mxu0  ;;  %v1025_v60 = vmax.f32 %v881_v4, 0.0  ;;  %v1026_v8 = vmax.f32 %v883_v58, 0.0  ;;  %v2788_v58 = vld [vmem:[#allocation10 + $0x40] sm:$0xf]  ;;  %v2866_v59 = vld [vmem:[#allocation10 + $0x44] sm:$0xf] }
 0x195   : > { %v821_v11 = vpop.f32.mrf.mxu2  ;;  %v727_v35 = vadd.f32 %v3729_v16, %v3506_v37 }
 0x196   : > { %v990_v13 = vpop.f32.mrf.mxu3  ;;  %v822_v14 = vadd.f32 %v821_v11, %v3506_v37  ;;  %v3732_v11 = vpop.f32.mrf.mxu1 }
 0x198   : > { %v991_v15 = vadd.f32 %v990_v13, %v822_v14  ;;  %v1084_v14 = vpack.c.bf16 %v1026_v8, %v1025_v60  ;;  %v2790_v8 = vld [vmem:[#allocation10 + $0x48] sm:$0xf0] }
 0x19a   : > { %v1069_v50 = vmax.f32 %v991_v15, 0.0  ;;  %v719_v15 = vadd.f32 %v3698_v18, %v3506_v37 }
 0x19c   : > { %v728_v20 = vpop.f32.mrf.mxu0  ;;  %v888_v27 = vadd.f32 %v3700_v29, %v719_v15  ;;  %v724_v29 = vadd.f32 %v723_v39, %v3506_v37 }
 0x19d   : > { %v823_v32 = vpop.f32.mrf.mxu2  ;;  %v729_v15 = vadd.f32 %v728_v20, %v3506_v37 }
 0x19e   : > { %v992_v33 = vpop.f32.mrf.mxu3  ;;  %v824_v28 = vadd.f32 %v823_v32, %v3506_v37  ;;  %v897_v32 = vpop.f32.mrf.mxu1  ;;  %v893_v53 = vadd.f32 %v892_v43, %v724_v29 }
 0x1a0   : > { %v993_v12 = vadd.f32 %v992_v33, %v824_v28  ;;  %v1027_v33 = vmax.f32 %v886_v26, 0.0  ;;  %v1028_v28 = vmax.f32 %v888_v27, 0.0  ;;  %v1030_v39 = vmax.f32 %v893_v53, 0.0 }
 0x1a2   : > { %v1070_v49 = vmax.f32 %v993_v12, 0.0  ;;  %1204 = vmatmul.bf16.gmra.mxu2 %v1083_v38  ;;  %v1086_v62 = vpack.c.bf16 %v1030_v39, %v1029_v19 }
 0x1a4   : > { %v3724_v44 = vpack.c.bf16 %v1070_v49, %v1069_v50  ;;  %v731_v38 = vpop.f32.mrf.mxu0  ;;  %v1085_v49 = vpack.c.bf16 %v1028_v28, %v1027_v33  ;;  %v898_v33 = vadd.f32 %v897_v32, %v729_v15 }
 0x1a5   : > { %v826_v47 = vpop.f32.mrf.mxu2 }
 0x1a6   : > { %v995_v51 = vpop.f32.mrf.mxu3  ;;  %v827_v52 = vadd.f32 %v826_v47, %v3506_v37  ;;  %v900_v47 = vpop.f32.mrf.mxu1 }
 0x1a8   : > { %v996_v34 = vadd.f32 %v995_v51, %v827_v52 }
 0x1aa   : > { %v1071_v17 = vmax.f32 %v996_v34, 0.0  ;;  %v2867_v34 = vld [vmem:[#allocation10 + $0x44] sm:$0xf0] }
 0x1ab   : > { %v2789_v60 = vor.u32 %v2867_v34, %v2788_v58  ;;  %v2865_v58 = vld [vmem:[#allocation10 + $0x34] sm:$0xf0]  ;;  %v3764_v34 = vld [vmem:[#allocation11 + $0x1] ss:$0 sm:$0xff] }
 0x1ac   : > { %v733_v4 = vpop.f32.mrf.mxu0 }
 0x1ad   : > { %v828_v0 = vpop.f32.mrf.mxu2  ;;  %1877 = vmatpush.bf16.msrb.mxu0 %v2789_v60  ;;  %v2864_v60 = vld [vmem:[#allocation10 + $0x34] sm:$0xf] }
 0x1ae   : > { %v997_v5 = vpop.f32.mrf.mxu3  ;;  %v829_v6 = vadd.f32 %v828_v0, %v3506_v37  ;;  %v2793_v0 = vor.u32 %v2866_v59, %v2790_v8  ;;  %v2782_v8 = vld [vmem:[#allocation10 + $0x38] sm:$0xf0] }
 0x1b0   : > { %v998_v13 = vadd.f32 %v997_v5, %v829_v6  ;;  %v902_v5 = vpop.f32.mrf.mxu1  ;;  %2046 = vmatpush.bf16.msrb.mxu1 %v2793_v0  ;;  %v2785_v0 = vor.u32 %v2864_v60, %v2782_v8 }
 0x1b2   : > { %v1072_v3 = vmax.f32 %v998_v13, 0.0  ;;  %1209 = vmatmul.bf16.gmra.mxu2 %v1084_v14 }
 0x1b4   : > { %v3738_v24 = vpack.c.bf16 %v1072_v3, %v1071_v17  ;;  %v736_v42 = vpop.f32.mrf.mxu0  ;;  %2047 = vmatpush.bf16.msrb.mxu1 %v2785_v0 }
 0x1b5   : > { %v831_v22 = vpop.f32.mrf.mxu2 }
 0x1b6   : > { %v1000_v45 = vpop.f32.mrf.mxu3  ;;  %v832_v25 = vadd.f32 %v831_v22, %v3506_v37 }
 0x1b8   : > { %v1001_v30 = vadd.f32 %v1000_v45, %v832_v25  ;;  %v905_v27 = vpop.f32.mrf.mxu1 }
 0x1ba   : > { %v1073_v63 = vmax.f32 %v1001_v30, 0.0  ;;  %v896_v30 = vadd.f32 %v3732_v11, %v727_v35 }
 0x1bd   : > { %v833_v1 = vpop.f32.mrf.mxu2 }
 0x1be   : > { %v1002_v12 = vpop.f32.mrf.mxu3  ;;  %v834_v18 = vadd.f32 %v833_v1, %v3506_v37  ;;  %v1031_v1 = vmax.f32 %v896_v30, 0.0 }
 0x1c0   : > { %v1003_v50 = vadd.f32 %v1002_v12, %v834_v18  ;;  %v1032_v12 = vmax.f32 %v898_v33, 0.0  ;;  %v738_v18 = vpop.f32.mrf.mxu0 }
 0x1c2   : > { %v1074_v41 = vmax.f32 %v1003_v50, 0.0  ;;  %1214 = vmatmul.bf16.gmra.mxu2 %v1085_v49  ;;  %v1087_v20 = vpack.c.bf16 %v1032_v12, %v1031_v1 }
 0x1c4   : > { %v3747_v51 = vpack.c.bf16 %v1074_v41, %v1073_v63  ;;  %v907_v41 = vpop.f32.mrf.mxu1 }
 0x1c5   : > { %v836_v52 = vpop.f32.mrf.mxu2 }
 0x1c6   : > { %v1005_v31 = vpop.f32.mrf.mxu3  ;;  %v837_v55 = vadd.f32 %v836_v52, %v3506_v37  ;;  %v732_v52 = vadd.f32 %v731_v38, %v3506_v37 }
 0x1c8   : > { %v1006_v57 = vadd.f32 %v1005_v31, %v837_v55  ;;  %v734_v31 = vadd.f32 %v733_v4, %v3506_v37  ;;  %v741_v55 = vpop.f32.mrf.mxu0  ;;  %v901_v56 = vadd.f32 %v900_v47, %v732_v52  ;;  %v2772_v52 = vld [vmem:[#allocation10 + $0x20] sm:$0xf] }
 0x1ca   : > { %v1075_v43 = vmax.f32 %v1006_v57, 0.0  ;;  %v903_v53 = vadd.f32 %v902_v5, %v734_v31  ;;  %v2780_v57 = vld [vmem:[#allocation10 + $0x30] sm:$0xf]  ;;  %v1033_v39 = vmax.f32 %v901_v56, 0.0  ;;  %v2863_v31 = vld [vmem:[#allocation10 + $0x24] sm:$0xf0] }
 0x1cb   : > { %v2781_v59 = vor.u32 %v2865_v58, %v2780_v57  ;;  %v2773_v56 = vor.u32 %v2863_v31, %v2772_v52  ;;  %v2774_v57 = vld [vmem:[#allocation10 + $0x28] sm:$0xf0] }
 0x1cc   : > { %v910_v19 = vpop.f32.mrf.mxu1  ;;  %v1034_v38 = vmax.f32 %v903_v53, 0.0  ;;  %v2862_v53 = vld [vmem:[#allocation10 + $0x24] sm:$0xf] }
 0x1cd   : > { %v838_v6 = vpop.f32.mrf.mxu2  ;;  %1878 = vmatpush.bf16.msrb.mxu0 %v2781_v59  ;;  %v2777_v58 = vor.u32 %v2862_v53, %v2774_v57 }
 0x1ce   : > { %v1007_v13 = vpop.f32.mrf.mxu3  ;;  %v839_v14 = vadd.f32 %v838_v6, %v3506_v37 }
 0x1cf   : > { %2048 = vmatpush.bf16.msrb.mxu1 %v2777_v58 }
 0x1d0   : > { %v1008_v17 = vadd.f32 %v1007_v13, %v839_v14  ;;  %v1088_v13 = vpack.c.bf16 %v1034_v38, %v1033_v39  ;;  %v743_v14 = vpop.f32.mrf.mxu0 }
 0x1d1   : > { %1879 = vmatpush.bf16.msrb.mxu0 %v2773_v56 }
 0x1d2   : > { %v1076_v3 = vmax.f32 %v1008_v17, 0.0  ;;  %1219 = vmatmul.bf16.gmra.mxu2 %v1086_v62  ;;  %v3768_v62 = vld [vmem:[#allocation11] ss:$0 sm:$0xff] }
 0x1d4   : > { %v3755_v22 = vpack.c.bf16 %v1076_v3, %v1075_v43  ;;  %v737_v43 = vadd.f32 %v3768_v62, %v736_v42  ;;  %v739_v3 = vadd.f32 %v3768_v62, %v738_v18  ;;  %v912_v15 = vpop.f32.mrf.mxu1  ;;  %v742_v18 = vadd.f32 %v3768_v62, %v741_v55 }
 0x1d5   : > { %v841_v45 = vpop.f32.mrf.mxu2 }
 0x1d6   : > { %v1010_v25 = vpop.f32.mrf.mxu3  ;;  %v842_v26 = vadd.f32 %v841_v45, %v3506_v37  ;;  %v906_v45 = vadd.f32 %v905_v27, %v737_v43 }
 0x1d8   : > { %v1011_v28 = vadd.f32 %v1010_v25, %v842_v26  ;;  %v908_v25 = vadd.f32 %v907_v41, %v739_v3  ;;  %v746_v26 = vpop.f32.mrf.mxu0  ;;  %v1035_v30 = vmax.f32 %v906_v45, 0.0 }
 0x1da   : > { %v1077_v48 = vmax.f32 %v1011_v28, 0.0  ;;  %v1036_v33 = vmax.f32 %v908_v25, 0.0 }
 0x1dd   : > { %v843_v50 = vpop.f32.mrf.mxu2 }
 0x1de   : > { %v1012_v49 = vpop.f32.mrf.mxu3  ;;  %v844_v16 = vadd.f32 %v843_v50, %v3506_v37  ;;  %v915_v50 = vpop.f32.mrf.mxu1 }
 0x1e0   : > { %v1013_v63 = vadd.f32 %v1012_v49, %v844_v16  ;;  %v748_v41 = vpop.f32.mrf.mxu0 }
 0x1e2   : > { %v1078_v29 = vmax.f32 %v1013_v63, 0.0  ;;  %1224 = vmatmul.bf16.gmra.mxu2 %v1087_v20  ;;  %v1089_v63 = vpack.c.bf16 %v1036_v33, %v1035_v30  ;;  %v744_v20 = vadd.f32 %v3768_v62, %v743_v14 }
 0x1e4   : > { %v3762_v11 = vpack.c.bf16 %v1078_v29, %v1077_v48  ;;  %v911_v48 = vadd.f32 %v910_v19, %v742_v18  ;;  %v913_v29 = vadd.f32 %v912_v15, %v744_v20  ;;  %v2764_v20 = vld [vmem:[#allocation10 + $0x10] sm:$0xf] }
 0x1e5   : > { %v1185_v32 = vpop.f32.mrf.mxu2 }
 0x1e6   : > { %v1186_v37 = vadd.f32 %v1185_v32, %v3764_v34  ;;  %v917_v32 = vpop.f32.mrf.mxu1  ;;  %v1037_v59 = vmax.f32 %v911_v48, 0.0  ;;  %v1038_v60 = vmax.f32 %v913_v29, 0.0  ;;  %v2860_v48 = vld [vmem:[#allocation10 + $0x14] sm:$0xf]  ;;  %v2766_v29 = vld [vmem:[#allocation10 + $0x18] sm:$0xf0] }
 0x1e7   : > { %v2769_v52 = vor.u32 %v2860_v48, %v2766_v29 }
 0x1e8   : > { %v1345_v47 = vmax.f32 %v1186_v37, 0.0  ;;  %v751_v39 = vpop.f32.mrf.mxu0  ;;  %v1090_v37 = vpack.c.bf16 %v1038_v60, %v1037_v59 }
 0x1e9   : > { %2049 = vmatpush.bf16.msrb.mxu1 %v2769_v52 }
 0x1ed   : > { %v1187_v4 = vpop.f32.mrf.mxu2 }
 0x1ee   : > { %v1188_v6 = vadd.f32 %v1187_v4, %v3764_v34 }
 0x1f0   : > { %v1346_v5 = vmax.f32 %v1188_v6, 0.0  ;;  %v920_v6 = vpop.f32.mrf.mxu1  ;;  %v753_v43 = vpop.f32.mrf.mxu0 }
 0x1f2   : > { %v1409_v17 = vpack.c.bf16 %v1346_v5, %v1345_v47  ;;  %1229 = vmatmul.bf16.gmra.mxu2 %v1088_v13  ;;  %v747_v47 = vadd.f32 %v3768_v62, %v746_v26  ;;  %v749_v5 = vadd.f32 %v3768_v62, %v748_v41 }
 0x1f4   : > { %1514 = vmatmul.bf16.vlgmr.msrb.gmra.mxu3 %v1409_v17  ;;  %v916_v14 = vadd.f32 %v915_v50, %v747_v47  ;;  %v918_v17 = vadd.f32 %v917_v32, %v749_v5  ;;  %v754_v50 = vadd.f32 %v3768_v62, %v753_v43 }
 0x1f5   : > { %v1190_v35 = vpop.f32.mrf.mxu2 }
 0x1f6   : > { %v1191_v28 = vadd.f32 %v1190_v35, %v3764_v34  ;;  %v1039_v3 = vmax.f32 %v916_v14, 0.0  ;;  %v1040_v35 = vmax.f32 %v918_v17, 0.0 }
 0x1f8   : > { %v1347_v49 = vmax.f32 %v1191_v28, 0.0  ;;  %v922_v25 = vpop.f32.mrf.mxu1 }
 0x1f9   : > { %v923_v18 = vadd.f32 %v922_v25, %v754_v50  ;;  %v2859_v50 = vld [vmem:[#allocation10 + $0x4] sm:$0xf0] }
 0x1fb   : > { %v1042_v32 = vmax.f32 %v923_v18, 0.0 }
 0x1fd   : > { %v1192_v1 = vpop.f32.mrf.mxu2 }
 0x1fe   : > { %v1193_v12 = vadd.f32 %v1192_v1, %v3764_v34  ;;  %v1091_v1 = vpack.c.bf16 %v1040_v35, %v1039_v3 }
 0x200   : > { %v1348_v16 = vmax.f32 %v1193_v12, 0.0  ;;  %v756_v12 = vpop.f32.mrf.mxu0 }
 0x202   : > { %1234 = vmatmul.bf16.gmra.mxu2 %v1089_v63  ;;  %v1410_v42 = vpack.c.bf16 %v1348_v16, %v1347_v49  ;;  %v752_v49 = vadd.f32 %v3768_v62, %v751_v39  ;;  %v925_v63 = vpop.f32.mrf.mxu1  ;;  %v757_v39 = vadd.f32 %v3768_v62, %v756_v12 }
 0x204   : > { %1519 = vmatmul.bf16.gmra.mxu3 %v1410_v42  ;;  %v921_v42 = vadd.f32 %v920_v6, %v752_v49  ;;  %v2756_v49 = vld [vmem:[#allocation10] sm:$0xf] }
 0x205   : > { %v1195_v27 = vpop.f32.mrf.mxu2 }
 0x206   : > { %v1196_v8 = vadd.f32 %v1195_v27, %v3764_v34  ;;  %v2861_v27 = vld [vmem:[#allocation10 + $0x14] sm:$0xf0]  ;;  %v1041_v31 = vmax.f32 %v921_v42, 0.0  ;;  %v2758_v42 = vld [vmem:[#allocation10 + $0x8] sm:$0xf0] }
 0x207   : > { %v2765_v41 = vor.u32 %v2861_v27, %v2764_v20 }
 0x208   : > { %v1349_v38 = vmax.f32 %v1196_v8, 0.0  ;;  %v758_v57 = vpop.f32.mrf.mxu0  ;;  %v1092_v8 = vpack.c.bf16 %v1042_v32, %v1041_v31 }
 0x209   : > { %1880 = vmatpush.bf16.msrb.mxu0 %v2765_v41 }
 0x20d   : > { %v1197_v55 = vpop.f32.mrf.mxu2 }
 0x20e   : > { %v1198_v0 = vadd.f32 %v1197_v55, %v3764_v34  ;;  %v927_v55 = vpop.f32.mrf.mxu1 }
 0x210   : > { %v1350_v19 = vmax.f32 %v1198_v0, 0.0 }
 0x212   : > { %1239 = vmatmul.bf16.gmra.mxu2 %v1090_v37  ;;  %v1411_v4 = vpack.c.bf16 %v1350_v19, %v1349_v38  ;;  %v759_v38 = vadd.f32 %v3768_v62, %v758_v57  ;;  %v761_v37 = vpop.f32.mrf.mxu0 }
 0x214   : > { %1524 = vmatmul.bf16.gmra.mxu3 %v1411_v4  ;;  %v926_v4 = vadd.f32 %v925_v63, %v757_v39  ;;  %v928_v6 = vadd.f32 %v927_v55, %v759_v38  ;;  %v2858_v63 = vld [vmem:[#allocation10 + $0x4] sm:$0xf] }
 0x215   : > { %v1200_v13 = vpop.f32.mrf.mxu2  ;;  %v2761_v18 = vor.u32 %v2858_v63, %v2758_v42 }
 0x216   : > { %v1201_v15 = vadd.f32 %v1200_v13, %v3764_v34  ;;  %v930_v47 = vpop.f32.mrf.mxu1  ;;  %v1043_v5 = vmax.f32 %v926_v4, 0.0  ;;  %v1044_v13 = vmax.f32 %v928_v6, 0.0 }
 0x217   : > { %2050 = vmatpush.bf16.msrb.mxu1 %v2761_v18 }
 0x218   : > { %v1351_v33 = vmax.f32 %v1201_v15, 0.0  ;;  %v1093_v15 = vpack.c.bf16 %v1044_v13, %v1043_v5  ;;  %v3800_v5 = vld [vmem:[#allocation11 + $0x2] ss:$0 sm:$0xff] }
 0x21d   : > { %v1202_v45 = vpop.f32.mrf.mxu2 }
 0x21e   : > { %v1203_v30 = vadd.f32 %v1202_v45, %v3764_v34  ;;  %v763_v45 = vpop.f32.mrf.mxu0 }
 0x220   : > { %v1352_v28 = vmax.f32 %v1203_v30, 0.0  ;;  %v762_v30 = vadd.f32 %v3768_v62, %v761_v37 }
 0x222   : > { %1244 = vmatmul.bf16.gmra.mxu2 %v1091_v1  ;;  %v1412_v26 = vpack.c.bf16 %v1352_v28, %v1351_v33  ;;  %v764_v33 = vadd.f32 %v3768_v62, %v763_v45  ;;  %v932_v28 = vpop.f32.mrf.mxu1 }
 0x224   : > { %1529 = vmatmul.bf16.gmra.mxu3 %v1412_v26  ;;  %v931_v26 = vadd.f32 %v930_v47, %v762_v30  ;;  %v933_v12 = vadd.f32 %v932_v28, %v764_v33 }
 0x225   : > { %v1205_v16 = vpop.f32.mrf.mxu2 }
 0x226   : > { %v1206_v56 = vadd.f32 %v1205_v16, %v3764_v34  ;;  %v2757_v16 = vor.u32 %v2859_v50, %v2756_v49  ;;  %v1045_v20 = vmax.f32 %v931_v26, 0.0  ;;  %v1046_v27 = vmax.f32 %v933_v12, 0.0 }
 0x228   : > { %v1353_v59 = vmax.f32 %v1206_v56, 0.0  ;;  %1881 = vmatpush.bf16.msrb.mxu0 %v2757_v16  ;;  %v1094_v31 = vpack.c.bf16 %v1046_v27, %v1045_v20 }
 0x22d   : > { %v1207_v53 = vpop.f32.mrf.mxu2 }
 0x22e   : > { %v1208_v58 = vadd.f32 %v1207_v53, %v3764_v34 }
 0x230   : > { %v1354_v60 = vmax.f32 %v1208_v58, 0.0 }
 0x232   : > { %1249 = vmatmul.bf16.gmra.mxu2 %v1092_v8  ;;  %v1413_v0 = vpack.c.bf16 %v1354_v60, %v1353_v59 }
 0x234   : > { %1534 = vmatmul.bf16.gmra.mxu3 %v1413_v0 }
 0x235   : > { %v1210_v19 = vpop.f32.mrf.mxu2 }
 0x236   : > { %v1211_v14 = vadd.f32 %v1210_v19, %v3764_v34 }
 0x238   : > { %v1355_v3 = vmax.f32 %v1211_v14, 0.0 }
 0x23d   : > { %v1212_v17 = vpop.f32.mrf.mxu2 }
 0x23e   : > { %v1213_v43 = vadd.f32 %v1212_v17, %v3764_v34 }
 0x240   : > { %v1356_v35 = vmax.f32 %v1213_v43, 0.0 }
 0x242   : > { %1254 = vmatmul.bf16.gmra.mxu2 %v1093_v15  ;;  %v1414_v25 = vpack.c.bf16 %v1356_v35, %v1355_v3 }
 0x244   : > { %1539 = vmatmul.bf16.gmra.mxu3 %v1414_v25 }
 0x245   : > { %v1215_v1 = vpop.f32.mrf.mxu2 }
 0x246   : > { %v1216_v41 = vadd.f32 %v1215_v1, %v3764_v34 }
 0x248   : > { %v1357_v29 = vmax.f32 %v1216_v41, 0.0 }
 0x24d   : > { %v1217_v48 = vpop.f32.mrf.mxu2 }
 0x24e   : > { %v1218_v62 = vadd.f32 %v1217_v48, %v3764_v34 }
 0x250   : > { %v1358_v52 = vmax.f32 %v1218_v62, 0.0 }
 0x252   : > { %1259 = vmatmul.bf16.gmra.mxu2 %v1094_v31  ;;  %v1415_v32 = vpack.c.bf16 %v1358_v52, %v1357_v29 }
 0x254   : > { %1544 = vmatmul.bf16.gmra.mxu3 %v1415_v32 }
 0x255   : > { %v1220_v56 = vpop.f32.mrf.mxu2 }
 0x256   : > { %v1221_v53 = vadd.f32 %v1220_v56, %v3764_v34 }
 0x258   : > { %v1359_v59 = vmax.f32 %v1221_v53, 0.0 }
 0x25d   : > { %v1222_v57 = vpop.f32.mrf.mxu2 }
 0x25e   : > { %v1223_v58 = vadd.f32 %v1222_v57, %v3764_v34 }
 0x260   : > { %v1360_v60 = vmax.f32 %v1223_v58, 0.0 }
 0x262   : > { %1264 = vmatmul.bf16.gmra.mxu2 %v3518_v61  ;;  %v1416_v8 = vpack.c.bf16 %v1360_v60, %v1359_v59 }
 0x264   : > { %1549 = vmatmul.bf16.gmra.mxu3 %v1416_v8 }
 0x265   : > { %v1225_v55 = vpop.f32.mrf.mxu2 }
 0x266   : > { %v1226_v0 = vadd.f32 %v1225_v55, %v3764_v34 }
 0x268   : > { %v1361_v19 = vmax.f32 %v1226_v0, 0.0 }
 0x26d   : > { %v1227_v39 = vpop.f32.mrf.mxu2 }
 0x26e   : > { %v1228_v38 = vadd.f32 %v1227_v39, %v3764_v34 }
 0x270   : > { %v1362_v37 = vmax.f32 %v1228_v38, 0.0 }
 0x272   : > { %1269 = vmatmul.bf16.gmra.mxu2 %v3530_v21  ;;  %v1417_v4 = vpack.c.bf16 %v1362_v37, %v1361_v19 }
 0x274   : > { %1554 = vmatmul.bf16.gmra.mxu3 %v1417_v4 }
 0x275   : > { %v1230_v6 = vpop.f32.mrf.mxu2 }
 0x276   : > { %v1231_v61 = vadd.f32 %v1230_v6, %v3764_v34 }
 0x277   : > { %v1515_v47 = vpop.f32.mrf.mxu3 }
 0x278   : > { %v1516_v14 = vadd.f32 %v1515_v47, %v3800_v5  ;;  %v1363_v3 = vmax.f32 %v1231_v61, 0.0 }
 0x27a   : > { %v1675_v45 = vmax.f32 %v1516_v14, 0.0 }
 0x27d   : > { %v1232_v13 = vpop.f32.mrf.mxu2 }
 0x27e   : > { %v1233_v17 = vadd.f32 %v1232_v13, %v3764_v34 }
 0x27f   : > { %v1517_v43 = vpop.f32.mrf.mxu3 }
 0x280   : > { %v1364_v35 = vmax.f32 %v1233_v17, 0.0  ;;  %v1518_v15 = vadd.f32 %v1517_v43, %v3800_v5 }
 0x282   : > { %v1676_v21 = vmax.f32 %v1518_v15, 0.0  ;;  %1274 = vmatmul.bf16.gmra.mxu2 %v3542_v46  ;;  %v1418_v25 = vpack.c.bf16 %v1364_v35, %v1363_v3 }
 0x284   : > { %v1739_v30 = vpack.c.bf16 %v1676_v21, %v1675_v45  ;;  %1559 = vmatmul.bf16.gmra.mxu3 %v1418_v25 }
 0x285   : > { %v1235_v33 = vpop.f32.mrf.mxu2 }
 0x286   : > { %1882 = vmatmul.bf16.vlgmr.msrb.gmra.mxu0 %v1739_v30  ;;  %2051 = vmatmul.bf16.vlgmr.msrb.gmra.mxu1 %v1739_v30  ;;  %v1236_v1 = vadd.f32 %v1235_v33, %v3764_v34 }
 0x287   : > { %v1520_v28 = vpop.f32.mrf.mxu3 }
 0x288   : > { %v1521_v12 = vadd.f32 %v1520_v28, %v3800_v5  ;;  %v1365_v16 = vmax.f32 %v1236_v1, 0.0 }
 0x28a   : > { %v1677_v46 = vmax.f32 %v1521_v12, 0.0 }
 0x28d   : > { %v1237_v26 = vpop.f32.mrf.mxu2 }
 0x28e   : > { %v1238_v49 = vadd.f32 %v1237_v26, %v3764_v34 }
 0x28f   : > { %v1522_v50 = vpop.f32.mrf.mxu3 }
 0x290   : > { %v1366_v63 = vmax.f32 %v1238_v49, 0.0  ;;  %v1523_v42 = vadd.f32 %v1522_v50, %v3800_v5 }
 0x292   : > { %v1678_v18 = vmax.f32 %v1523_v42, 0.0  ;;  %1279 = vmatmul.bf16.gmra.mxu2 %v3554_v7  ;;  %v1419_v20 = vpack.c.bf16 %v1366_v63, %v1365_v16 }
 0x294   : > { %1564 = vmatmul.bf16.gmra.mxu3 %v1419_v20  ;;  %v1740_v27 = vpack.c.bf16 %v1678_v18, %v1677_v46 }
 0x295   : > { %v1240_v41 = vpop.f32.mrf.mxu2 }
 0x296   : > { %1887 = vmatmul.bf16.gmra.mxu0 %v1740_v27  ;;  %2056 = vmatmul.bf16.gmra.mxu1 %v1740_v27  ;;  %v1241_v62 = vadd.f32 %v1240_v41, %v3764_v34 }
 0x297   : > { %v1525_v48 = vpop.f32.mrf.mxu3 }
 0x298   : > { %v1526_v52 = vadd.f32 %v1525_v48, %v3800_v5  ;;  %v1367_v56 = vmax.f32 %v1241_v62, 0.0 }
 0x29a   : > { %v1679_v7 = vmax.f32 %v1526_v52, 0.0 }
 0x29d   : > { %v1242_v29 = vpop.f32.mrf.mxu2 }
 0x29e   : > { %v1243_v31 = vadd.f32 %v1242_v29, %v3764_v34 }
 0x29f   : > { %v1527_v32 = vpop.f32.mrf.mxu3 }
 0x2a0   : > { %v1368_v53 = vmax.f32 %v1243_v31, 0.0  ;;  %v1528_v57 = vadd.f32 %v1527_v32, %v3800_v5 }
 0x2a2   : > { %v1680_v58 = vmax.f32 %v1528_v57, 0.0  ;;  %1284 = vmatmul.bf16.gmra.mxu2 %v3574_v36  ;;  %v1420_v59 = vpack.c.bf16 %v1368_v53, %v1367_v56 }
 0x2a4   : > { %1569 = vmatmul.bf16.gmra.mxu3 %v1420_v59  ;;  %v1741_v60 = vpack.c.bf16 %v1680_v58, %v1679_v7 }
 0x2a5   : > { %v1245_v8 = vpop.f32.mrf.mxu2 }
 0x2a6   : > { %1892 = vmatmul.bf16.gmra.mxu0 %v1741_v60  ;;  %2061 = vmatmul.bf16.gmra.mxu1 %v1741_v60  ;;  %v1246_v0 = vadd.f32 %v1245_v8, %v3764_v34 }
 0x2a7   : > { %v1530_v55 = vpop.f32.mrf.mxu3 }
 0x2a8   : > { %v1531_v38 = vadd.f32 %v1530_v55, %v3800_v5  ;;  %v1369_v4 = vmax.f32 %v1246_v0, 0.0 }
 0x2aa   : > { %v1681_v36 = vmax.f32 %v1531_v38, 0.0 }
 0x2ad   : > { %v1247_v39 = vpop.f32.mrf.mxu2 }
 0x2ae   : > { %v1248_v19 = vadd.f32 %v1247_v39, %v3764_v34 }
 0x2af   : > { %v1532_v37 = vpop.f32.mrf.mxu3 }
 0x2b0   : > { %v1370_v6 = vmax.f32 %v1248_v19, 0.0  ;;  %v1533_v47 = vadd.f32 %v1532_v37, %v3800_v5 }
 0x2b2   : > { %v1682_v61 = vmax.f32 %v1533_v47, 0.0  ;;  %1289 = vmatmul.bf16.gmra.mxu2 %v3594_v2  ;;  %v1421_v13 = vpack.c.bf16 %v1370_v6, %v1369_v4 }
 0x2b4   : > { %1574 = vmatmul.bf16.gmra.mxu3 %v1421_v13  ;;  %v1742_v14 = vpack.c.bf16 %v1682_v61, %v1681_v36 }
 0x2b5   : > { %v1250_v17 = vpop.f32.mrf.mxu2 }
 0x2b6   : > { %1897 = vmatmul.bf16.gmra.mxu0 %v1742_v14  ;;  %2066 = vmatmul.bf16.gmra.mxu1 %v1742_v14  ;;  %v1251_v3 = vadd.f32 %v1250_v17, %v3764_v34 }
 0x2b7   : > { %v1535_v43 = vpop.f32.mrf.mxu3 }
 0x2b8   : > { %v1536_v15 = vadd.f32 %v1535_v43, %v3800_v5  ;;  %v1371_v25 = vmax.f32 %v1251_v3, 0.0 }
 0x2ba   : > { %v1683_v2 = vmax.f32 %v1536_v15, 0.0  ;;  %v1788_v15 = vld [vmem:[#allocation11 + $0x3] ss:$8 sm:$0x3] }
 0x2bd   : > { %v1252_v35 = vpop.f32.mrf.mxu2 }
 0x2be   : > { %v1253_v45 = vadd.f32 %v1252_v35, %v3764_v34 }
 0x2bf   : > { %v1537_v21 = vpop.f32.mrf.mxu3 }
 0x2c0   : > { %v1372_v30 = vmax.f32 %v1253_v45, 0.0  ;;  %v1538_v33 = vadd.f32 %v1537_v21, %v3800_v5 }
 0x2c2   : > { %v1684_v28 = vmax.f32 %v1538_v33, 0.0  ;;  %1294 = vmatmul.bf16.gmra.mxu2 %v3618_v40  ;;  %v1422_v1 = vpack.c.bf16 %v1372_v30, %v1371_v25  ;;  %v3845_v33 = vperm.slane %v1788_v15, 0 }
 0x2c4   : > { %1579 = vmatmul.bf16.gmra.mxu3 %v1422_v1  ;;  %v1743_v26 = vpack.c.bf16 %v1684_v28, %v1683_v2  ;;  %v3848_v1 = vperm.slane %v1788_v15, 1 }
 0x2c5   : > { %v1255_v12 = vpop.f32.mrf.mxu2 }
 0x2c6   : > { %1902 = vmatmul.bf16.gmra.mxu0 %v1743_v26  ;;  %2071 = vmatmul.bf16.gmra.mxu1 %v1743_v26  ;;  %v1256_v50 = vadd.f32 %v1255_v12, %v3764_v34 }
 0x2c7   : > { %v1540_v49 = vpop.f32.mrf.mxu3 }
 0x2c8   : > { %v1541_v63 = vadd.f32 %v1540_v49, %v3800_v5  ;;  %v1373_v18 = vmax.f32 %v1256_v50, 0.0 }
 0x2ca   : > { %v1685_v40 = vmax.f32 %v1541_v63, 0.0 }
 0x2cd   : > { %v1257_v16 = vpop.f32.mrf.mxu2 }
 0x2ce   : > { %v1258_v42 = vadd.f32 %v1257_v16, %v3764_v34 }
 0x2cf   : > { %v1542_v46 = vpop.f32.mrf.mxu3 }
 0x2d0   : > { %v1374_v20 = vmax.f32 %v1258_v42, 0.0  ;;  %v1543_v27 = vadd.f32 %v1542_v46, %v3800_v5 }
 0x2d2   : > { %v1686_v41 = vmax.f32 %v1543_v27, 0.0  ;;  %1299 = vmatmul.bf16.gmra.mxu2 %v3640_v9  ;;  %v1423_v48 = vpack.c.bf16 %v1374_v20, %v1373_v18 }
 0x2d4   : > { %1584 = vmatmul.bf16.gmra.mxu3 %v1423_v48  ;;  %v1744_v62 = vpack.c.bf16 %v1686_v41, %v1685_v40 }
 0x2d5   : > { %v1260_v29 = vpop.f32.mrf.mxu2 }
 0x2d6   : > { %1907 = vmatmul.bf16.gmra.mxu0 %v1744_v62  ;;  %2076 = vmatmul.bf16.gmra.mxu1 %v1744_v62  ;;  %v1261_v31 = vadd.f32 %v1260_v29, %v3764_v34 }
 0x2d7   : > { %v1545_v52 = vpop.f32.mrf.mxu3 }
 0x2d8   : > { %v1546_v56 = vadd.f32 %v1545_v52, %v3800_v5  ;;  %v1375_v7 = vmax.f32 %v1261_v31, 0.0 }
 0x2da   : > { %v1687_v9 = vmax.f32 %v1546_v56, 0.0 }
 0x2dd   : > { %v1262_v32 = vpop.f32.mrf.mxu2 }
 0x2de   : > { %v1263_v53 = vadd.f32 %v1262_v32, %v3764_v34 }
 0x2df   : > { %v1547_v57 = vpop.f32.mrf.mxu3 }
 0x2e0   : > { %v1376_v58 = vmax.f32 %v1263_v53, 0.0  ;;  %v1548_v59 = vadd.f32 %v1547_v57, %v3800_v5 }
 0x2e2   : > { %v1688_v60 = vmax.f32 %v1548_v59, 0.0  ;;  %1304 = vmatmul.bf16.gmra.mxu2 %v3662_v54  ;;  %v1424_v8 = vpack.c.bf16 %v1376_v58, %v1375_v7 }
 0x2e4   : > { %1589 = vmatmul.bf16.gmra.mxu3 %v1424_v8  ;;  %v1745_v55 = vpack.c.bf16 %v1688_v60, %v1687_v9 }
 0x2e5   : > { %v1265_v0 = vpop.f32.mrf.mxu2 }
 0x2e6   : > { %1912 = vmatmul.bf16.gmra.mxu0 %v1745_v55  ;;  %2081 = vmatmul.bf16.gmra.mxu1 %v1745_v55  ;;  %v1266_v38 = vadd.f32 %v1265_v0, %v3764_v34 }
 0x2e7   : > { %v1550_v39 = vpop.f32.mrf.mxu3 }
 0x2e8   : > { %v1551_v37 = vadd.f32 %v1550_v39, %v3800_v5  ;;  %v1377_v47 = vmax.f32 %v1266_v38, 0.0 }
 0x2ea   : > { %v1689_v54 = vmax.f32 %v1551_v37, 0.0 }
 0x2ed   : > { %v1267_v19 = vpop.f32.mrf.mxu2 }
 0x2ee   : > { %v1268_v4 = vadd.f32 %v1267_v19, %v3764_v34 }
 0x2ef   : > { %v1552_v6 = vpop.f32.mrf.mxu3 }
 0x2f0   : > { %v1378_v36 = vmax.f32 %v1268_v4, 0.0  ;;  %v1553_v61 = vadd.f32 %v1552_v6, %v3800_v5 }
 0x2f2   : > { %v1690_v13 = vmax.f32 %v1553_v61, 0.0  ;;  %1309 = vmatmul.bf16.gmra.mxu2 %v3684_v23  ;;  %v1425_v14 = vpack.c.bf16 %v1378_v36, %v1377_v47 }
 0x2f4   : > { %1594 = vmatmul.bf16.gmra.mxu3 %v1425_v14  ;;  %v1746_v17 = vpack.c.bf16 %v1690_v13, %v1689_v54 }
 0x2f5   : > { %v1270_v43 = vpop.f32.mrf.mxu2 }
 0x2f6   : > { %1917 = vmatmul.bf16.gmra.mxu0 %v1746_v17  ;;  %2086 = vmatmul.bf16.gmra.mxu1 %v1746_v17  ;;  %v1271_v35 = vadd.f32 %v1270_v43, %v3764_v34 }
 0x2f7   : > { %v1555_v3 = vpop.f32.mrf.mxu3 }
 0x2f8   : > { %v1556_v21 = vadd.f32 %v1555_v3, %v3800_v5  ;;  %v1379_v2 = vmax.f32 %v1271_v35, 0.0 }
 0x2fa   : > { %v1691_v26 = vmax.f32 %v1556_v21, 0.0 }
 0x2fd   : > { %v1272_v45 = vpop.f32.mrf.mxu2 }
 0x2fe   : > { %v1273_v25 = vadd.f32 %v1272_v45, %v3764_v34 }
 0x2ff   : > { %v1557_v30 = vpop.f32.mrf.mxu3 }
 0x300   : > { %v1380_v23 = vmax.f32 %v1273_v25, 0.0  ;;  %v1558_v28 = vadd.f32 %v1557_v30, %v3800_v5 }
 0x302   : > { %v1692_v12 = vmax.f32 %v1558_v28, 0.0  ;;  %1314 = vmatmul.bf16.gmra.mxu2 %v3706_v10  ;;  %v1426_v49 = vpack.c.bf16 %v1380_v23, %v1379_v2 }
 0x303   : > { %v1883_v50 = vpop.f32.mrf.mxu0  ;;  %v2052_v16 = vpop.f32.mrf.mxu1 }
 0x304   : > { %v1884_v63 = vadd.f32 %v1883_v50, %v3845_v33  ;;  %v2053_v42 = vadd.f32 %v2052_v16, %v3848_v1  ;;  %1599 = vmatmul.bf16.gmra.mxu3 %v1426_v49  ;;  %v1747_v46 = vpack.c.bf16 %v1692_v12, %v1691_v26 }
 0x305   : > { %v1275_v18 = vpop.f32.mrf.mxu2 }
 0x306   : > { %v2212_v20 = vmax.f32 %v1884_v63, 0.0  ;;  %v2213_v27 = vmax.f32 %v2053_v42, 0.0  ;;  %1922 = vmatmul.bf16.gmra.mxu0 %v1747_v46  ;;  %2091 = vmatmul.bf16.gmra.mxu1 %v1747_v46  ;;  %v1276_v48 = vadd.f32 %v1275_v18, %v3764_v34 }
 0x307   : > { %v1560_v40 = vpop.f32.mrf.mxu3 }
 0x308   : > { %2340 = vst [vmem:[%s3855_s29] sm:$0xff] %v2212_v20  ;;  %v1561_v31 = vadd.f32 %v1560_v40, %v3800_v5  ;;  %v1381_v7 = vmax.f32 %v1276_v48, 0.0 }
 0x309   : > { %2341 = vst [vmem:[%s3855_s29 + $0x8] sm:$0xff] %v2213_v27 }
 0x30a   : > { %v1693_v9 = vmax.f32 %v1561_v31, 0.0 }
 0x30b   : > { %v1885_v10 = vpop.f32.mrf.mxu0  ;;  %v2054_v41 = vpop.f32.mrf.mxu1 }
 0x30c   : > { %v1886_v62 = vadd.f32 %v1885_v10, %v3845_v33  ;;  %v2055_v29 = vadd.f32 %v2054_v41, %v3848_v1 }
 0x30d   : > { %v1277_v52 = vpop.f32.mrf.mxu2 }
 0x30e   : > { %v2214_v32 = vmax.f32 %v1886_v62, 0.0  ;;  %v2215_v56 = vmax.f32 %v2055_v29, 0.0  ;;  %v1278_v53 = vadd.f32 %v1277_v52, %v3764_v34 }
 0x30f   : > { %v1562_v57 = vpop.f32.mrf.mxu3 }
 0x310   : > { %2342 = vst [vmem:[%s3855_s29 + $0x10] sm:$0xff] %v2214_v32  ;;  %v1382_v58 = vmax.f32 %v1278_v53, 0.0  ;;  %v1563_v59 = vadd.f32 %v1562_v57, %v3800_v5 }
 0x311   : > { %2343 = vst [vmem:[%s3855_s29 + $0x18] sm:$0xff] %v2215_v56 }
 0x312   : > { %v1694_v60 = vmax.f32 %v1563_v59, 0.0  ;;  %1319 = vmatmul.bf16.gmra.mxu2 %v3724_v44  ;;  %v1427_v8 = vpack.c.bf16 %v1382_v58, %v1381_v7 }
 0x313   : > { %v1888_v55 = vpop.f32.mrf.mxu0  ;;  %v2057_v0 = vpop.f32.mrf.mxu1 }
 0x314   : > { %v1889_v39 = vadd.f32 %v1888_v55, %v3845_v33  ;;  %v2058_v38 = vadd.f32 %v2057_v0, %v3848_v1  ;;  %1604 = vmatmul.bf16.gmra.mxu3 %v1427_v8  ;;  %v1748_v19 = vpack.c.bf16 %v1694_v60, %v1693_v9 }
 0x315   : > { %v1280_v37 = vpop.f32.mrf.mxu2 }
 0x316   : > { %v2216_v4 = vmax.f32 %v1889_v39, 0.0  ;;  %v2217_v6 = vmax.f32 %v2058_v38, 0.0  ;;  %1927 = vmatmul.bf16.gmra.mxu0 %v1748_v19  ;;  %2096 = vmatmul.bf16.gmra.mxu1 %v1748_v19  ;;  %v1281_v61 = vadd.f32 %v1280_v37, %v3764_v34 }
 0x317   : > { %v1565_v47 = vpop.f32.mrf.mxu3 }
 0x318   : > { %2344 = vst [vmem:[%s3855_s29 + $0x20] sm:$0xff] %v2216_v4  ;;  %v1566_v17 = vadd.f32 %v1565_v47, %v3800_v5  ;;  %v1383_v45 = vmax.f32 %v1281_v61, 0.0 }
 0x319   : > { %2345 = vst [vmem:[%s3855_s29 + $0x28] sm:$0xff] %v2217_v6 }
 0x31a   : > { %v1695_v30 = vmax.f32 %v1566_v17, 0.0 }
 0x31b   : > { %v1890_v44 = vpop.f32.mrf.mxu0  ;;  %v2059_v36 = vpop.f32.mrf.mxu1 }
 0x31c   : > { %v1891_v54 = vadd.f32 %v1890_v44, %v3845_v33  ;;  %v2060_v13 = vadd.f32 %v2059_v36, %v3848_v1 }
 0x31d   : > { %v1282_v14 = vpop.f32.mrf.mxu2 }
 0x31e   : > { %v2218_v43 = vmax.f32 %v1891_v54, 0.0  ;;  %v2219_v3 = vmax.f32 %v2060_v13, 0.0  ;;  %v1283_v35 = vadd.f32 %v1282_v14, %v3764_v34 }
 0x31f   : > { %v1567_v15 = vpop.f32.mrf.mxu3 }
 0x320   : > { %2346 = vst [vmem:[%s3855_s29 + $0x30] sm:$0xff] %v2218_v43  ;;  %v1384_v21 = vmax.f32 %v1283_v35, 0.0  ;;  %v1568_v25 = vadd.f32 %v1567_v15, %v3800_v5 }
 0x321   : > { %2347 = vst [vmem:[%s3855_s29 + $0x38] sm:$0xff] %v2219_v3 }
 0x322   : > { %v1696_v2 = vmax.f32 %v1568_v25, 0.0  ;;  %1324 = vmatmul.bf16.gmra.mxu2 %v3738_v24  ;;  %v1428_v23 = vpack.c.bf16 %v1384_v21, %v1383_v45 }
 0x323   : > { %v1893_v28 = vpop.f32.mrf.mxu0  ;;  %v2062_v26 = vpop.f32.mrf.mxu1 }
 0x324   : > { %v1894_v12 = vadd.f32 %v1893_v28, %v3845_v33  ;;  %v2063_v49 = vadd.f32 %v2062_v26, %v3848_v1  ;;  %1609 = vmatmul.bf16.gmra.mxu3 %v1428_v23  ;;  %v1749_v50 = vpack.c.bf16 %v1696_v2, %v1695_v30 }
 0x325   : > { %v1285_v16 = vpop.f32.mrf.mxu2 }
 0x326   : > { %v2220_v63 = vmax.f32 %v1894_v12, 0.0  ;;  %v2221_v42 = vmax.f32 %v2063_v49, 0.0  ;;  %1932 = vmatmul.bf16.gmra.mxu0 %v1749_v50  ;;  %2101 = vmatmul.bf16.gmra.mxu1 %v1749_v50  ;;  %v1286_v20 = vadd.f32 %v1285_v16, %v3764_v34 }
 0x327   : > { %v1570_v46 = vpop.f32.mrf.mxu3 }
 0x328   : > { %2348 = vst [vmem:[%s3855_s29 + $0x40] sm:$0xff] %v2220_v63  ;;  %v1571_v41 = vadd.f32 %v1570_v46, %v3800_v5  ;;  %v1385_v31 = vmax.f32 %v1286_v20, 0.0 }
 0x329   : > { %2349 = vst [vmem:[%s3855_s29 + $0x48] sm:$0xff] %v2221_v42 }
 0x32a   : > { %v1697_v53 = vmax.f32 %v1571_v41, 0.0 }
 0x32b   : > { %v1895_v24 = vpop.f32.mrf.mxu0  ;;  %v2064_v18 = vpop.f32.mrf.mxu1 }
 0x32c   : > { %v1896_v27 = vadd.f32 %v1895_v24, %v3845_v33  ;;  %v2065_v40 = vadd.f32 %v2064_v18, %v3848_v1 }
 0x32d   : > { %v1287_v10 = vpop.f32.mrf.mxu2 }
 0x32e   : > { %v2222_v48 = vmax.f32 %v1896_v27, 0.0  ;;  %v2223_v62 = vmax.f32 %v2065_v40, 0.0  ;;  %v1288_v29 = vadd.f32 %v1287_v10, %v3764_v34 }
 0x32f   : > { %v1572_v52 = vpop.f32.mrf.mxu3 }
 0x330   : > { %2350 = vst [vmem:[%s3855_s29 + $0x50] sm:$0xff] %v2222_v48  ;;  %v1386_v32 = vmax.f32 %v1288_v29, 0.0  ;;  %v1573_v56 = vadd.f32 %v1572_v52, %v3800_v5 }
 0x331   : > { %2351 = vst [vmem:[%s3855_s29 + $0x58] sm:$0xff] %v2223_v62 }
 0x332   : > { %v1429_v57 = vpack.c.bf16 %v1386_v32, %v1385_v31  ;;  %v1698_v7 = vmax.f32 %v1573_v56, 0.0  ;;  %1329 = vmatmul.bf16.gmra.mxu2 %v3747_v51 }
 0x333   : > { %v1898_v58 = vpop.f32.mrf.mxu0  ;;  %v2067_v59 = vpop.f32.mrf.mxu1 }
 0x334   : > { %v1899_v9 = vadd.f32 %v1898_v58, %v3845_v33  ;;  %v2068_v60 = vadd.f32 %v2067_v59, %v3848_v1  ;;  %1614 = vmatmul.bf16.gmra.mxu3 %v1429_v57  ;;  %v1750_v8 = vpack.c.bf16 %v1698_v7, %v1697_v53 }
 0x335   : > { %v1290_v55 = vpop.f32.mrf.mxu2 }
 0x336   : > { %v2224_v0 = vmax.f32 %v1899_v9, 0.0  ;;  %v2225_v39 = vmax.f32 %v2068_v60, 0.0  ;;  %1937 = vmatmul.bf16.gmra.mxu0 %v1750_v8  ;;  %2106 = vmatmul.bf16.gmra.mxu1 %v1750_v8  ;;  %v1291_v37 = vadd.f32 %v1290_v55, %v3764_v34  ;;  %v3924_v9 = vld [vmem:[#allocation11 + $0x1] ss:$0 sm:$0xff] }
 0x337   : > { %v1575_v38 = vpop.f32.mrf.mxu3 }
 0x338   : > { %2352 = vst [vmem:[%s3855_s29 + $0x60] sm:$0xff] %v2224_v0  ;;  %v1576_v44 = vadd.f32 %v1575_v38, %v3800_v5  ;;  %v1387_v14 = vmax.f32 %v1291_v37, 0.0 }
 0x339   : > { %2353 = vst [vmem:[%s3855_s29 + $0x68] sm:$0xff] %v2225_v39 }
 0x33a   : > { %v1699_v3 = vmax.f32 %v1576_v44, 0.0 }
 0x33b   : > { %v1900_v19 = vpop.f32.mrf.mxu0  ;;  %v2069_v51 = vpop.f32.mrf.mxu1 }
 0x33c   : > { %v1901_v4 = vadd.f32 %v1900_v19, %v3845_v33  ;;  %v2070_v6 = vadd.f32 %v2069_v51, %v3848_v1 }
 0x33d   : > { %v1292_v47 = vpop.f32.mrf.mxu2 }
 0x33e   : > { %v2226_v36 = vmax.f32 %v1901_v4, 0.0  ;;  %v2227_v61 = vmax.f32 %v2070_v6, 0.0  ;;  %v1293_v54 = vadd.f32 %v1292_v47, %v3764_v34 }
 0x33f   : > { %v1577_v13 = vpop.f32.mrf.mxu3 }
 0x340   : > { %2354 = vst [vmem:[%s3855_s29 + $0x70] sm:$0xff] %v2226_v36  ;;  %v1388_v17 = vmax.f32 %v1293_v54, 0.0  ;;  %v1578_v43 = vadd.f32 %v1577_v13, %v3800_v5 }
 0x341   : > { %2355 = vst [vmem:[%s3855_s29 + $0x78] sm:$0xff] %v2227_v61 }
 0x342   : > { %v1430_v35 = vpack.c.bf16 %v1388_v17, %v1387_v14  ;;  %v1700_v15 = vmax.f32 %v1578_v43, 0.0  ;;  %1334 = vmatmul.bf16.gmra.mxu2 %v3755_v22 }
 0x343   : > { %v1903_v45 = vpop.f32.mrf.mxu0  ;;  %v2072_v21 = vpop.f32.mrf.mxu1 }
 0x344   : > { %v1904_v25 = vadd.f32 %v1903_v45, %v3845_v33  ;;  %v2073_v30 = vadd.f32 %v2072_v21, %v3848_v1  ;;  %1619 = vmatmul.bf16.gmra.mxu3 %v1430_v35  ;;  %v1751_v2 = vpack.c.bf16 %v1700_v15, %v1699_v3 }
 0x345   : > { %v1295_v23 = vpop.f32.mrf.mxu2 }
 0x346   : > { %v2228_v28 = vmax.f32 %v1904_v25, 0.0  ;;  %v2229_v26 = vmax.f32 %v2073_v30, 0.0  ;;  %1942 = vmatmul.bf16.gmra.mxu0 %v1751_v2  ;;  %2111 = vmatmul.bf16.gmra.mxu1 %v1751_v2  ;;  %v1296_v50 = vadd.f32 %v1295_v23, %v3764_v34 }
 0x347   : > { %v1580_v12 = vpop.f32.mrf.mxu3 }
 0x348   : > { %2356 = vst [vmem:[%s3855_s29 + $0x80] sm:$0xff] %v2228_v28  ;;  %v1581_v46 = vadd.f32 %v1580_v12, %v3800_v5  ;;  %v1389_v40 = vmax.f32 %v1296_v50, 0.0 }
 0x349   : > { %2357 = vst [vmem:[%s3855_s29 + $0x88] sm:$0xff] %v2229_v26 }
 0x34a   : > { %v1701_v48 = vmax.f32 %v1581_v46, 0.0 }
 0x34b   : > { %v1905_v49 = vpop.f32.mrf.mxu0  ;;  %v2074_v22 = vpop.f32.mrf.mxu1 }
 0x34c   : > { %v1906_v16 = vadd.f32 %v1905_v49, %v3845_v33  ;;  %v2075_v63 = vadd.f32 %v2074_v22, %v3848_v1 }
 0x34d   : > { %v1297_v42 = vpop.f32.mrf.mxu2 }
 0x34e   : > { %v2230_v24 = vmax.f32 %v1906_v16, 0.0  ;;  %v2231_v18 = vmax.f32 %v2075_v63, 0.0  ;;  %v1298_v20 = vadd.f32 %v1297_v42, %v3764_v34 }
 0x34f   : > { %v1582_v27 = vpop.f32.mrf.mxu3 }
 0x350   : > { %2358 = vst [vmem:[%s3855_s29 + $0x90] sm:$0xff] %v2230_v24  ;;  %v1390_v10 = vmax.f32 %v1298_v20, 0.0  ;;  %v1583_v41 = vadd.f32 %v1582_v27, %v3800_v5 }
 0x351   : > { %2359 = vst [vmem:[%s3855_s29 + $0x98] sm:$0xff] %v2231_v18 }
 0x352   : > { %v1431_v62 = vpack.c.bf16 %v1390_v10, %v1389_v40  ;;  %v1702_v29 = vmax.f32 %v1583_v41, 0.0  ;;  %1339 = vmatmul.bf16.gmra.mxu2 %v3762_v11 }
 0x353   : > { %v1908_v52 = vpop.f32.mrf.mxu0  ;;  %v2077_v31 = vpop.f32.mrf.mxu1 }
 0x354   : > { %v1909_v32 = vadd.f32 %v1908_v52, %v3845_v33  ;;  %v2078_v34 = vadd.f32 %v2077_v31, %v3848_v1  ;;  %1624 = vmatmul.bf16.gmra.mxu3 %v1431_v62  ;;  %v1752_v56 = vpack.c.bf16 %v1702_v29, %v1701_v48 }
 0x355   : > { %v1300_v53 = vpop.f32.mrf.mxu2 }
 0x356   : > { %v2232_v57 = vmax.f32 %v1909_v32, 0.0  ;;  %v2233_v7 = vmax.f32 %v2078_v34, 0.0  ;;  %1947 = vmatmul.bf16.gmra.mxu0 %v1752_v56  ;;  %2116 = vmatmul.bf16.gmra.mxu1 %v1752_v56  ;;  %v1301_v60 = vadd.f32 %v3924_v9, %v1300_v53 }
 0x357   : > { %v1585_v58 = vpop.f32.mrf.mxu3 }
 0x358   : > { %2360 = vst [vmem:[%s3855_s29 + $0xa0] sm:$0xff] %v2232_v57  ;;  %v1586_v39 = vadd.f32 %v1585_v58, %v3800_v5  ;;  %v1391_v4 = vmax.f32 %v1301_v60, 0.0 }
 0x359   : > { %2361 = vst [vmem:[%s3855_s29 + $0xa8] sm:$0xff] %v2233_v7 }
 0x35a   : > { %v1703_v44 = vmax.f32 %v1586_v39, 0.0 }
 0x35b   : > { %v1910_v59 = vpop.f32.mrf.mxu0  ;;  %v2079_v11 = vpop.f32.mrf.mxu1 }
 0x35c   : > { %v1911_v8 = vadd.f32 %v1910_v59, %v3845_v33  ;;  %v2080_v55 = vadd.f32 %v2079_v11, %v3848_v1 }
 0x35d   : > { %v1302_v0 = vpop.f32.mrf.mxu2 }
 0x35e   : > { %v2234_v38 = vmax.f32 %v1911_v8, 0.0  ;;  %v2235_v19 = vmax.f32 %v2080_v55, 0.0  ;;  %v1303_v51 = vadd.f32 %v3924_v9, %v1302_v0 }
 0x35f   : > { %v1587_v37 = vpop.f32.mrf.mxu3 }
 0x360   : > { %2362 = vst [vmem:[%s3855_s29 + $0xb0] sm:$0xff] %v2234_v38  ;;  %v1392_v6 = vmax.f32 %v1303_v51, 0.0  ;;  %v1588_v47 = vadd.f32 %v1587_v37, %v3800_v5 }
 0x361   : > { %2363 = vst [vmem:[%s3855_s29 + $0xb8] sm:$0xff] %v2235_v19 }
 0x362   : > { %v1432_v36 = vpack.c.bf16 %v1392_v6, %v1391_v4  ;;  %v1704_v61 = vmax.f32 %v1588_v47, 0.0 }
 0x363   : > { %v1913_v54 = vpop.f32.mrf.mxu0  ;;  %v2082_v13 = vpop.f32.mrf.mxu1 }
 0x364   : > { %v1914_v14 = vadd.f32 %v1913_v54, %v3845_v33  ;;  %v2083_v17 = vadd.f32 %v2082_v13, %v3848_v1  ;;  %1629 = vmatmul.bf16.gmra.mxu3 %v1432_v36  ;;  %v1753_v43 = vpack.c.bf16 %v1704_v61, %v1703_v44 }
 0x365   : > { %v1305_v3 = vpop.f32.mrf.mxu2 }
 0x366   : > { %v2236_v35 = vmax.f32 %v1914_v14, 0.0  ;;  %v2237_v15 = vmax.f32 %v2083_v17, 0.0  ;;  %1952 = vmatmul.bf16.gmra.mxu0 %v1753_v43  ;;  %2121 = vmatmul.bf16.gmra.mxu1 %v1753_v43  ;;  %v1306_v30 = vadd.f32 %v3924_v9, %v1305_v3 }
 0x367   : > { %v1590_v45 = vpop.f32.mrf.mxu3 }
 0x368   : > { %2364 = vst [vmem:[%s3855_s29 + $0xc0] sm:$0xff] %v2236_v35  ;;  %v1591_v26 = vadd.f32 %v1590_v45, %v3800_v5  ;;  %v1393_v16 = vmax.f32 %v1306_v30, 0.0 }
 0x369   : > { %2365 = vst [vmem:[%s3855_s29 + $0xc8] sm:$0xff] %v2237_v15 }
 0x36a   : > { %v1705_v46 = vmax.f32 %v1591_v26, 0.0 }
 0x36b   : > { %v1915_v21 = vpop.f32.mrf.mxu0  ;;  %v2084_v25 = vpop.f32.mrf.mxu1 }
 0x36c   : > { %v1916_v2 = vadd.f32 %v1915_v21, %v3845_v33  ;;  %v2085_v23 = vadd.f32 %v2084_v25, %v3848_v1 }
 0x36d   : > { %v1307_v28 = vpop.f32.mrf.mxu2 }
 0x36e   : > { %v2238_v12 = vmax.f32 %v1916_v2, 0.0  ;;  %v2239_v49 = vmax.f32 %v2085_v23, 0.0  ;;  %v1308_v22 = vadd.f32 %v3924_v9, %v1307_v28 }
 0x36f   : > { %v1592_v50 = vpop.f32.mrf.mxu3 }
 0x370   : > { %2366 = vst [vmem:[%s3855_s29 + $0xd0] sm:$0xff] %v2238_v12  ;;  %v1394_v63 = vmax.f32 %v1308_v22, 0.0  ;;  %v1593_v42 = vadd.f32 %v1592_v50, %v3800_v5 }
 0x371   : > { %2367 = vst [vmem:[%s3855_s29 + $0xd8] sm:$0xff] %v2239_v49 }
 0x372   : > { %v1433_v24 = vpack.c.bf16 %v1394_v63, %v1393_v16  ;;  %v1706_v18 = vmax.f32 %v1593_v42, 0.0 }
 0x373   : > { %v1918_v20 = vpop.f32.mrf.mxu0  ;;  %v2087_v27 = vpop.f32.mrf.mxu1 }
 0x374   : > { %v1919_v40 = vadd.f32 %v1918_v20, %v3845_v33  ;;  %v2088_v10 = vadd.f32 %v2087_v27, %v3848_v1  ;;  %1634 = vmatmul.bf16.gmra.mxu3 %v1433_v24  ;;  %v1754_v41 = vpack.c.bf16 %v1706_v18, %v1705_v46 }
 0x375   : > { %v1310_v48 = vpop.f32.mrf.mxu2 }
 0x376   : > { %v2240_v62 = vmax.f32 %v1919_v40, 0.0  ;;  %v2241_v29 = vmax.f32 %v2088_v10, 0.0  ;;  %1957 = vmatmul.bf16.gmra.mxu0 %v1754_v41  ;;  %2126 = vmatmul.bf16.gmra.mxu1 %v1754_v41  ;;  %v1311_v34 = vadd.f32 %v3924_v9, %v1310_v48 }
 0x377   : > { %v1595_v52 = vpop.f32.mrf.mxu3 }
 0x378   : > { %2368 = vst [vmem:[%s3855_s29 + $0xe0] sm:$0xff] %v2240_v62  ;;  %v1596_v7 = vadd.f32 %v1595_v52, %v3800_v5  ;;  %v1395_v8 = vmax.f32 %v1311_v34, 0.0 }
 0x379   : > { %2369 = vst [vmem:[%s3855_s29 + $0xe8] sm:$0xff] %v2241_v29 }
 0x37a   : > { %v1707_v39 = vmax.f32 %v1596_v7, 0.0 }
 0x37b   : > { %v1920_v31 = vpop.f32.mrf.mxu0  ;;  %v2089_v32 = vpop.f32.mrf.mxu1 }
 0x37c   : > { %v1921_v56 = vadd.f32 %v1920_v31, %v3845_v33  ;;  %v2090_v53 = vadd.f32 %v2089_v32, %v3848_v1 }
 0x37d   : > { %v1312_v57 = vpop.f32.mrf.mxu2 }
 0x37e   : > { %v2242_v58 = vmax.f32 %v1921_v56, 0.0  ;;  %v2243_v59 = vmax.f32 %v2090_v53, 0.0  ;;  %v1313_v11 = vadd.f32 %v3924_v9, %v1312_v57 }
 0x37f   : > { %v1597_v60 = vpop.f32.mrf.mxu3 }
 0x380   : > { %2370 = vst [vmem:[%s3855_s29 + $0xf0] sm:$0xff] %v2242_v58  ;;  %v1396_v55 = vmax.f32 %v1313_v11, 0.0  ;;  %v1598_v0 = vadd.f32 %v1597_v60, %v3800_v5 }
 0x381   : > { %2371 = vst [vmem:[%s3855_s29 + $0xf8] sm:$0xff] %v2243_v59 }
 0x382   : > { %v1434_v38 = vpack.c.bf16 %v1396_v55, %v1395_v8  ;;  %v1708_v19 = vmax.f32 %v1598_v0, 0.0 }
 0x383   : > { %v1923_v51 = vpop.f32.mrf.mxu0  ;;  %v2092_v37 = vpop.f32.mrf.mxu1 }
 0x384   : > { %v1924_v4 = vadd.f32 %v1923_v51, %v3845_v33  ;;  %v2093_v6 = vadd.f32 %v2092_v37, %v3848_v1  ;;  %1639 = vmatmul.bf16.gmra.mxu3 %v1434_v38  ;;  %v1755_v47 = vpack.c.bf16 %v1708_v19, %v1707_v39 }
 0x385   : > { %v1315_v44 = vpop.f32.mrf.mxu2 }
 0x386   : > { %v2244_v36 = vmax.f32 %v1924_v4, 0.0  ;;  %v2245_v61 = vmax.f32 %v2093_v6, 0.0  ;;  %1962 = vmatmul.bf16.gmra.mxu0 %v1755_v47  ;;  %2131 = vmatmul.bf16.gmra.mxu1 %v1755_v47  ;;  %v1316_v17 = vadd.f32 %v3924_v9, %v1315_v44 }
 0x387   : > { %v1600_v54 = vpop.f32.mrf.mxu3 }
 0x388   : > { %2372 = vst [vmem:[%s3855_s29 + $0x100] sm:$0xff] %v2244_v36  ;;  %v1601_v15 = vadd.f32 %v1600_v54, %v3800_v5  ;;  %v1397_v2 = vmax.f32 %v1316_v17, 0.0  ;;  %v3989_v36 = vld [vmem:[#allocation11 + $0x2] ss:$0 sm:$0xff] }
 0x389   : > { %2373 = vst [vmem:[%s3855_s29 + $0x108] sm:$0xff] %v2245_v61 }
 0x38a   : > { %v1709_v26 = vmax.f32 %v1601_v15, 0.0 }
 0x38b   : > { %v1925_v13 = vpop.f32.mrf.mxu0  ;;  %v2094_v14 = vpop.f32.mrf.mxu1 }
 0x38c   : > { %v1926_v43 = vadd.f32 %v1925_v13, %v3845_v33  ;;  %v2095_v3 = vadd.f32 %v2094_v14, %v3848_v1 }
 0x38d   : > { %v1317_v35 = vpop.f32.mrf.mxu2 }
 0x38e   : > { %v2246_v45 = vmax.f32 %v1926_v43, 0.0  ;;  %v2247_v21 = vmax.f32 %v2095_v3, 0.0  ;;  %v1318_v25 = vadd.f32 %v3924_v9, %v1317_v35 }
 0x38f   : > { %v1602_v30 = vpop.f32.mrf.mxu3 }
 0x390   : > { %2374 = vst [vmem:[%s3855_s29 + $0x110] sm:$0xff] %v2246_v45  ;;  %v1398_v23 = vmax.f32 %v1318_v25, 0.0  ;;  %v1603_v28 = vadd.f32 %v1602_v30, %v3800_v5 }
 0x391   : > { %2375 = vst [vmem:[%s3855_s29 + $0x118] sm:$0xff] %v2247_v21 }
 0x392   : > { %v1435_v12 = vpack.c.bf16 %v1398_v23, %v1397_v2  ;;  %v1710_v49 = vmax.f32 %v1603_v28, 0.0 }
 0x393   : > { %v1928_v22 = vpop.f32.mrf.mxu0  ;;  %v2097_v50 = vpop.f32.mrf.mxu1 }
 0x394   : > { %v1929_v16 = vadd.f32 %v1928_v22, %v3845_v33  ;;  %v2098_v63 = vadd.f32 %v2097_v50, %v3848_v1  ;;  %1644 = vmatmul.bf16.gmra.mxu3 %v1435_v12  ;;  %v1756_v42 = vpack.c.bf16 %v1710_v49, %v1709_v26 }
 0x395   : > { %v1320_v46 = vpop.f32.mrf.mxu2 }
 0x396   : > { %v2248_v24 = vmax.f32 %v1929_v16, 0.0  ;;  %v2249_v18 = vmax.f32 %v2098_v63, 0.0  ;;  %1967 = vmatmul.bf16.gmra.mxu0 %v1756_v42  ;;  %2136 = vmatmul.bf16.gmra.mxu1 %v1756_v42  ;;  %v1321_v10 = vadd.f32 %v3924_v9, %v1320_v46 }
 0x397   : > { %v1605_v20 = vpop.f32.mrf.mxu3 }
 0x398   : > { %2376 = vst [vmem:[%s3855_s29 + $0x120] sm:$0xff] %v2248_v24  ;;  %v1606_v29 = vadd.f32 %v1605_v20, %v3800_v5  ;;  %v1399_v56 = vmax.f32 %v1321_v10, 0.0 }
 0x399   : > { %2377 = vst [vmem:[%s3855_s29 + $0x128] sm:$0xff] %v2249_v18 }
 0x39a   : > { %v1711_v7 = vmax.f32 %v1606_v29, 0.0 }
 0x39b   : > { %v1930_v27 = vpop.f32.mrf.mxu0  ;;  %v2099_v40 = vpop.f32.mrf.mxu1 }
 0x39c   : > { %v1931_v41 = vadd.f32 %v1930_v27, %v3845_v33  ;;  %v2100_v48 = vadd.f32 %v2099_v40, %v3848_v1 }
 0x39d   : > { %v1322_v62 = vpop.f32.mrf.mxu2 }
 0x39e   : > { %v2250_v52 = vmax.f32 %v1931_v41, 0.0  ;;  %v2251_v31 = vmax.f32 %v2100_v48, 0.0  ;;  %v1323_v32 = vadd.f32 %v3924_v9, %v1322_v62 }
 0x39f   : > { %v1607_v34 = vpop.f32.mrf.mxu3 }
 0x3a0   : > { %2378 = vst [vmem:[%s3855_s29 + $0x130] sm:$0xff] %v2250_v52  ;;  %v1400_v53 = vmax.f32 %v1323_v32, 0.0  ;;  %v1608_v57 = vadd.f32 %v1607_v34, %v3800_v5 }
 0x3a1   : > { %2379 = vst [vmem:[%s3855_s29 + $0x138] sm:$0xff] %v2251_v31 }
 0x3a2   : > { %v1436_v58 = vpack.c.bf16 %v1400_v53, %v1399_v56  ;;  %v1712_v59 = vmax.f32 %v1608_v57, 0.0 }
 0x3a3   : > { %v1933_v11 = vpop.f32.mrf.mxu0  ;;  %v2102_v60 = vpop.f32.mrf.mxu1 }
 0x3a4   : > { %v1934_v8 = vadd.f32 %v1933_v11, %v3845_v33  ;;  %v2103_v55 = vadd.f32 %v2102_v60, %v3848_v1  ;;  %1649 = vmatmul.bf16.gmra.mxu3 %v1436_v58  ;;  %v1757_v0 = vpack.c.bf16 %v1712_v59, %v1711_v7 }
 0x3a5   : > { %v1325_v39 = vpop.f32.mrf.mxu2 }
 0x3a6   : > { %v2252_v38 = vmax.f32 %v1934_v8, 0.0  ;;  %v2253_v19 = vmax.f32 %v2103_v55, 0.0  ;;  %1972 = vmatmul.bf16.gmra.mxu0 %v1757_v0  ;;  %2141 = vmatmul.bf16.gmra.mxu1 %v1757_v0  ;;  %v1326_v4 = vadd.f32 %v3924_v9, %v1325_v39 }
 0x3a7   : > { %v1610_v5 = vpop.f32.mrf.mxu3 }
 0x3a8   : > { %2380 = vst [vmem:[%s3855_s29 + $0x140] sm:$0xff] %v2252_v38  ;;  %v1611_v61 = vadd.f32 %v3989_v36, %v1610_v5  ;;  %v1401_v43 = vmax.f32 %v1326_v4, 0.0 }
 0x3a9   : > { %2381 = vst [vmem:[%s3855_s29 + $0x148] sm:$0xff] %v2253_v19 }
 0x3aa   : > { %v1713_v15 = vmax.f32 %v1611_v61, 0.0 }
 0x3ab   : > { %v1935_v51 = vpop.f32.mrf.mxu0  ;;  %v2104_v37 = vpop.f32.mrf.mxu1 }
 0x3ac   : > { %v1936_v6 = vadd.f32 %v1935_v51, %v3845_v33  ;;  %v2105_v47 = vadd.f32 %v2104_v37, %v3848_v1 }
 0x3ad   : > { %v1327_v44 = vpop.f32.mrf.mxu2 }
 0x3ae   : > { %v2254_v54 = vmax.f32 %v1936_v6, 0.0  ;;  %v2255_v13 = vmax.f32 %v2105_v47, 0.0  ;;  %v1328_v14 = vadd.f32 %v3924_v9, %v1327_v44 }
 0x3af   : > { %v1612_v17 = vpop.f32.mrf.mxu3 }
 0x3b0   : > { %2382 = vst [vmem:[%s3855_s29 + $0x150] sm:$0xff] %v2254_v54  ;;  %v1402_v3 = vmax.f32 %v1328_v14, 0.0  ;;  %v1613_v35 = vadd.f32 %v3989_v36, %v1612_v17 }
 0x3b1   : > { %2383 = vst [vmem:[%s3855_s29 + $0x158] sm:$0xff] %v2255_v13 }
 0x3b2   : > { %v1437_v45 = vpack.c.bf16 %v1402_v3, %v1401_v43  ;;  %v1714_v21 = vmax.f32 %v1613_v35, 0.0 }
 0x3b3   : > { %v1938_v25 = vpop.f32.mrf.mxu0  ;;  %v2107_v30 = vpop.f32.mrf.mxu1 }
 0x3b4   : > { %v1939_v2 = vadd.f32 %v1938_v25, %v3845_v33  ;;  %v2108_v23 = vadd.f32 %v2107_v30, %v3848_v1  ;;  %1654 = vmatmul.bf16.gmra.mxu3 %v1437_v45  ;;  %v1758_v28 = vpack.c.bf16 %v1714_v21, %v1713_v15 }
 0x3b5   : > { %v1330_v26 = vpop.f32.mrf.mxu2 }
 0x3b6   : > { %v2256_v12 = vmax.f32 %v1939_v2, 0.0  ;;  %v2257_v49 = vmax.f32 %v2108_v23, 0.0  ;;  %1977 = vmatmul.bf16.gmra.mxu0 %v1758_v28  ;;  %2146 = vmatmul.bf16.gmra.mxu1 %v1758_v28  ;;  %v1331_v63 = vadd.f32 %v3924_v9, %v1330_v26 }
 0x3b7   : > { %v1615_v22 = vpop.f32.mrf.mxu3 }
 0x3b8   : > { %2384 = vst [vmem:[%s3855_s29 + $0x160] sm:$0xff] %v2256_v12  ;;  %v1616_v18 = vadd.f32 %v3989_v36, %v1615_v22  ;;  %v1403_v41 = vmax.f32 %v1331_v63, 0.0 }
 0x3b9   : > { %2385 = vst [vmem:[%s3855_s29 + $0x168] sm:$0xff] %v2257_v49 }
 0x3ba   : > { %v1715_v29 = vmax.f32 %v1616_v18, 0.0 }
 0x3bb   : > { %v1940_v50 = vpop.f32.mrf.mxu0  ;;  %v2109_v16 = vpop.f32.mrf.mxu1 }
 0x3bc   : > { %v1941_v42 = vadd.f32 %v1940_v50, %v3845_v33  ;;  %v2110_v46 = vadd.f32 %v2109_v16, %v3848_v1 }
 0x3bd   : > { %v1332_v24 = vpop.f32.mrf.mxu2 }
 0x3be   : > { %v2258_v20 = vmax.f32 %v1941_v42, 0.0  ;;  %v2259_v27 = vmax.f32 %v2110_v46, 0.0  ;;  %v1333_v40 = vadd.f32 %v3924_v9, %v1332_v24 }
 0x3bf   : > { %v1617_v10 = vpop.f32.mrf.mxu3 }
 0x3c0   : > { %2386 = vst [vmem:[%s3855_s29 + $0x170] sm:$0xff] %v2258_v20  ;;  %v1404_v48 = vmax.f32 %v1333_v40, 0.0  ;;  %v1618_v62 = vadd.f32 %v3989_v36, %v1617_v10 }
 0x3c1   : > { %2387 = vst [vmem:[%s3855_s29 + $0x178] sm:$0xff] %v2259_v27 }
 0x3c2   : > { %v1438_v52 = vpack.c.bf16 %v1404_v48, %v1403_v41  ;;  %v1716_v31 = vmax.f32 %v1618_v62, 0.0 }
 0x3c3   : > { %v1943_v32 = vpop.f32.mrf.mxu0  ;;  %v2112_v34 = vpop.f32.mrf.mxu1 }
 0x3c4   : > { %v1759_v56 = vpack.c.bf16 %v1716_v31, %v1715_v29  ;;  %v1944_v53 = vadd.f32 %v1943_v32, %v3845_v33  ;;  %v2113_v57 = vadd.f32 %v2112_v34, %v3848_v1  ;;  %1659 = vmatmul.bf16.gmra.mxu3 %v1438_v52 }
 0x3c5   : > { %v1335_v7 = vpop.f32.mrf.mxu2 }
 0x3c6   : > { %v2260_v58 = vmax.f32 %v1944_v53, 0.0  ;;  %v2261_v59 = vmax.f32 %v2113_v57, 0.0  ;;  %1982 = vmatmul.bf16.gmra.mxu0 %v1759_v56  ;;  %2151 = vmatmul.bf16.gmra.mxu1 %v1759_v56  ;;  %v1336_v55 = vadd.f32 %v3924_v9, %v1335_v7 }
 0x3c7   : > { %v1620_v11 = vpop.f32.mrf.mxu3 }
 0x3c8   : > { %2388 = vst [vmem:[%s3855_s29 + $0x180] sm:$0xff] %v2260_v58  ;;  %v1621_v19 = vadd.f32 %v3989_v36, %v1620_v11  ;;  %v1405_v6 = vmax.f32 %v1336_v55, 0.0 }
 0x3c9   : > { %2389 = vst [vmem:[%s3855_s29 + $0x188] sm:$0xff] %v2261_v59 }
 0x3ca   : > { %v1717_v61 = vmax.f32 %v1621_v19, 0.0 }
 0x3cb   : > { %v1945_v60 = vpop.f32.mrf.mxu0  ;;  %v2114_v8 = vpop.f32.mrf.mxu1 }
 0x3cc   : > { %v1946_v0 = vadd.f32 %v1945_v60, %v3845_v33  ;;  %v2115_v39 = vadd.f32 %v2114_v8, %v3848_v1 }
 0x3cd   : > { %v1337_v38 = vpop.f32.mrf.mxu2 }
 0x3ce   : > { %v2262_v5 = vmax.f32 %v1946_v0, 0.0  ;;  %v2263_v51 = vmax.f32 %v2115_v39, 0.0  ;;  %v1338_v37 = vadd.f32 %v3924_v9, %v1337_v38 }
 0x3cf   : > { %v1622_v4 = vpop.f32.mrf.mxu3 }
 0x3d0   : > { %2390 = vst [vmem:[%s3855_s29 + $0x190] sm:$0xff] %v2262_v5  ;;  %v1406_v47 = vmax.f32 %v1338_v37, 0.0  ;;  %v1623_v44 = vadd.f32 %v3989_v36, %v1622_v4 }
 0x3d1   : > { %2391 = vst [vmem:[%s3855_s29 + $0x198] sm:$0xff] %v2263_v51 }
 0x3d2   : > { %v1439_v54 = vpack.c.bf16 %v1406_v47, %v1405_v6  ;;  %v1718_v13 = vmax.f32 %v1623_v44, 0.0 }
 0x3d3   : > { %v1948_v14 = vpop.f32.mrf.mxu0  ;;  %v2117_v17 = vpop.f32.mrf.mxu1 }
 0x3d4   : > { %v1760_v43 = vpack.c.bf16 %v1718_v13, %v1717_v61  ;;  %v1949_v3 = vadd.f32 %v1948_v14, %v3845_v33  ;;  %v2118_v35 = vadd.f32 %v2117_v17, %v3848_v1  ;;  %1664 = vmatmul.bf16.gmra.mxu3 %v1439_v54 }
 0x3d5   : > { %v1340_v15 = vpop.f32.mrf.mxu2 }
 0x3d6   : > { %v2264_v45 = vmax.f32 %v1949_v3, 0.0  ;;  %v2265_v21 = vmax.f32 %v2118_v35, 0.0  ;;  %1987 = vmatmul.bf16.gmra.mxu0 %v1760_v43  ;;  %2156 = vmatmul.bf16.gmra.mxu1 %v1760_v43  ;;  %v1341_v23 = vadd.f32 %v3924_v9, %v1340_v15 }
 0x3d7   : > { %v1625_v25 = vpop.f32.mrf.mxu3 }
 0x3d8   : > { %2392 = vst [vmem:[%s3855_s29 + $0x1a0] sm:$0xff] %v2264_v45  ;;  %v1626_v49 = vadd.f32 %v3989_v36, %v1625_v25  ;;  %v1407_v42 = vmax.f32 %v1341_v23, 0.0 }
 0x3d9   : > { %2393 = vst [vmem:[%s3855_s29 + $0x1a8] sm:$0xff] %v2265_v21 }
 0x3da   : > { %v1719_v18 = vmax.f32 %v1626_v49, 0.0 }
 0x3db   : > { %v1950_v30 = vpop.f32.mrf.mxu0  ;;  %v2119_v2 = vpop.f32.mrf.mxu1 }
 0x3dc   : > { %v1951_v28 = vadd.f32 %v1950_v30, %v3845_v33  ;;  %v2120_v26 = vadd.f32 %v2119_v2, %v3848_v1 }
 0x3dd   : > { %v1342_v12 = vpop.f32.mrf.mxu2 }
 0x3de   : > { %v2266_v22 = vmax.f32 %v1951_v28, 0.0  ;;  %v2267_v50 = vmax.f32 %v2120_v26, 0.0  ;;  %v1343_v16 = vadd.f32 %v3924_v9, %v1342_v12 }
 0x3df   : > { %v1627_v63 = vpop.f32.mrf.mxu3 }
 0x3e0   : > { %2394 = vst [vmem:[%s3855_s29 + $0x1b0] sm:$0xff] %v2266_v22  ;;  %v1408_v46 = vmax.f32 %v1343_v16, 0.0  ;;  %v1628_v24 = vadd.f32 %v3989_v36, %v1627_v63 }
 0x3e1   : > { %2395 = vst [vmem:[%s3855_s29 + $0x1b8] sm:$0xff] %v2267_v50 }
 0x3e2   : > { %v1440_v20 = vpack.c.bf16 %v1408_v46, %v1407_v42  ;;  %v1720_v27 = vmax.f32 %v1628_v24, 0.0 }
 0x3e3   : > { %v1953_v40 = vpop.f32.mrf.mxu0  ;;  %v2122_v10 = vpop.f32.mrf.mxu1 }
 0x3e4   : > { %v1761_v41 = vpack.c.bf16 %v1720_v27, %v1719_v18  ;;  %v1954_v48 = vadd.f32 %v1953_v40, %v3845_v33  ;;  %v2123_v62 = vadd.f32 %v2122_v10, %v3848_v1  ;;  %1669 = vmatmul.bf16.gmra.mxu3 %v1440_v20 }
 0x3e6   : > { %v2268_v9 = vmax.f32 %v1954_v48, 0.0  ;;  %v2269_v29 = vmax.f32 %v2123_v62, 0.0  ;;  %1992 = vmatmul.bf16.gmra.mxu0 %v1761_v41  ;;  %2161 = vmatmul.bf16.gmra.mxu1 %v1761_v41 }
 0x3e7   : > { %v1630_v52 = vpop.f32.mrf.mxu3 }
 0x3e8   : > { %2396 = vst [vmem:[%s3855_s29 + $0x1c0] sm:$0xff] %v2268_v9  ;;  %v1631_v53 = vadd.f32 %v3989_v36, %v1630_v52 }
 0x3e9   : > { %2397 = vst [vmem:[%s3855_s29 + $0x1c8] sm:$0xff] %v2269_v29 }
 0x3ea   : > { %v1721_v11 = vmax.f32 %v1631_v53, 0.0 }
 0x3eb   : > { %v1955_v31 = vpop.f32.mrf.mxu0  ;;  %v2124_v32 = vpop.f32.mrf.mxu1 }
 0x3ec   : > { %v1956_v34 = vadd.f32 %v1955_v31, %v3845_v33  ;;  %v2125_v56 = vadd.f32 %v2124_v32, %v3848_v1 }
 0x3ee   : > { %v2270_v57 = vmax.f32 %v1956_v34, 0.0  ;;  %v2271_v7 = vmax.f32 %v2125_v56, 0.0 }
 0x3ef   : > { %v1632_v58 = vpop.f32.mrf.mxu3 }
 0x3f0   : > { %2398 = vst [vmem:[%s3855_s29 + $0x1d0] sm:$0xff] %v2270_v57  ;;  %v1633_v59 = vadd.f32 %v3989_v36, %v1632_v58 }
 0x3f1   : > { %2399 = vst [vmem:[%s3855_s29 + $0x1d8] sm:$0xff] %v2271_v7 }
 0x3f2   : > { %v1722_v60 = vmax.f32 %v1633_v59, 0.0 }
 0x3f3   : > { %v1958_v8 = vpop.f32.mrf.mxu0  ;;  %v2127_v55 = vpop.f32.mrf.mxu1 }
 0x3f4   : > { %v1762_v0 = vpack.c.bf16 %v1722_v60, %v1721_v11  ;;  %v1959_v39 = vadd.f32 %v1958_v8, %v3845_v33  ;;  %v2128_v38 = vadd.f32 %v2127_v55, %v3848_v1 }
 0x3f6   : > { %v2272_v19 = vmax.f32 %v1959_v39, 0.0  ;;  %v2273_v5 = vmax.f32 %v2128_v38, 0.0  ;;  %1997 = vmatmul.bf16.gmra.mxu0 %v1762_v0  ;;  %2166 = vmatmul.bf16.gmra.mxu1 %v1762_v0 }
 0x3f7   : > { %v1635_v51 = vpop.f32.mrf.mxu3 }
 0x3f8   : > { %2400 = vst [vmem:[%s3855_s29 + $0x1e0] sm:$0xff] %v2272_v19  ;;  %v1636_v44 = vadd.f32 %v3989_v36, %v1635_v51 }
 0x3f9   : > { %2401 = vst [vmem:[%s3855_s29 + $0x1e8] sm:$0xff] %v2273_v5 }
 0x3fa   : > { %v1723_v17 = vmax.f32 %v1636_v44, 0.0 }
 0x3fb   : > { %v1960_v37 = vpop.f32.mrf.mxu0  ;;  %v2129_v4 = vpop.f32.mrf.mxu1 }
 0x3fc   : > { %v1961_v6 = vadd.f32 %v1960_v37, %v3845_v33  ;;  %v2130_v47 = vadd.f32 %v2129_v4, %v3848_v1 }
 0x3fe   : > { %v2274_v61 = vmax.f32 %v1961_v6, 0.0  ;;  %v2275_v54 = vmax.f32 %v2130_v47, 0.0 }
 0x3ff   : > { %v1637_v13 = vpop.f32.mrf.mxu3 }
 0x400   : > { %2402 = vst [vmem:[%s3855_s29 + $0x1f0] sm:$0xff] %v2274_v61  ;;  %v1638_v14 = vadd.f32 %v3989_v36, %v1637_v13 }
 0x401   : > { %2403 = vst [vmem:[%s3855_s29 + $0x1f8] sm:$0xff] %v2275_v54 }
 0x402   : > { %v1724_v43 = vmax.f32 %v1638_v14, 0.0 }
 0x403   : > { %v1963_v3 = vpop.f32.mrf.mxu0  ;;  %v2132_v35 = vpop.f32.mrf.mxu1 }
 0x404   : > { %v1763_v15 = vpack.c.bf16 %v1724_v43, %v1723_v17  ;;  %v1964_v45 = vadd.f32 %v1963_v3, %v3845_v33  ;;  %v2133_v21 = vadd.f32 %v2132_v35, %v3848_v1 }
 0x406   : > { %v2276_v25 = vmax.f32 %v1964_v45, 0.0  ;;  %v2277_v30 = vmax.f32 %v2133_v21, 0.0  ;;  %2002 = vmatmul.bf16.gmra.mxu0 %v1763_v15  ;;  %2171 = vmatmul.bf16.gmra.mxu1 %v1763_v15 }
 0x407   : > { %v1640_v2 = vpop.f32.mrf.mxu3 }
 0x408   : > { %2404 = vst [vmem:[%s3855_s29 + $0x200] sm:$0xff] %v2276_v25  ;;  %v1641_v49 = vadd.f32 %v3989_v36, %v1640_v2 }
 0x409   : > { %2405 = vst [vmem:[%s3855_s29 + $0x208] sm:$0xff] %v2277_v30 }
 0x40a   : > { %v1725_v42 = vmax.f32 %v1641_v49, 0.0 }
 0x40b   : > { %v1965_v23 = vpop.f32.mrf.mxu0  ;;  %v2134_v28 = vpop.f32.mrf.mxu1 }
 0x40c   : > { %v1966_v26 = vadd.f32 %v1965_v23, %v3845_v33  ;;  %v2135_v12 = vadd.f32 %v2134_v28, %v3848_v1 }
 0x40e   : > { %v2278_v22 = vmax.f32 %v1966_v26, 0.0  ;;  %v2279_v50 = vmax.f32 %v2135_v12, 0.0 }
 0x40f   : > { %v1642_v16 = vpop.f32.mrf.mxu3 }
 0x410   : > { %2406 = vst [vmem:[%s3855_s29 + $0x210] sm:$0xff] %v2278_v22  ;;  %v1643_v63 = vadd.f32 %v3989_v36, %v1642_v16 }
 0x411   : > { %2407 = vst [vmem:[%s3855_s29 + $0x218] sm:$0xff] %v2279_v50 }
 0x412   : > { %v1726_v46 = vmax.f32 %v1643_v63, 0.0 }
 0x413   : > { %v1968_v24 = vpop.f32.mrf.mxu0  ;;  %v2137_v18 = vpop.f32.mrf.mxu1 }
 0x414   : > { %v1764_v20 = vpack.c.bf16 %v1726_v46, %v1725_v42  ;;  %v1969_v27 = vadd.f32 %v1968_v24, %v3845_v33  ;;  %v2138_v40 = vadd.f32 %v2137_v18, %v3848_v1 }
 0x416   : > { %v2280_v10 = vmax.f32 %v1969_v27, 0.0  ;;  %v2281_v41 = vmax.f32 %v2138_v40, 0.0  ;;  %2007 = vmatmul.bf16.gmra.mxu0 %v1764_v20  ;;  %2176 = vmatmul.bf16.gmra.mxu1 %v1764_v20 }
 0x417   : > { %v1645_v48 = vpop.f32.mrf.mxu3 }
 0x418   : > { %2408 = vst [vmem:[%s3855_s29 + $0x220] sm:$0xff] %v2280_v10  ;;  %v1646_v31 = vadd.f32 %v3989_v36, %v1645_v48 }
 0x419   : > { %2409 = vst [vmem:[%s3855_s29 + $0x228] sm:$0xff] %v2281_v41 }
 0x41a   : > { %v1727_v57 = vmax.f32 %v1646_v31, 0.0 }
 0x41b   : > { %v1970_v62 = vpop.f32.mrf.mxu0  ;;  %v2139_v9 = vpop.f32.mrf.mxu1 }
 0x41c   : > { %v1971_v29 = vadd.f32 %v1970_v62, %v3845_v33  ;;  %v2140_v52 = vadd.f32 %v2139_v9, %v3848_v1 }
 0x41e   : > { %v2282_v32 = vmax.f32 %v1971_v29, 0.0  ;;  %v2283_v34 = vmax.f32 %v2140_v52, 0.0 }
 0x41f   : > { %v1647_v56 = vpop.f32.mrf.mxu3 }
 0x420   : > { %2410 = vst [vmem:[%s3855_s29 + $0x230] sm:$0xff] %v2282_v32  ;;  %v1648_v53 = vadd.f32 %v3989_v36, %v1647_v56 }
 0x421   : > { %2411 = vst [vmem:[%s3855_s29 + $0x238] sm:$0xff] %v2283_v34 }
 0x422   : > { %v1728_v7 = vmax.f32 %v1648_v53, 0.0 }
 0x423   : > { %v1973_v58 = vpop.f32.mrf.mxu0  ;;  %v2142_v59 = vpop.f32.mrf.mxu1 }
 0x424   : > { %v1765_v11 = vpack.c.bf16 %v1728_v7, %v1727_v57  ;;  %v1974_v60 = vadd.f32 %v1973_v58, %v3845_v33  ;;  %v2143_v8 = vadd.f32 %v2142_v59, %v3848_v1 }
 0x426   : > { %v2284_v55 = vmax.f32 %v1974_v60, 0.0  ;;  %v2285_v0 = vmax.f32 %v2143_v8, 0.0  ;;  %2012 = vmatmul.bf16.gmra.mxu0 %v1765_v11  ;;  %2181 = vmatmul.bf16.gmra.mxu1 %v1765_v11 }
 0x427   : > { %v1650_v39 = vpop.f32.mrf.mxu3 }
 0x428   : > { %2412 = vst [vmem:[%s3855_s29 + $0x240] sm:$0xff] %v2284_v55  ;;  %v1651_v37 = vadd.f32 %v3989_v36, %v1650_v39 }
 0x429   : > { %2413 = vst [vmem:[%s3855_s29 + $0x248] sm:$0xff] %v2285_v0 }
 0x42a   : > { %v1729_v61 = vmax.f32 %v1651_v37, 0.0 }
 0x42b   : > { %v1975_v38 = vpop.f32.mrf.mxu0  ;;  %v2144_v19 = vpop.f32.mrf.mxu1 }
 0x42c   : > { %v1976_v5 = vadd.f32 %v1975_v38, %v3845_v33  ;;  %v2145_v51 = vadd.f32 %v2144_v19, %v3848_v1 }
 0x42e   : > { %v2286_v4 = vmax.f32 %v1976_v5, 0.0  ;;  %v2287_v6 = vmax.f32 %v2145_v51, 0.0 }
 0x42f   : > { %v1652_v47 = vpop.f32.mrf.mxu3 }
 0x430   : > { %2414 = vst [vmem:[%s3855_s29 + $0x250] sm:$0xff] %v2286_v4  ;;  %v1653_v44 = vadd.f32 %v3989_v36, %v1652_v47 }
 0x431   : > { %2415 = vst [vmem:[%s3855_s29 + $0x258] sm:$0xff] %v2287_v6 }
 0x432   : > { %v1730_v54 = vmax.f32 %v1653_v44, 0.0 }
 0x433   : > { %v1978_v13 = vpop.f32.mrf.mxu0  ;;  %v2147_v14 = vpop.f32.mrf.mxu1 }
 0x434   : > { %v1766_v17 = vpack.c.bf16 %v1730_v54, %v1729_v61  ;;  %v1979_v43 = vadd.f32 %v1978_v13, %v3845_v33  ;;  %v2148_v3 = vadd.f32 %v2147_v14, %v3848_v1 }
 0x436   : > { %v2288_v35 = vmax.f32 %v1979_v43, 0.0  ;;  %v2289_v15 = vmax.f32 %v2148_v3, 0.0  ;;  %2017 = vmatmul.bf16.gmra.mxu0 %v1766_v17  ;;  %2186 = vmatmul.bf16.gmra.mxu1 %v1766_v17 }
 0x437   : > { %v1655_v45 = vpop.f32.mrf.mxu3 }
 0x438   : > { %2416 = vst [vmem:[%s3855_s29 + $0x260] sm:$0xff] %v2288_v35  ;;  %v1656_v23 = vadd.f32 %v3989_v36, %v1655_v45 }
 0x439   : > { %2417 = vst [vmem:[%s3855_s29 + $0x268] sm:$0xff] %v2289_v15 }
 0x43a   : > { %v1731_v22 = vmax.f32 %v1656_v23, 0.0 }
 0x43b   : > { %v1980_v21 = vpop.f32.mrf.mxu0  ;;  %v2149_v25 = vpop.f32.mrf.mxu1 }
 0x43c   : > { %v1981_v30 = vadd.f32 %v1980_v21, %v3845_v33  ;;  %v2150_v2 = vadd.f32 %v2149_v25, %v3848_v1 }
 0x43e   : > { %v2290_v28 = vmax.f32 %v1981_v30, 0.0  ;;  %v2291_v26 = vmax.f32 %v2150_v2, 0.0 }
 0x43f   : > { %v1657_v12 = vpop.f32.mrf.mxu3 }
 0x440   : > { %2418 = vst [vmem:[%s3855_s29 + $0x270] sm:$0xff] %v2290_v28  ;;  %v1658_v49 = vadd.f32 %v3989_v36, %v1657_v12 }
 0x441   : > { %2419 = vst [vmem:[%s3855_s29 + $0x278] sm:$0xff] %v2291_v26 }
 0x442   : > { %v1732_v50 = vmax.f32 %v1658_v49, 0.0 }
 0x443   : > { %v1983_v16 = vpop.f32.mrf.mxu0  ;;  %v2152_v63 = vpop.f32.mrf.mxu1 }
 0x444   : > { %v1767_v42 = vpack.c.bf16 %v1732_v50, %v1731_v22  ;;  %v1984_v46 = vadd.f32 %v1983_v16, %v3845_v33  ;;  %v2153_v24 = vadd.f32 %v2152_v63, %v3848_v1 }
 0x446   : > { %v2292_v18 = vmax.f32 %v1984_v46, 0.0  ;;  %v2293_v20 = vmax.f32 %v2153_v24, 0.0  ;;  %2022 = vmatmul.bf16.gmra.mxu0 %v1767_v42  ;;  %2191 = vmatmul.bf16.gmra.mxu1 %v1767_v42 }
 0x447   : > { %v1660_v27 = vpop.f32.mrf.mxu3 }
 0x448   : > { %2420 = vst [vmem:[%s3855_s29 + $0x280] sm:$0xff] %v2292_v18  ;;  %v1661_v62 = vadd.f32 %v3989_v36, %v1660_v27 }
 0x449   : > { %2421 = vst [vmem:[%s3855_s29 + $0x288] sm:$0xff] %v2293_v20 }
 0x44a   : > { %v1733_v32 = vmax.f32 %v1661_v62, 0.0 }
 0x44b   : > { %v1985_v40 = vpop.f32.mrf.mxu0  ;;  %v2154_v10 = vpop.f32.mrf.mxu1 }
 0x44c   : > { %v1986_v41 = vadd.f32 %v1985_v40, %v3845_v33  ;;  %v2155_v48 = vadd.f32 %v2154_v10, %v3848_v1 }
 0x44e   : > { %v2294_v9 = vmax.f32 %v1986_v41, 0.0  ;;  %v2295_v29 = vmax.f32 %v2155_v48, 0.0 }
 0x44f   : > { %v1662_v52 = vpop.f32.mrf.mxu3 }
 0x450   : > { %2422 = vst [vmem:[%s3855_s29 + $0x290] sm:$0xff] %v2294_v9  ;;  %v1663_v31 = vadd.f32 %v3989_v36, %v1662_v52 }
 0x451   : > { %2423 = vst [vmem:[%s3855_s29 + $0x298] sm:$0xff] %v2295_v29 }
 0x452   : > { %v1734_v34 = vmax.f32 %v1663_v31, 0.0 }
 0x453   : > { %v1988_v56 = vpop.f32.mrf.mxu0  ;;  %v2157_v53 = vpop.f32.mrf.mxu1 }
 0x454   : > { %v1768_v57 = vpack.c.bf16 %v1734_v34, %v1733_v32  ;;  %v1989_v7 = vadd.f32 %v1988_v56, %v3845_v33  ;;  %v2158_v58 = vadd.f32 %v2157_v53, %v3848_v1 }
 0x456   : > { %v2296_v59 = vmax.f32 %v1989_v7, 0.0  ;;  %v2297_v11 = vmax.f32 %v2158_v58, 0.0  ;;  %2027 = vmatmul.bf16.gmra.mxu0 %v1768_v57  ;;  %2196 = vmatmul.bf16.gmra.mxu1 %v1768_v57 }
 0x457   : > { %v1665_v60 = vpop.f32.mrf.mxu3 }
 0x458   : > { %2424 = vst [vmem:[%s3855_s29 + $0x2a0] sm:$0xff] %v2296_v59  ;;  %v1666_v38 = vadd.f32 %v3989_v36, %v1665_v60 }
 0x459   : > { %2425 = vst [vmem:[%s3855_s29 + $0x2a8] sm:$0xff] %v2297_v11 }
 0x45a   : > { %v1735_v4 = vmax.f32 %v1666_v38, 0.0 }
 0x45b   : > { %v1990_v8 = vpop.f32.mrf.mxu0  ;;  %v2159_v55 = vpop.f32.mrf.mxu1 }
 0x45c   : > { %v1991_v0 = vadd.f32 %v1990_v8, %v3845_v33  ;;  %v2160_v39 = vadd.f32 %v2159_v55, %v3848_v1 }
 0x45e   : > { %v2298_v19 = vmax.f32 %v1991_v0, 0.0  ;;  %v2299_v5 = vmax.f32 %v2160_v39, 0.0 }
 0x45f   : > { %v1667_v51 = vpop.f32.mrf.mxu3 }
 0x460   : > { %2426 = vst [vmem:[%s3855_s29 + $0x2b0] sm:$0xff] %v2298_v19  ;;  %v1668_v37 = vadd.f32 %v3989_v36, %v1667_v51 }
 0x461   : > { %2427 = vst [vmem:[%s3855_s29 + $0x2b8] sm:$0xff] %v2299_v5 }
 0x462   : > { %v1736_v6 = vmax.f32 %v1668_v37, 0.0 }
 0x463   : > { %v1993_v47 = vpop.f32.mrf.mxu0  ;;  %v2162_v44 = vpop.f32.mrf.mxu1 }
 0x464   : > { %v1769_v61 = vpack.c.bf16 %v1736_v6, %v1735_v4  ;;  %v1994_v54 = vadd.f32 %v1993_v47, %v3845_v33  ;;  %v2163_v13 = vadd.f32 %v2162_v44, %v3848_v1 }
 0x466   : > { %v2300_v14 = vmax.f32 %v1994_v54, 0.0  ;;  %v2301_v17 = vmax.f32 %v2163_v13, 0.0  ;;  %2032 = vmatmul.bf16.gmra.mxu0 %v1769_v61  ;;  %2201 = vmatmul.bf16.gmra.mxu1 %v1769_v61 }
 0x467   : > { %v1670_v43 = vpop.f32.mrf.mxu3 }
 0x468   : > { %2428 = vst [vmem:[%s3855_s29 + $0x2c0] sm:$0xff] %v2300_v14  ;;  %v1671_v21 = vadd.f32 %v3989_v36, %v1670_v43 }
 0x469   : > { %2429 = vst [vmem:[%s3855_s29 + $0x2c8] sm:$0xff] %v2301_v17 }
 0x46a   : > { %v1737_v28 = vmax.f32 %v1671_v21, 0.0 }
 0x46b   : > { %v1995_v3 = vpop.f32.mrf.mxu0  ;;  %v2164_v35 = vpop.f32.mrf.mxu1 }
 0x46c   : > { %v1996_v15 = vadd.f32 %v1995_v3, %v3845_v33  ;;  %v2165_v45 = vadd.f32 %v2164_v35, %v3848_v1 }
 0x46e   : > { %v2302_v25 = vmax.f32 %v1996_v15, 0.0  ;;  %v2303_v30 = vmax.f32 %v2165_v45, 0.0 }
 0x46f   : > { %v1672_v2 = vpop.f32.mrf.mxu3 }
 0x470   : > { %2430 = vst [vmem:[%s3855_s29 + $0x2d0] sm:$0xff] %v2302_v25  ;;  %v1673_v23 = vadd.f32 %v3989_v36, %v1672_v2 }
 0x471   : > { %2431 = vst [vmem:[%s3855_s29 + $0x2d8] sm:$0xff] %v2303_v30 }
 0x472   : > { %v1738_v26 = vmax.f32 %v1673_v23, 0.0 }
 0x473   : > { %v1998_v12 = vpop.f32.mrf.mxu0  ;;  %v2167_v49 = vpop.f32.mrf.mxu1 }
 0x474   : > { %v1770_v22 = vpack.c.bf16 %v1738_v26, %v1737_v28  ;;  %v1999_v50 = vadd.f32 %v1998_v12, %v3845_v33  ;;  %v2168_v16 = vadd.f32 %v2167_v49, %v3848_v1 }
 0x476   : > { %v2304_v63 = vmax.f32 %v1999_v50, 0.0  ;;  %v2305_v42 = vmax.f32 %v2168_v16, 0.0  ;;  %2037 = vmatmul.bf16.gmra.mxu0 %v1770_v22  ;;  %2206 = vmatmul.bf16.gmra.mxu1 %v1770_v22 }
 0x478   : > { %2432 = vst [vmem:[%s3855_s29 + $0x2e0] sm:$0xff] %v2304_v63 }
 0x479   : > { %2433 = vst [vmem:[%s3855_s29 + $0x2e8] sm:$0xff] %v2305_v42 }
 0x47b   : > { %v2000_v36 = vpop.f32.mrf.mxu0  ;;  %v2169_v46 = vpop.f32.mrf.mxu1 }
 0x47c   : > { %v2001_v24 = vadd.f32 %v2000_v36, %v3845_v33  ;;  %v2170_v18 = vadd.f32 %v2169_v46, %v3848_v1 }
 0x47e   : > { %v2306_v20 = vmax.f32 %v2001_v24, 0.0  ;;  %v2307_v27 = vmax.f32 %v2170_v18, 0.0 }
 0x480   : > { %2434 = vst [vmem:[%s3855_s29 + $0x2f0] sm:$0xff] %v2306_v20 }
 0x481   : > { %2435 = vst [vmem:[%s3855_s29 + $0x2f8] sm:$0xff] %v2307_v27 }
 0x483   : > { %v2003_v40 = vpop.f32.mrf.mxu0  ;;  %v2172_v10 = vpop.f32.mrf.mxu1 }
 0x484   : > { %v2004_v41 = vadd.f32 %v2003_v40, %v3845_v33  ;;  %v2173_v48 = vadd.f32 %v2172_v10, %v3848_v1 }
 0x486   : > { %v2308_v62 = vmax.f32 %v2004_v41, 0.0  ;;  %v2309_v9 = vmax.f32 %v2173_v48, 0.0 }
 0x488   : > { %2436 = vst [vmem:[%s3855_s29 + $0x300] sm:$0xff] %v2308_v62 }
 0x489   : > { %2437 = vst [vmem:[%s3855_s29 + $0x308] sm:$0xff] %v2309_v9 }
 0x48b   : > { %v2005_v29 = vpop.f32.mrf.mxu0  ;;  %v2174_v52 = vpop.f32.mrf.mxu1 }
 0x48c   : > { %v2006_v31 = vadd.f32 %v2005_v29, %v3845_v33  ;;  %v2175_v32 = vadd.f32 %v2174_v52, %v3848_v1 }
 0x48e   : > { %v2310_v34 = vmax.f32 %v2006_v31, 0.0  ;;  %v2311_v56 = vmax.f32 %v2175_v32, 0.0 }
 0x490   : > { %2438 = vst [vmem:[%s3855_s29 + $0x310] sm:$0xff] %v2310_v34 }
 0x491   : > { %2439 = vst [vmem:[%s3855_s29 + $0x318] sm:$0xff] %v2311_v56 }
 0x493   : > { %v2008_v53 = vpop.f32.mrf.mxu0  ;;  %v2177_v57 = vpop.f32.mrf.mxu1 }
 0x494   : > { %v2009_v7 = vadd.f32 %v2008_v53, %v3845_v33  ;;  %v2178_v58 = vadd.f32 %v2177_v57, %v3848_v1 }
 0x496   : > { %v2312_v59 = vmax.f32 %v2009_v7, 0.0  ;;  %v2313_v11 = vmax.f32 %v2178_v58, 0.0 }
 0x498   : > { %2440 = vst [vmem:[%s3855_s29 + $0x320] sm:$0xff] %v2312_v59 }
 0x499   : > { %2441 = vst [vmem:[%s3855_s29 + $0x328] sm:$0xff] %v2313_v11 }
 0x49b   : > { %v2010_v60 = vpop.f32.mrf.mxu0  ;;  %v2179_v8 = vpop.f32.mrf.mxu1 }
 0x49c   : > { %v2011_v55 = vadd.f32 %v2010_v60, %v3845_v33  ;;  %v2180_v0 = vadd.f32 %v2179_v8, %v3848_v1 }
 0x49e   : > { %v2314_v39 = vmax.f32 %v2011_v55, 0.0  ;;  %v2315_v38 = vmax.f32 %v2180_v0, 0.0 }
 0x4a0   : > { %2442 = vst [vmem:[%s3855_s29 + $0x330] sm:$0xff] %v2314_v39 }
 0x4a1   : > { %2443 = vst [vmem:[%s3855_s29 + $0x338] sm:$0xff] %v2315_v38 }
 0x4a3   : > { %v2013_v19 = vpop.f32.mrf.mxu0  ;;  %v2182_v5 = vpop.f32.mrf.mxu1 }
 0x4a4   : > { %v2014_v51 = vadd.f32 %v2013_v19, %v3845_v33  ;;  %v2183_v37 = vadd.f32 %v2182_v5, %v3848_v1 }
 0x4a6   : > { %v2316_v4 = vmax.f32 %v2014_v51, 0.0  ;;  %v2317_v6 = vmax.f32 %v2183_v37, 0.0 }
 0x4a8   : > { %2444 = vst [vmem:[%s3855_s29 + $0x340] sm:$0xff] %v2316_v4 }
 0x4a9   : > { %2445 = vst [vmem:[%s3855_s29 + $0x348] sm:$0xff] %v2317_v6 }
 0x4ab   : > { %v2015_v47 = vpop.f32.mrf.mxu0  ;;  %v2184_v44 = vpop.f32.mrf.mxu1 }
 0x4ac   : > { %v2016_v61 = vadd.f32 %v2015_v47, %v3845_v33  ;;  %v2185_v54 = vadd.f32 %v2184_v44, %v3848_v1 }
 0x4ae   : > { %v2318_v13 = vmax.f32 %v2016_v61, 0.0  ;;  %v2319_v14 = vmax.f32 %v2185_v54, 0.0 }
 0x4b0   : > { %2446 = vst [vmem:[%s3855_s29 + $0x350] sm:$0xff] %v2318_v13 }
 0x4b1   : > { %2447 = vst [vmem:[%s3855_s29 + $0x358] sm:$0xff] %v2319_v14 }
 0x4b3   : > { %v2018_v17 = vpop.f32.mrf.mxu0  ;;  %v2187_v43 = vpop.f32.mrf.mxu1 }
 0x4b4   : > { %v2019_v3 = vadd.f32 %v2018_v17, %v3845_v33  ;;  %v2188_v35 = vadd.f32 %v2187_v43, %v3848_v1 }
 0x4b6   : > { %v2320_v15 = vmax.f32 %v2019_v3, 0.0  ;;  %v2321_v45 = vmax.f32 %v2188_v35, 0.0 }
 0x4b8   : > { %2448 = vst [vmem:[%s3855_s29 + $0x360] sm:$0xff] %v2320_v15 }
 0x4b9   : > { %2449 = vst [vmem:[%s3855_s29 + $0x368] sm:$0xff] %v2321_v45 }
 0x4bb   : > { %v2020_v21 = vpop.f32.mrf.mxu0  ;;  %v2189_v25 = vpop.f32.mrf.mxu1 }
 0x4bc   : > { %v2021_v30 = vadd.f32 %v2020_v21, %v3845_v33  ;;  %v2190_v2 = vadd.f32 %v2189_v25, %v3848_v1 }
 0x4be   : > { %v2322_v23 = vmax.f32 %v2021_v30, 0.0  ;;  %v2323_v28 = vmax.f32 %v2190_v2, 0.0 }
 0x4c0   : > { %2450 = vst [vmem:[%s3855_s29 + $0x370] sm:$0xff] %v2322_v23 }
 0x4c1   : > { %2451 = vst [vmem:[%s3855_s29 + $0x378] sm:$0xff] %v2323_v28 }
 0x4c3   : > { %v2023_v26 = vpop.f32.mrf.mxu0  ;;  %v2192_v12 = vpop.f32.mrf.mxu1 }
 0x4c4   : > { %v2024_v49 = vadd.f32 %v2023_v26, %v3845_v33  ;;  %v2193_v22 = vadd.f32 %v2192_v12, %v3848_v1 }
 0x4c6   : > { %v2324_v50 = vmax.f32 %v2024_v49, 0.0  ;;  %v2325_v16 = vmax.f32 %v2193_v22, 0.0 }
 0x4c8   : > { %2452 = vst [vmem:[%s3855_s29 + $0x380] sm:$0xff] %v2324_v50 }
 0x4c9   : > { %2453 = vst [vmem:[%s3855_s29 + $0x388] sm:$0xff] %v2325_v16 }
 0x4cb   : > { %v2025_v63 = vpop.f32.mrf.mxu0  ;;  %v2194_v42 = vpop.f32.mrf.mxu1 }
 0x4cc   : > { %v2026_v36 = vadd.f32 %v2025_v63, %v3845_v33  ;;  %v2195_v46 = vadd.f32 %v2194_v42, %v3848_v1 }
 0x4ce   : > { %v2326_v24 = vmax.f32 %v2026_v36, 0.0  ;;  %v2327_v18 = vmax.f32 %v2195_v46, 0.0 }
 0x4d0   : > { %2454 = vst [vmem:[%s3855_s29 + $0x390] sm:$0xff] %v2326_v24 }
 0x4d1   : > { %2455 = vst [vmem:[%s3855_s29 + $0x398] sm:$0xff] %v2327_v18 }
 0x4d3   : > { %v2028_v20 = vpop.f32.mrf.mxu0  ;;  %v2197_v27 = vpop.f32.mrf.mxu1 }
 0x4d4   : > { %v2029_v40 = vadd.f32 %v2028_v20, %v3845_v33  ;;  %v2198_v10 = vadd.f32 %v2197_v27, %v3848_v1 }
 0x4d6   : > { %v2328_v41 = vmax.f32 %v2029_v40, 0.0  ;;  %v2329_v48 = vmax.f32 %v2198_v10, 0.0 }
 0x4d8   : > { %2456 = vst [vmem:[%s3855_s29 + $0x3a0] sm:$0xff] %v2328_v41 }
 0x4d9   : > { %2457 = vst [vmem:[%s3855_s29 + $0x3a8] sm:$0xff] %v2329_v48 }
 0x4db   : > { %v2030_v62 = vpop.f32.mrf.mxu0  ;;  %v2199_v9 = vpop.f32.mrf.mxu1 }
 0x4dc   : > { %v2031_v29 = vadd.f32 %v2030_v62, %v3845_v33  ;;  %v2200_v52 = vadd.f32 %v2199_v9, %v3848_v1 }
 0x4de   : > { %v2330_v31 = vmax.f32 %v2031_v29, 0.0  ;;  %v2331_v32 = vmax.f32 %v2200_v52, 0.0 }
 0x4e0   : > { %2458 = vst [vmem:[%s3855_s29 + $0x3b0] sm:$0xff] %v2330_v31 }
 0x4e1   : > { %2459 = vst [vmem:[%s3855_s29 + $0x3b8] sm:$0xff] %v2331_v32 }
 0x4e3   : > { %v2033_v34 = vpop.f32.mrf.mxu0  ;;  %v2202_v56 = vpop.f32.mrf.mxu1 }
 0x4e4   : > { %v2034_v53 = vadd.f32 %v2033_v34, %v3845_v33  ;;  %v2203_v57 = vadd.f32 %v2202_v56, %v3848_v1 }
 0x4e6   : > { %v2332_v7 = vmax.f32 %v2034_v53, 0.0  ;;  %v2333_v58 = vmax.f32 %v2203_v57, 0.0 }
 0x4e8   : > { %2460 = vst [vmem:[%s3855_s29 + $0x3c0] sm:$0xff] %v2332_v7 }
 0x4e9   : > { %2461 = vst [vmem:[%s3855_s29 + $0x3c8] sm:$0xff] %v2333_v58 }
 0x4eb   : > { %v2035_v59 = vpop.f32.mrf.mxu0  ;;  %v2204_v11 = vpop.f32.mrf.mxu1 }
 0x4ec   : > { %v2036_v60 = vadd.f32 %v2035_v59, %v3845_v33  ;;  %v2205_v8 = vadd.f32 %v2204_v11, %v3848_v1 }
 0x4ee   : > { %v2334_v55 = vmax.f32 %v2036_v60, 0.0  ;;  %v2335_v0 = vmax.f32 %v2205_v8, 0.0 }
 0x4f0   : > { %2462 = vst [vmem:[%s3855_s29 + $0x3d0] sm:$0xff] %v2334_v55 }
 0x4f1   : > { %2463 = vst [vmem:[%s3855_s29 + $0x3d8] sm:$0xff] %v2335_v0 }
 0x4f3   : > { %v2038_v39 = vpop.f32.mrf.mxu0  ;;  %v2207_v38 = vpop.f32.mrf.mxu1 }
 0x4f4   : > { %v2039_v19 = vadd.f32 %v2038_v39, %v3845_v33  ;;  %v2208_v5 = vadd.f32 %v2207_v38, %v3848_v1 }
 0x4f6   : > { %v2336_v51 = vmax.f32 %v2039_v19, 0.0  ;;  %v2337_v37 = vmax.f32 %v2208_v5, 0.0 }
 0x4f8   : > { %2464 = vst [vmem:[%s3855_s29 + $0x3e0] sm:$0xff] %v2336_v51 }
 0x4f9   : > { %2465 = vst [vmem:[%s3855_s29 + $0x3e8] sm:$0xff] %v2337_v37 }
 0x4fb   : > { %v2040_v4 = vpop.f32.mrf.mxu0  ;;  %v2209_v6 = vpop.f32.mrf.mxu1 }
 0x4fc   : > { %v2041_v47 = vadd.f32 %v2040_v4, %v3845_v33  ;;  %v2210_v44 = vadd.f32 %v2209_v6, %v3848_v1 }
 0x4fe   : > { %v2338_v61 = vmax.f32 %v2041_v47, 0.0  ;;  %v2339_v54 = vmax.f32 %v2210_v44, 0.0 }
 0x500   : > { %2466 = vst [vmem:[%s3855_s29 + $0x3f0] sm:$0xff] %v2338_v61 }
 0x501   : > { %2467 = vst [vmem:[%s3855_s29 + $0x3f8] sm:$0xff] %v2339_v54 }
 0x502   : > { %3207 = shalt.err (!%p3204_p8)
}
 0x503   : > { %s3271_s14 = smov 256   ;;  %s3272_s8 = smov 16  }
 0x504   : > { %2914 = dma.vmem_to_hbm [thread:$0]  (%p3397_p13), %s2483_s18, 16384, %s2485_s7, %s2469_s28, %s3271_s14, %s3271_s14, %s3272_s8  }
 0x505 PF: > { %p2951_p9 = scmp.ge.s32.totalorder %s3258_s24, 2  ;;  %s2499_s29 = sand.u32 1, %s3246_s21  }
 0x506   : > { %s2500_s11 = scalar_lea.sflag [#allocation4], %s2499_s29 }
 0x507   : > { %p2937_p10 = pnand %p2951_p9, %p3403_p4 }
 0x509   : > { %p2938_p11 = pneg %p2937_p10 }
 0x50b   : > { %3241 = dma.done.wait (%p2938_p11), %s2500_s11, 16384  }
 0x50c   : > { %3243 = vsyncadd (%p2938_p11), %s2500_s11, 4294950912  ;;  %p22_p0 = scmp.ge.s32.totalorder %s3373_s17, 6   ;;  %s4243_s21 = smov %s3250_s22 }
 0x50d   : > { %s4244_s22 = smov %s3254_s23  ;;  %s4245_s23 = smov %s3385_s20 }
 0x50e   : > { %s4246_s24 = smov %s3373_s17  ;;  %24 = sbr.rel (!%p22_p0) target bundleno = 10 (0xa), region = 110 }
 0x513   :  { %2506 = vsyncpa [#allocation3], 1 }
 0x514   :  { %2508 = vsyncpa [#allocation3 + $0x1], 1 }
 0x515   :  { %2509 = vsyncpa [#allocation6], 1 }
 0x516   :  { %2510 = vsyncpa [#allocation9], 1 }
 0x517   :  { %2511 = vsyncpa [#allocation12], 1 }
 0x518   :  { %2512 = vsyncpa [#allocation4], 1 }
 0x519   :  { %2514 = vsyncpa [#allocation4 + $0x1], 1 }

</bundles_post_ra>
